<compile_context>
chip_gen: v5e
topology: v5e:2x2
jax: 0.10.0
libtpu: 0.0.40
codegen_flags: <defaults>
</compile_context>

<pallas_src>
import functools
import math

import jax
import jax.numpy as jnp
from jax.experimental import pallas as pl
from jax.experimental.pallas import tpu as pltpu

DIM_OUTER = 1     # outer ("CLS") dim of the original branch (see faithfulness note)
DIM_INNER = 128   # inner dim expected by fn (compared branch)


def _project_in_out_kernel(xq_ref, xk_ref, fold_ref, scal_ref, o_ref,
                           q_sc, m_sc, l_sc, acc_sc,
                           *, compute_dtype, softmax_exp_dtype):
    """One (query-tile, kv-tile) grid step of
         out = project_out( fn(project_in(x)) + x )
       with project_in / project_out = nn.Linear (dim_outer == 1) and fn a single-head
       self-attention stand-in for the injected callable.

       fold_ref rows: 0 rq  1 cq  2 rk  3 ck  4 rv  5 cv  6 (Wo @ w_out)  7 pad
       scal_ref (SMEM): [sum(w_out), b_out]
    """
    ki = pl.program_id(1)

    @pl.when(ki == 0)
    def _init():
        # q for this query tile via the rank-1 project_in fold (scale pre-folded into
        # the Wq row): q = x * rq + cq.  Pure VPU broadcast-FMA, no QKV matmul.
        xq = xq_ref[...].astype(jnp.float32)                            # (B, qt, 1)
        q = xq * fold_ref[0:1, :] + fold_ref[1:2, :]                    # (B, qt, D) f32
        q_sc[...] = q.astype(q_sc.dtype)
        m_sc[...] = jnp.full(m_sc.shape, -jnp.inf, jnp.float32)
        l_sc[...] = jnp.zeros(l_sc.shape, jnp.float32)
        acc_sc[...] = jnp.zeros(acc_sc.shape, jnp.float32)

    # k / v for this KV tile via the same rank-1 fold (f32 VPU math -> one cast for MXU).
    xk = xk_ref[...].astype(jnp.float32)                                # (B, kt, 1)
    k = (xk * fold_ref[2:3, :] + fold_ref[3:4, :]).astype(compute_dtype)
    v = (xk * fold_ref[4:5, :] + fold_ref[5:6, :]).astype(compute_dtype)

    # ---- online-softmax attention (MXU hot path, f32 accumulation) ----
    s = jnp.einsum("bqd,bkd->bqk", q_sc[...], k,
                   preferred_element_type=jnp.float32)                  # (B, qt, kt) f32
    m_new = jnp.maximum(m_sc[...], jnp.max(s, axis=-1, keepdims=True))
    alpha = jnp.exp(m_sc[...] - m_new)
    p = jnp.exp((s - m_new).astype(softmax_exp_dtype))                  # EUP
    l_sc[...] = alpha * l_sc[...] + jnp.sum(p.astype(jnp.float32),
                                            axis=-1, keepdims=True)
    acc_sc[...] = alpha * acc_sc[...] + jnp.einsum(
        "bqk,bkd->bqd", p.astype(compute_dtype), v,
        preferred_element_type=jnp.float32)
    m_sc[...] = m_new

    @pl.when(ki == pl.num_programs(1) - 1)
    def _finalize():
        # Exact reciprocal in the strict-f32 path; EUP approx otherwise.
        inv_l = pl.reciprocal(l_sc[...], approx=(compute_dtype != jnp.float32))
        attn = acc_sc[...] * inv_l                                      # (B, qt, D) f32
        # project_out with Wo folded in:       sum(attn * (Wo @ w_out), -1)
        # residual folded through project_out: + x * sum(w_out) + b_out
        y = jnp.sum(attn * fold_ref[6:7, :], axis=-1, keepdims=True)    # (B, qt, 1)
        y = y + xq_ref[...].astype(jnp.float32) * scal_ref[0] + scal_ref[1]
        o_ref[...] = y[:, :, 0].astype(o_ref.dtype)                     # lane-dense store


def init_params(key, dim_outer=DIM_OUTER, dim_inner=DIM_INNER, dtype=jnp.float32):
    """Deterministic parameter init. Linear layers follow nn.Linear's
    U(-1/sqrt(fan_in), 1/sqrt(fan_in)); attention weights are scaled normals."""
    ks = jax.random.split(key, 8)
    bnd_in = 1.0 / math.sqrt(dim_outer)
    bnd_out = 1.0 / math.sqrt(dim_inner)
    return dict(
        w_in=jax.random.uniform(ks[0], (dim_inner, dim_outer), dtype, -bnd_in, bnd_in),
        b_in=jax.random.uniform(ks[1], (dim_inner,), dtype, -bnd_in, bnd_in),
        w_out=jax.random.uniform(ks[2], (dim_outer, dim_inner), dtype, -bnd_out, bnd_out),
        b_out=jax.random.uniform(ks[3], (dim_outer,), dtype, -bnd_out, bnd_out),
        wq=jax.random.normal(ks[4], (dim_inner, dim_inner), dtype) * bnd_out,
        wk=jax.random.normal(ks[5], (dim_inner, dim_inner), dtype) * bnd_out,
        wv=jax.random.normal(ks[6], (dim_inner, dim_inner), dtype) * bnd_out,
        wo=jax.random.normal(ks[7], (dim_inner, dim_inner), dtype) * bnd_out,
    )


def project_in_out(x, params, *, compute_dtype=jnp.bfloat16,
                   softmax_exp_dtype=jnp.float32,   # bf16 only sensible on v6e/v7x
                   q_tile=128, kv_tile=128,
                   vmem_limit_bytes=32 * 1024 * 1024):
    """Pallas forward of ProjectInOut (projection branch, dim_outer=1 != dim_inner).
    compute_dtype is the MXU operand dtype (accumulation is always f32).

    Tile sizing: prefer growing q_tile / kv_tile (they feed the MXU) over batch when N
    grows; VMEM cost per query tile is ~ B*q_tile*(2D*4 + kv_tile*4) bytes, so budget
    against 64 MiB on v7x and the 16/32 MiB scoped defaults on v5e/v6e.
    """
    B, N, dim_outer = x.shape
    D = params["w_in"].shape[0]
    assert dim_outer == DIM_OUTER and D == DIM_INNER
    assert D % 128 == 0
    q_tile = min(q_tile, N)
    kv_tile = min(kv_tile, N)
    assert q_tile % 128 == 0 and kv_tile % 128 == 0, \
        "lane-axis tiles (output N-blocks / score KV-blocks) must be multiples of 128"
    assert N % q_tile == 0 and N % kv_tile == 0

    f32 = jnp.float32
    hi = jax.lax.Precision.HIGHEST
    scale = 1.0 / math.sqrt(D)
    w_in_vec = params["w_in"][:, 0].astype(f32)        # (D,)  rank-1 project_in weight
    b_in = params["b_in"].astype(f32)                  # (D,)
    w_out_vec = params["w_out"][0, :].astype(f32)      # (D,)  rank-1 project_out weight

    def rank1_fold(w, s=1.0):
        w = w.astype(f32)
        return jnp.stack([
            jnp.einsum("d,de->e", w_in_vec, w, precision=hi) * s,   # row:  x-coefficient
            jnp.einsum("d,de->e", b_in, w, precision=hi) * s,       # col:  bias term
        ])

    fold = jnp.concatenate([
        rank1_fold(params["wq"], scale),                             # rows 0,1 (scaled)
        rank1_fold(params["wk"]),                                    # rows 2,3
        rank1_fold(params["wv"]),                                    # rows 4,5
        jnp.einsum("de,e->d", params["wo"].astype(f32), w_out_vec,
                   precision=hi)[None, :],                           # row 6: Wo @ w_out
        jnp.zeros((1, D), f32),                                      # row 7: sublane pad
    ], axis=0)                                                       # (8, D)

    scalars = jnp.stack([jnp.sum(w_out_vec),
                         params["b_out"].astype(f32)[0]])            # [sum(w_out), b_out]

    kernel = functools.partial(_project_in_out_kernel,
                               compute_dtype=compute_dtype,
                               softmax_exp_dtype=softmax_exp_dtype)

    y = pl.pallas_call(
        kernel,
        # Lane-dense output: (B, N) with tokens on the lane axis (unmasked stores).
        out_shape=jax.ShapeDtypeStruct((B, N), x.dtype),
        grid_spec=pltpu.PrefetchScalarGridSpec(
            num_scalar_prefetch=0,
            grid=(N // q_tile, N // kv_tile),                        # (parallel, arbitrary)
            in_specs=[
                pl.BlockSpec((B, q_tile, 1), lambda qi, ki: (0, qi, 0)),   # x, query view
                pl.BlockSpec((B, kv_tile, 1), lambda qi, ki: (0, ki, 0)),  # x, kv view
                pl.BlockSpec((8, D), lambda qi, ki: (0, 0)),               # folded weights
                pl.BlockSpec(memory_space=pltpu.MemorySpace.SMEM),         # scalar folds
            ],
            out_specs=pl.BlockSpec((B, q_tile), lambda qi, ki: (0, qi)),
            scratch_shapes=[
                pltpu.VMEM((B, q_tile, D), compute_dtype),           # q tile (MXU dtype)
                pltpu.VMEM((B, q_tile, 1), jnp.float32),             # running max  m
                pltpu.VMEM((B, q_tile, 1), jnp.float32),             # running denom l
                pltpu.VMEM((B, q_tile, D), jnp.float32),             # unnormalized p@v
            ]),
        compiler_params=pltpu.CompilerParams(
            # Query tiles shard across TensorCores (v7x megacore); the KV axis carries
            # the online-softmax accumulators so it must stay sequential.
            dimension_semantics=("parallel", "arbitrary"),
            vmem_limit_bytes=vmem_limit_bytes),
    )(x, x, fold, scalars)

    return y.reshape(B, N, dim_outer)                  # back to the module's (B, N, 1)


if __name__ == "__main__":
    key = jax.random.PRNGKey(0)
    kx, kp = jax.random.split(key)
    # N=256 -> 2 query tiles ("parallel", sharded across v7x TCs) x 2 KV tiles (flash).
    B, N = 2, 256
    x = jax.random.normal(kx, (B, N, DIM_OUTER), jnp.float32)
    params = init_params(kp)

    # Performance path (bf16 MXU operands, f32 accumulation) and strict-f32 path.
    y_bf16 = project_in_out(x, params, compute_dtype=jnp.bfloat16)
    y_f32 = project_in_out(x, params, compute_dtype=jnp.float32)
    jax.block_until_ready((y_bf16, y_f32))
    assert y_bf16.shape == (B, N, DIM_OUTER) and y_bf16.dtype == x.dtype
    assert y_f32.shape == (B, N, DIM_OUTER)

    # Pure-JAX f32 reference of the module forward, written exactly as the reference:
    #   project_out( fn(project_in(x)) + x )
    def ref_forward(x, params):
        hi = jax.lax.Precision.HIGHEST
        scale = 1.0 / math.sqrt(DIM_INNER)
        h = x * params["w_in"].T + params["b_in"]                  # project_in (do == 1)
        mm = lambda a, b: jnp.einsum("bnd,de->bne", a, b, precision=hi)
        q = mm(h, params["wq"]) * scale
        k = mm(h, params["wk"])
        v = mm(h, params["wv"])
        s = jnp.einsum("bqd,bkd->bqk", q, k, precision=hi)
        p = jax.nn.softmax(s, axis=-1)
        fn_out = mm(jnp.einsum("bqk,bkd->bqd", p, v, precision=hi), params["wo"])
        r = fn_out + x                                             # residual as written
        return jnp.sum(r * params["w_out"], axis=-1, keepdims=True) + params["b_out"]

    ref = ref_forward(x, params)
    err32 = float(jnp.max(jnp.abs(y_f32 - ref)))
    err16 = float(jnp.max(jnp.abs(y_bf16 - ref)))
    assert jnp.allclose(y_f32, ref, atol=5e-3, rtol=5e-3), f"f32 max abs err={err32}"
    assert jnp.allclose(y_bf16, ref, atol=3e-2, rtol=3e-2), f"bf16 max abs err={err16}"

    print("KERNEL_OK")
</pallas_src>

<mosaic_0001>
module attributes {stable_mosaic.version = 11 : i64} {
  func.func @_project_in_out_kernel(%arg0: i32, %arg1: i32, %arg2: memref<2x128x1xf32, #tpu.memory_space<vmem>>, %arg3: memref<2x128x1xf32, #tpu.memory_space<vmem>>, %arg4: memref<8x128xf32, #tpu.memory_space<vmem>>, %arg5: memref<2xf32, #tpu.memory_space<smem>>, %arg6: memref<2x128xf32, #tpu.memory_space<vmem>>, %arg7: memref<2x128x128xbf16, #tpu.memory_space<vmem>>, %arg8: memref<2x128x1xf32, #tpu.memory_space<vmem>>, %arg9: memref<2x128x1xf32, #tpu.memory_space<vmem>>, %arg10: memref<2x128x128xf32, #tpu.memory_space<vmem>>) attributes {dimension_semantics = [#tpu.dimension_semantics<parallel>, #tpu.dimension_semantics<arbitrary>], iteration_bounds = array<i64: 2, 2>, scalar_prefetch = 0 : i64, scratch_operands = 4 : i64, tpu.core_type = #tpu.core_type<tc>, window_params = [{transform_indices = @transform_0, window_bounds = array<i64: 2, 128, 1>}, {transform_indices = @transform_1, window_bounds = array<i64: 2, 128, 1>}, {pipeline_mode = #tpu.pipeline_mode<synchronous>, transform_indices = @transform_2, window_bounds = array<i64: 8, 128>}, {transform_indices = @transform_3, window_bounds = array<i64: 2>}, {transform_indices = @transform_4, window_bounds = array<i64: 2, 128>}]} {
    %c0_i32 = arith.constant 0 : i32
    %0 = arith.cmpi eq, %arg1, %c0_i32 : i32
    %1 = arith.extui %0 : i1 to i32
    %c0_i32_0 = arith.constant 0 : i32
    %2 = arith.cmpi ne, %1, %c0_i32_0 : i32
    scf.if %2 {
      %c0_35 = arith.constant 0 : index
      %c0_36 = arith.constant 0 : index
      %c0_37 = arith.constant 0 : index
      %53 = vector.load %arg2[%c0_35, %c0_36, %c0_37] : memref<2x128x1xf32, #tpu.memory_space<vmem>>, vector<2x128x1xf32>
      %c0_38 = arith.constant 0 : index
      %c0_39 = arith.constant 0 : index
      %54 = vector.load %arg4[%c0_38, %c0_39] : memref<8x128xf32, #tpu.memory_space<vmem>>, vector<1x128xf32>
      %55 = vector.shape_cast %54 : vector<1x128xf32> to vector<1x1x128xf32>
      %56 = vector.broadcast %53 : vector<2x128x1xf32> to vector<2x128x128xf32>
      %57 = vector.broadcast %55 : vector<1x1x128xf32> to vector<2x128x128xf32>
      %58 = arith.mulf %56, %57 : vector<2x128x128xf32>
      %c1 = arith.constant 1 : index
      %c0_40 = arith.constant 0 : index
      %59 = vector.load %arg4[%c1, %c0_40] : memref<8x128xf32, #tpu.memory_space<vmem>>, vector<1x128xf32>
      %60 = vector.shape_cast %59 : vector<1x128xf32> to vector<1x1x128xf32>
      %61 = vector.broadcast %60 : vector<1x1x128xf32> to vector<2x128x128xf32>
      %62 = arith.addf %58, %61 : vector<2x128x128xf32>
      %63 = arith.truncf %62 : vector<2x128x128xf32> to vector<2x128x128xbf16>
      %c0_41 = arith.constant 0 : index
      %c0_42 = arith.constant 0 : index
      %c0_43 = arith.constant 0 : index
      %64 = vector.load %arg7[%c0_41, %c0_42, %c0_43] : memref<2x128x128xbf16, #tpu.memory_space<vmem>>, vector<2x128x128xbf16>
      tpu.vector_store %arg7[%c0_41, %c0_42, %c0_43], %63 {strides = array<i32>} : memref<2x128x128xbf16, #tpu.memory_space<vmem>>, vector<2x128x128xbf16>,
      %cst_44 = arith.constant 0xFF800000 : f32
      %65 = vector.broadcast %cst_44 : f32 to vector<2x128x1xf32>
      %c0_45 = arith.constant 0 : index
      %c0_46 = arith.constant 0 : index
      %c0_47 = arith.constant 0 : index
      %66 = vector.load %arg8[%c0_45, %c0_46, %c0_47] : memref<2x128x1xf32, #tpu.memory_space<vmem>>, vector<2x128x1xf32>
      tpu.vector_store %arg8[%c0_45, %c0_46, %c0_47], %65 {strides = array<i32>} : memref<2x128x1xf32, #tpu.memory_space<vmem>>, vector<2x128x1xf32>,
      %cst_48 = arith.constant 0.000000e+00 : f32
      %67 = vector.broadcast %cst_48 : f32 to vector<2x128x1xf32>
      %c0_49 = arith.constant 0 : index
      %c0_50 = arith.constant 0 : index
      %c0_51 = arith.constant 0 : index
      %68 = vector.load %arg9[%c0_49, %c0_50, %c0_51] : memref<2x128x1xf32, #tpu.memory_space<vmem>>, vector<2x128x1xf32>
      tpu.vector_store %arg9[%c0_49, %c0_50, %c0_51], %67 {strides = array<i32>} : memref<2x128x1xf32, #tpu.memory_space<vmem>>, vector<2x128x1xf32>,
      %cst_52 = arith.constant 0.000000e+00 : f32
      %69 = vector.broadcast %cst_52 : f32 to vector<2x128x128xf32>
      %c0_53 = arith.constant 0 : index
      %c0_54 = arith.constant 0 : index
      %c0_55 = arith.constant 0 : index
      %70 = vector.load %arg10[%c0_53, %c0_54, %c0_55] : memref<2x128x128xf32, #tpu.memory_space<vmem>>, vector<2x128x128xf32>
      tpu.vector_store %arg10[%c0_53, %c0_54, %c0_55], %69 {strides = array<i32>} : memref<2x128x128xf32, #tpu.memory_space<vmem>>, vector<2x128x128xf32>,
    } else {
    }
    %c0 = arith.constant 0 : index
    %c0_1 = arith.constant 0 : index
    %c0_2 = arith.constant 0 : index
    %3 = vector.load %arg3[%c0, %c0_1, %c0_2] : memref<2x128x1xf32, #tpu.memory_space<vmem>>, vector<2x128x1xf32>
    %c2 = arith.constant 2 : index
    %c0_3 = arith.constant 0 : index
    %4 = vector.load %arg4[%c2, %c0_3] : memref<8x128xf32, #tpu.memory_space<vmem>>, vector<1x128xf32>
    %5 = vector.shape_cast %4 : vector<1x128xf32> to vector<1x1x128xf32>
    %6 = vector.broadcast %3 : vector<2x128x1xf32> to vector<2x128x128xf32>
    %7 = vector.broadcast %5 : vector<1x1x128xf32> to vector<2x128x128xf32>
    %8 = arith.mulf %6, %7 : vector<2x128x128xf32>
    %c3 = arith.constant 3 : index
    %c0_4 = arith.constant 0 : index
    %9 = vector.load %arg4[%c3, %c0_4] : memref<8x128xf32, #tpu.memory_space<vmem>>, vector<1x128xf32>
    %10 = vector.shape_cast %9 : vector<1x128xf32> to vector<1x1x128xf32>
    %11 = vector.broadcast %10 : vector<1x1x128xf32> to vector<2x128x128xf32>
    %12 = arith.addf %8, %11 : vector<2x128x128xf32>
    %13 = arith.truncf %12 : vector<2x128x128xf32> to vector<2x128x128xbf16>
    %c4 = arith.constant 4 : index
    %c0_5 = arith.constant 0 : index
    %14 = vector.load %arg4[%c4, %c0_5] : memref<8x128xf32, #tpu.memory_space<vmem>>, vector<1x128xf32>
    %15 = vector.shape_cast %14 : vector<1x128xf32> to vector<1x1x128xf32>
    %16 = vector.broadcast %3 : vector<2x128x1xf32> to vector<2x128x128xf32>
    %17 = vector.broadcast %15 : vector<1x1x128xf32> to vector<2x128x128xf32>
    %18 = arith.mulf %16, %17 : vector<2x128x128xf32>
    %c5 = arith.constant 5 : index
    %c0_6 = arith.constant 0 : index
    %19 = vector.load %arg4[%c5, %c0_6] : memref<8x128xf32, #tpu.memory_space<vmem>>, vector<1x128xf32>
    %20 = vector.shape_cast %19 : vector<1x128xf32> to vector<1x1x128xf32>
    %21 = vector.broadcast %20 : vector<1x1x128xf32> to vector<2x128x128xf32>
    %22 = arith.addf %18, %21 : vector<2x128x128xf32>
    %23 = arith.truncf %22 : vector<2x128x128xf32> to vector<2x128x128xbf16>
    %c0_7 = arith.constant 0 : index
    %c0_8 = arith.constant 0 : index
    %c0_9 = arith.constant 0 : index
    %24 = vector.load %arg7[%c0_7, %c0_8, %c0_9] : memref<2x128x128xbf16, #tpu.memory_space<vmem>>, vector<2x128x128xbf16>
    "tpu.trace_start"() <{level = 10 : i32, message = "bqd,bkd->bqk"}> : () -> ()
    %cst = arith.constant dense<0.000000e+00> : vector<2x128x128xf32>
    %25 = tpu.matmul %24, %13, %cst {dimension_numbers = #tpu.dot_dimension_numbers<[2], [2], [1], [1], [0, 0, 0, 1, 1, 1], [0], [0]>} : vector<2x128x128xbf16>, vector<2x128x128xbf16>, vector<2x128x128xf32> -> vector<2x128x128xf32>
    "tpu.trace_stop"() : () -> ()
    %c0_10 = arith.constant 0 : index
    %c0_11 = arith.constant 0 : index
    %c0_12 = arith.constant 0 : index
    %26 = vector.load %arg8[%c0_10, %c0_11, %c0_12] : memref<2x128x1xf32, #tpu.memory_space<vmem>>, vector<2x128x1xf32>
    %cst_13 = arith.constant dense<0xFF800000> : vector<2x128xf32>
    %27 = vector.multi_reduction <maximumf>, %25, %cst_13 [2] : vector<2x128x128xf32> to vector<2x128xf32>
    %28 = vector.shape_cast %27 : vector<2x128xf32> to vector<2x128x1xf32>
    %29 = arith.maximumf %26, %28 : vector<2x128x1xf32>
    %c0_14 = arith.constant 0 : index
    %c0_15 = arith.constant 0 : index
    %c0_16 = arith.constant 0 : index
    %30 = vector.load %arg8[%c0_14, %c0_15, %c0_16] : memref<2x128x1xf32, #tpu.memory_space<vmem>>, vector<2x128x1xf32>
    %31 = arith.subf %30, %29 : vector<2x128x1xf32>
    %32 = math.exp %31 : vector<2x128x1xf32>
    %33 = vector.broadcast %29 : vector<2x128x1xf32> to vector<2x128x128xf32>
    %34 = arith.subf %25, %33 : vector<2x128x128xf32>
    %35 = math.exp %34 : vector<2x128x128xf32>
    %c0_17 = arith.constant 0 : index
    %c0_18 = arith.constant 0 : index
    %c0_19 = arith.constant 0 : index
    %36 = vector.load %arg9[%c0_17, %c0_18, %c0_19] : memref<2x128x1xf32, #tpu.memory_space<vmem>>, vector<2x128x1xf32>
    %37 = arith.mulf %32, %36 : vector<2x128x1xf32>
    %cst_20 = arith.constant dense<0.000000e+00> : vector<2x128xf32>
    %38 = vector.multi_reduction <add>, %35, %cst_20 [2] : vector<2x128x128xf32> to vector<2x128xf32>
    %39 = vector.shape_cast %38 : vector<2x128xf32> to vector<2x128x1xf32>
    %40 = arith.addf %37, %39 : vector<2x128x1xf32>
    %c0_21 = arith.constant 0 : index
    %c0_22 = arith.constant 0 : index
    %c0_23 = arith.constant 0 : index
    %41 = vector.load %arg9[%c0_21, %c0_22, %c0_23] : memref<2x128x1xf32, #tpu.memory_space<vmem>>, vector<2x128x1xf32>
    tpu.vector_store %arg9[%c0_21, %c0_22, %c0_23], %40 {strides = array<i32>} : memref<2x128x1xf32, #tpu.memory_space<vmem>>, vector<2x128x1xf32>,
    %c0_24 = arith.constant 0 : index
    %c0_25 = arith.constant 0 : index
    %c0_26 = arith.constant 0 : index
    %42 = vector.load %arg10[%c0_24, %c0_25, %c0_26] : memref<2x128x128xf32, #tpu.memory_space<vmem>>, vector<2x128x128xf32>
    %43 = vector.broadcast %32 : vector<2x128x1xf32> to vector<2x128x128xf32>
    %44 = arith.mulf %43, %42 : vector<2x128x128xf32>
    %45 = arith.truncf %35 : vector<2x128x128xf32> to vector<2x128x128xbf16>
    "tpu.trace_start"() <{level = 10 : i32, message = "bqk,bkd->bqd"}> : () -> ()
    %cst_27 = arith.constant dense<0.000000e+00> : vector<2x128x128xf32>
    %46 = tpu.matmul %45, %23, %cst_27 {dimension_numbers = #tpu.dot_dimension_numbers<[2], [1], [1], [2], [0, 0, 0, 1, 1, 2], [0], [0]>} : vector<2x128x128xbf16>, vector<2x128x128xbf16>, vector<2x128x128xf32> -> vector<2x128x128xf32>
    "tpu.trace_stop"() : () -> ()
    %47 = arith.addf %44, %46 : vector<2x128x128xf32>
    %c0_28 = arith.constant 0 : index
    %c0_29 = arith.constant 0 : index
    %c0_30 = arith.constant 0 : index
    %48 = vector.load %arg10[%c0_28, %c0_29, %c0_30] : memref<2x128x128xf32, #tpu.memory_space<vmem>>, vector<2x128x128xf32>
    tpu.vector_store %arg10[%c0_28, %c0_29, %c0_30], %47 {strides = array<i32>} : memref<2x128x128xf32, #tpu.memory_space<vmem>>, vector<2x128x128xf32>,
    %c0_31 = arith.constant 0 : index
    %c0_32 = arith.constant 0 : index
    %c0_33 = arith.constant 0 : index
    %49 = vector.load %arg8[%c0_31, %c0_32, %c0_33] : memref<2x128x1xf32, #tpu.memory_space<vmem>>, vector<2x128x1xf32>
    tpu.vector_store %arg8[%c0_31, %c0_32, %c0_33], %29 {strides = array<i32>} : memref<2x128x1xf32, #tpu.memory_space<vmem>>, vector<2x128x1xf32>,
    %c1_i32 = arith.constant 1 : i32
    %50 = arith.cmpi eq, %arg1, %c1_i32 : i32
    %51 = arith.extui %50 : i1 to i32
    %c0_i32_34 = arith.constant 0 : i32
    %52 = arith.cmpi ne, %51, %c0_i32_34 : i32
    scf.if %52 {
      %c0_35 = arith.constant 0 : index
      %c0_36 = arith.constant 0 : index
      %c0_37 = arith.constant 0 : index
      %53 = vector.load %arg9[%c0_35, %c0_36, %c0_37] : memref<2x128x1xf32, #tpu.memory_space<vmem>>, vector<2x128x1xf32>
      %54 = tpu.reciprocal %53 {approx = true} : vector<2x128x1xf32> -> vector<2x128x1xf32>
      %c0_38 = arith.constant 0 : index
      %c0_39 = arith.constant 0 : index
      %c0_40 = arith.constant 0 : index
      %55 = vector.load %arg10[%c0_38, %c0_39, %c0_40] : memref<2x128x128xf32, #tpu.memory_space<vmem>>, vector<2x128x128xf32>
      %56 = vector.broadcast %54 : vector<2x128x1xf32> to vector<2x128x128xf32>
      %57 = arith.mulf %55, %56 : vector<2x128x128xf32>
      %c6 = arith.constant 6 : index
      %c0_41 = arith.constant 0 : index
      %58 = vector.load %arg4[%c6, %c0_41] : memref<8x128xf32, #tpu.memory_space<vmem>>, vector<1x128xf32>
      %59 = vector.shape_cast %58 : vector<1x128xf32> to vector<1x1x128xf32>
      %60 = vector.broadcast %59 : vector<1x1x128xf32> to vector<2x128x128xf32>
      %61 = arith.mulf %57, %60 : vector<2x128x128xf32>
      %cst_42 = arith.constant dense<0.000000e+00> : vector<2x128xf32>
      %62 = vector.multi_reduction <add>, %61, %cst_42 [2] : vector<2x128x128xf32> to vector<2x128xf32>
      %63 = vector.shape_cast %62 : vector<2x128xf32> to vector<2x128x1xf32>
      %c0_43 = arith.constant 0 : index
      %c0_44 = arith.constant 0 : index
      %c0_45 = arith.constant 0 : index
      %64 = vector.load %arg2[%c0_43, %c0_44, %c0_45] : memref<2x128x1xf32, #tpu.memory_space<vmem>>, vector<2x128x1xf32>
      %c0_46 = arith.constant 0 : index
      %65 = memref.load %arg5[%c0_46] : memref<2xf32, #tpu.memory_space<smem>>
      %66 = vector.broadcast %65 : f32 to vector<2x128x1xf32>
      %67 = arith.mulf %64, %66 : vector<2x128x1xf32>
      %68 = arith.addf %63, %67 : vector<2x128x1xf32>
      %c1 = arith.constant 1 : index
      %69 = memref.load %arg5[%c1] : memref<2xf32, #tpu.memory_space<smem>>
      %70 = vector.broadcast %69 : f32 to vector<2x128x1xf32>
      %71 = arith.addf %68, %70 : vector<2x128x1xf32>
      %72 = vector.shape_cast %71 : vector<2x128x1xf32> to vector<2x128xf32>
      %c0_47 = arith.constant 0 : index
      %c0_48 = arith.constant 0 : index
      %73 = vector.load %arg6[%c0_47, %c0_48] : memref<2x128xf32, #tpu.memory_space<vmem>>, vector<2x128xf32>
      tpu.vector_store %arg6[%c0_47, %c0_48], %72 {strides = array<i32>} : memref<2x128xf32, #tpu.memory_space<vmem>>, vector<2x128xf32>,
    } else {
    }
    return
  }
  func.func @transform_0(%arg0: i32, %arg1: i32) -> (i32, i32, i32) {
    %c0_i32 = arith.constant 0 : i32
    %c0_i32_0 = arith.constant 0 : i32
    %c0_i32_1 = arith.constant 0 : i32
    return %c0_i32, %arg0, %c0_i32_0 : i32, i32, i32
  }
  func.func @transform_1(%arg0: i32, %arg1: i32) -> (i32, i32, i32) {
    %c0_i32 = arith.constant 0 : i32
    %c0_i32_0 = arith.constant 0 : i32
    %c0_i32_1 = arith.constant 0 : i32
    return %c0_i32, %arg1, %c0_i32_0 : i32, i32, i32
  }
  func.func @transform_2(%arg0: i32, %arg1: i32) -> (i32, i32) {
    %c0_i32 = arith.constant 0 : i32
    %c0_i32_0 = arith.constant 0 : i32
    %c0_i32_1 = arith.constant 0 : i32
    return %c0_i32, %c0_i32_0 : i32, i32
  }
  func.func @transform_3(%arg0: i32, %arg1: i32) -> i32 {
    %c0_i32 = arith.constant 0 : i32
    %c0_i32_0 = arith.constant 0 : i32
    return %c0_i32 : i32
  }
  func.func @transform_4(%arg0: i32, %arg1: i32) -> (i32, i32) {
    %c0_i32 = arith.constant 0 : i32
    %c0_i32_0 = arith.constant 0 : i32
    return %c0_i32, %arg0 : i32, i32
  }
}

</mosaic_0001>

<bundles_post_ra>
// kernel: tpu_custom_call.1
= control target key start
LH: loop header
LB: loop body
LE: loop exit
PB: predicated region body
PF: predicated region fallthrough
CT: control target
= control target key end

     0   :  { %s6432_s0 = inlined_call_operand.vmem [shape: f32[2,256,1], index: 0, kind: input, shape index: {}]   ;;  %s6433_s1 = inlined_call_operand.vmem [shape: f32[2,256,1], index: 1, kind: input, shape index: {}]   ;;  %s6434_s2 = inlined_call_operand.vmem [shape: f32[8,128], index: 2, kind: input, shape index: {}]   ;;  %s6435_s3 = inlined_call_operand.vmem [shape: f32[2], index: 3, kind: input, shape index: {}]   ;;  %s6436_s4 = inlined_call_operand.hbm [shape: f32[2,256], index: 4, kind: output, shape index: {}]  }
   0x1   :  { %6468 = sst [smem:[#allocation45_spill]] %s6432_s0 }
   0x2   :  { %6469 = sst [smem:[#allocation46_spill]] %s6435_s3 }
   0x3   :  { %9 = vsyncpa [#allocation10], 0 }
   0x4   :  { %10 = vsyncpa [#allocation9], 0 }
   0x5   :  { %12 = vsyncpa [#allocation9 + $0x1], 0  ;;  %s4561_s15 = smov 0   ;;  %s4563_s16 = smov 0  }
   0x6   :  { %s4565_s17 = smov 0   ;;  %s4567_s18 = smov 0  }
   0x7   :  { %s4569_s19 = smov 0   ;;  %s4571_s20 = smov 0  }
   0x8   :  { %s4573_s21 = smov 0   ;;  %s4575_s22 = smov 0  }
   0x9   :  { %s4577_s23 = smov 0   ;;  %s4579_s24 = smov 0  }
   0xa LB: > { %s3888_s25 = sadd.s32 4294967295, %s4528_s24   ;;  %s3889_s26 = sadd.s32 4294967294, %s4528_s24   ;;  %s4528_s24 = sphi %s4579_s24, %s18_s24   ;;  %s4524_s23 = sphi %s4577_s23, %s6555_s23   ;;  %s4520_s22 = sphi %s4575_s22, %s6554_s22   ;;  %s4516_s21 = sphi %s4573_s21, %s6553_s21   ;;  %s4512_s20 = sphi %s4571_s20, %s6552_s20   ;;  %s4508_s19 = sphi %s4569_s19, %s6551_s19   ;;  %s4504_s18 = sphi %s4567_s18, %s6550_s18   ;;  %s4500_s17 = sphi %s4565_s17, %s6549_s17   ;;  %s4496_s16 = sphi %s4563_s16, %s6548_s16   ;;  %s4492_s15 = sphi %s4561_s15, %s6547_s15  }
   0xb   : > { %s27_s27 = sadd.s32 1, %s4520_s22  ;;  %s30_s28 = sadd.s32 1, %s4524_s23 }
   0xc   : > { %p28_p0 = scmp.ge.s32.totalorder %s27_s27, 2  ;;  %s37_s29 = sadd.s32 1, %s4508_s19 }
   0xd   : > { %p44_p1 = scmp.ne.s32.totalorder %s4508_s19, %s4504_s18  ;;  %p45_p2 = scmp.eq.s32.totalorder %s4528_s24, 0 }
   0xe   : > { %s6557_s27 = smov (%p28_p0, %s27_s27), 0  ;;  %s6559_s28 = smov (!%p28_p0, %s30_s28), %s4524_s23 }
   0xf   : > { %p4625_p3 = por %p45_p2, %p44_p1  ;;  %s60_s5 = ssub.s32 %s4520_s22, %s6557_s27 }
  0x10   : > { %p32_p4 = scmp.ge.s32.totalorder %s6559_s28, 2  ;;  %p61_p5 = scmp.eq.s32.totalorder %s60_s5, 0 }
  0x11   : > { %s63_s6 = sadd.s32 1, %s4500_s17  ;;  %p70_p6 = scmp.ne.s32.totalorder %s4500_s17, %s4496_s16 }
  0x12   : > { %s6561_s28 = smov (%p32_p4, %s6559_s28), 0  ;;  %p142_p9 = scmp.eq.s32.totalorder %s3888_s25, 3 }
  0x13   : > { %6471 = sst [smem:[#allocation14_spill]] %s6561_s28  ;;  %s34_s8 = ssub.s32 %s4524_s23, %s6561_s28 }
  0x14   : > { %s4637_s7 = scalar_select %p61_p5, %s4500_s17, %s63_s6  }
  0x15   : > { %p4641_p7 = por %p70_p6, %p45_p2  ;;  %p35_p8 = scmp.eq.s32.totalorder %s34_s8, 0 }
  0x16   : > { %p147_p10 = scmp.ne.s32.totalorder %s4504_s18, %s4492_s15  ;;  %p148_p11 = scmp.eq.s32.totalorder %s3889_s26, 3 }
  0x17   : > { %s4648_s10 = scalar_select %p35_p8, %s4508_s19, %s37_s29  }
  0x18   : > { %p4653_p12 = por %p142_p9, %p44_p1  ;;  %p4657_p13 = por %p148_p11, %p147_p10 }
  0x19   : > { %p3890_p0 = scmp.ge.s32.totalorder %s4528_s24, 1  ;;  %p155_p2 = scmp.lt.s32.totalorder %s4528_s24, 5 }
  0x1a   : > { %p4663_p4 = scmp.eq.s32.totalorder %s3888_s25, 0  ;;  %s6477_s3 = sld [smem:[#allocation46_spill]] }
  0x1b   : > { %p4667_p5 = pnand %p3890_p0, %p155_p2  ;;  %s4530_s6 = smov [#allocation8]  }
  0x1c   : > { %p3892_p8 = scmp.ge.s32.totalorder %s4528_s24, 4 }
  0x1d   : > { %p4094_p1 = pneg %p4667_p5 }
  0x1e   : > { %177 = sbr.rel (%p3892_p8) target bundleno = 113 (0x71), region = 24 }
  0x1f   : > { %p4095_p6 = pnand %p4663_p4, %p4094_p1 }
  0x20   : > { %s170_s5 = sshll.u32 %s6477_s3, 4  ;;  %s171_s5 = int_to_ptr.vmem [resolvable:$true] %s170_s5 }
  0x21   : > { %4097 = dma.vmem_to_smem (!%p4095_p6), %s171_s5, 16, %s4530_s6, [#allocation10]  }
  0x23   : > { %180 = sbr.rel (!%p4625_p3) target bundleno = 77 (0x4d), region = 28  ;;  %s182_s25 = sand.u32 (%p4625_p3), 1, %s4508_s19  }
  0x24   : > { %s3975_s8 = sshll.u32 (%p4625_p3), %s4524_s23, 7  ;;  %s3893_s26 = sshll.u32 (%p4625_p3), %s182_s25, 8 }
  0x25   : > { %s6478_s0 = sld [smem:[#allocation45_spill]] (%p4625_p3)  ;;  %s4691_s30 = scalar_lea.vmem (%p4625_p3), [#allocation6], %s3893_s26 }
  0x2b   : > { %s4686_s28 = scalar_lea.vmem %s6478_s0, %s3975_s8 }
  0x2c   : > { %v278_v0 = vld [vmem:[%s4686_s28] sm:$0xff]  ;;  %v280_v1 = vld [vmem:[%s4686_s28 + $0x8] sm:$0xff]  ;;  %v282_v2 = vld [vmem:[%s4686_s28 + $0x10] sm:$0xff] }
  0x2d   : > { %279 = vst [vmem:[%s4691_s30] sm:$0xff] %v278_v0  ;;  %v284_v3 = vld [vmem:[%s4686_s28 + $0x18] sm:$0xff]  ;;  %v286_v4 = vld [vmem:[%s4686_s28 + $0x20] sm:$0xff]  ;;  %v288_v5 = vld [vmem:[%s4686_s28 + $0x28] sm:$0xff] }
  0x2e   : > { %281 = vst [vmem:[%s4691_s30 + $0x8] sm:$0xff] %v280_v1  ;;  %v290_v6 = vld [vmem:[%s4686_s28 + $0x30] sm:$0xff]  ;;  %v292_v7 = vld [vmem:[%s4686_s28 + $0x38] sm:$0xff]  ;;  %v294_v8 = vld [vmem:[%s4686_s28 + $0x40] sm:$0xff] }
  0x2f   : > { %283 = vst [vmem:[%s4691_s30 + $0x10] sm:$0xff] %v282_v2  ;;  %v296_v9 = vld [vmem:[%s4686_s28 + $0x48] sm:$0xff]  ;;  %v298_v10 = vld [vmem:[%s4686_s28 + $0x50] sm:$0xff]  ;;  %v300_v11 = vld [vmem:[%s4686_s28 + $0x58] sm:$0xff] }
  0x30   : > { %285 = vst [vmem:[%s4691_s30 + $0x18] sm:$0xff] %v284_v3  ;;  %v302_v12 = vld [vmem:[%s4686_s28 + $0x60] sm:$0xff]  ;;  %v304_v13 = vld [vmem:[%s4686_s28 + $0x68] sm:$0xff]  ;;  %v306_v14 = vld [vmem:[%s4686_s28 + $0x70] sm:$0xff] }
  0x31   : > { %287 = vst [vmem:[%s4691_s30 + $0x20] sm:$0xff] %v286_v4  ;;  %v308_v15 = vld [vmem:[%s4686_s28 + $0x78] sm:$0xff]  ;;  %v310_v16 = vld [vmem:[%s4686_s28 + $0x100] sm:$0xff]  ;;  %v312_v17 = vld [vmem:[%s4686_s28 + $0x108] sm:$0xff] }
  0x32   : > { %289 = vst [vmem:[%s4691_s30 + $0x28] sm:$0xff] %v288_v5  ;;  %v314_v18 = vld [vmem:[%s4686_s28 + $0x110] sm:$0xff]  ;;  %v316_v19 = vld [vmem:[%s4686_s28 + $0x118] sm:$0xff]  ;;  %v318_v20 = vld [vmem:[%s4686_s28 + $0x120] sm:$0xff] }
  0x33   : > { %291 = vst [vmem:[%s4691_s30 + $0x30] sm:$0xff] %v290_v6  ;;  %v320_v21 = vld [vmem:[%s4686_s28 + $0x128] sm:$0xff]  ;;  %v322_v22 = vld [vmem:[%s4686_s28 + $0x130] sm:$0xff]  ;;  %v324_v23 = vld [vmem:[%s4686_s28 + $0x138] sm:$0xff] }
  0x34   : > { %293 = vst [vmem:[%s4691_s30 + $0x38] sm:$0xff] %v292_v7  ;;  %v326_v24 = vld [vmem:[%s4686_s28 + $0x140] sm:$0xff]  ;;  %v328_v25 = vld [vmem:[%s4686_s28 + $0x148] sm:$0xff]  ;;  %v330_v26 = vld [vmem:[%s4686_s28 + $0x150] sm:$0xff] }
  0x35   : > { %295 = vst [vmem:[%s4691_s30 + $0x40] sm:$0xff] %v294_v8  ;;  %v332_v27 = vld [vmem:[%s4686_s28 + $0x158] sm:$0xff]  ;;  %v334_v28 = vld [vmem:[%s4686_s28 + $0x160] sm:$0xff]  ;;  %v336_v29 = vld [vmem:[%s4686_s28 + $0x168] sm:$0xff] }
  0x36   : > { %297 = vst [vmem:[%s4691_s30 + $0x48] sm:$0xff] %v296_v9  ;;  %v338_v30 = vld [vmem:[%s4686_s28 + $0x170] sm:$0xff]  ;;  %v340_v31 = vld [vmem:[%s4686_s28 + $0x178] sm:$0xff] }
  0x37   : > { %299 = vst [vmem:[%s4691_s30 + $0x50] sm:$0xff] %v298_v10 }
  0x38   : > { %301 = vst [vmem:[%s4691_s30 + $0x58] sm:$0xff] %v300_v11 }
  0x39   : > { %303 = vst [vmem:[%s4691_s30 + $0x60] sm:$0xff] %v302_v12 }
  0x3a   : > { %305 = vst [vmem:[%s4691_s30 + $0x68] sm:$0xff] %v304_v13 }
  0x3b   : > { %307 = vst [vmem:[%s4691_s30 + $0x70] sm:$0xff] %v306_v14 }
  0x3c   : > { %309 = vst [vmem:[%s4691_s30 + $0x78] sm:$0xff] %v308_v15 }
  0x3d   : > { %311 = vst [vmem:[%s4691_s30 + $0x80] sm:$0xff] %v310_v16 }
  0x3e   : > { %313 = vst [vmem:[%s4691_s30 + $0x88] sm:$0xff] %v312_v17 }
  0x3f   : > { %315 = vst [vmem:[%s4691_s30 + $0x90] sm:$0xff] %v314_v18 }
  0x40   : > { %317 = vst [vmem:[%s4691_s30 + $0x98] sm:$0xff] %v316_v19 }
  0x41   : > { %319 = vst [vmem:[%s4691_s30 + $0xa0] sm:$0xff] %v318_v20 }
  0x42   : > { %321 = vst [vmem:[%s4691_s30 + $0xa8] sm:$0xff] %v320_v21 }
  0x43   : > { %323 = vst [vmem:[%s4691_s30 + $0xb0] sm:$0xff] %v322_v22 }
  0x44   : > { %325 = vst [vmem:[%s4691_s30 + $0xb8] sm:$0xff] %v324_v23 }
  0x45   : > { %327 = vst [vmem:[%s4691_s30 + $0xc0] sm:$0xff] %v326_v24 }
  0x46   : > { %329 = vst [vmem:[%s4691_s30 + $0xc8] sm:$0xff] %v328_v25 }
  0x47   : > { %331 = vst [vmem:[%s4691_s30 + $0xd0] sm:$0xff] %v330_v26 }
  0x48   : > { %333 = vst [vmem:[%s4691_s30 + $0xd8] sm:$0xff] %v332_v27 }
  0x49   : > { %335 = vst [vmem:[%s4691_s30 + $0xe0] sm:$0xff] %v334_v28 }
  0x4a   : > { %337 = vst [vmem:[%s4691_s30 + $0xe8] sm:$0xff] %v336_v29 }
  0x4b   : > { %339 = vst [vmem:[%s4691_s30 + $0xf0] sm:$0xff] %v338_v30 }
  0x4c   : > { %341 = vst [vmem:[%s4691_s30 + $0xf8] sm:$0xff] %v340_v31 }
  0x4d PF: > { %347 = sbr.rel (!%p4641_p7) target bundleno = 113 (0x71), region = 66  ;;  %s349_s3 = sand.u32 (%p4641_p7), 1, %s4500_s17  }
  0x4e   : > { %s3976_s5 = sshll.u32 (%p4641_p7), %s4520_s22, 7  ;;  %s3896_s6 = sshll.u32 (%p4641_p7), %s349_s3, 8 }
  0x4f   : > { %s4761_s26 = scalar_lea.vmem (%p4641_p7), %s6433_s1, %s3976_s5  ;;  %s4766_s28 = scalar_lea.vmem (%p4641_p7), [#allocation7], %s3896_s6 }
  0x50   : > { %v445_v32 = vld [vmem:[%s4761_s26] sm:$0xff] (%p4641_p7)  ;;  %v447_v33 = vld [vmem:[%s4761_s26 + $0x8] sm:$0xff] (%p4641_p7)  ;;  %v449_v34 = vld [vmem:[%s4761_s26 + $0x10] sm:$0xff] (%p4641_p7) }
  0x51   : > { %446 = vst [vmem:[%s4766_s28] sm:$0xff] (%p4641_p7), %v445_v32  ;;  %v451_v35 = vld [vmem:[%s4761_s26 + $0x18] sm:$0xff] (%p4641_p7)  ;;  %v453_v36 = vld [vmem:[%s4761_s26 + $0x20] sm:$0xff] (%p4641_p7)  ;;  %v455_v37 = vld [vmem:[%s4761_s26 + $0x28] sm:$0xff] (%p4641_p7) }
  0x52   : > { %448 = vst [vmem:[%s4766_s28 + $0x8] sm:$0xff] %v447_v33  ;;  %v457_v38 = vld [vmem:[%s4761_s26 + $0x30] sm:$0xff]  ;;  %v459_v39 = vld [vmem:[%s4761_s26 + $0x38] sm:$0xff]  ;;  %v461_v40 = vld [vmem:[%s4761_s26 + $0x40] sm:$0xff] }
  0x53   : > { %450 = vst [vmem:[%s4766_s28 + $0x10] sm:$0xff] %v449_v34  ;;  %v463_v41 = vld [vmem:[%s4761_s26 + $0x48] sm:$0xff]  ;;  %v465_v42 = vld [vmem:[%s4761_s26 + $0x50] sm:$0xff]  ;;  %v467_v43 = vld [vmem:[%s4761_s26 + $0x58] sm:$0xff] }
  0x54   : > { %452 = vst [vmem:[%s4766_s28 + $0x18] sm:$0xff] %v451_v35  ;;  %v469_v44 = vld [vmem:[%s4761_s26 + $0x60] sm:$0xff]  ;;  %v471_v45 = vld [vmem:[%s4761_s26 + $0x68] sm:$0xff]  ;;  %v473_v46 = vld [vmem:[%s4761_s26 + $0x70] sm:$0xff] }
  0x55   : > { %454 = vst [vmem:[%s4766_s28 + $0x20] sm:$0xff] %v453_v36  ;;  %v475_v47 = vld [vmem:[%s4761_s26 + $0x78] sm:$0xff]  ;;  %v477_v48 = vld [vmem:[%s4761_s26 + $0x100] sm:$0xff]  ;;  %v479_v49 = vld [vmem:[%s4761_s26 + $0x108] sm:$0xff] }
  0x56   : > { %456 = vst [vmem:[%s4766_s28 + $0x28] sm:$0xff] %v455_v37  ;;  %v481_v50 = vld [vmem:[%s4761_s26 + $0x110] sm:$0xff]  ;;  %v483_v51 = vld [vmem:[%s4761_s26 + $0x118] sm:$0xff]  ;;  %v485_v52 = vld [vmem:[%s4761_s26 + $0x120] sm:$0xff] }
  0x57   : > { %458 = vst [vmem:[%s4766_s28 + $0x30] sm:$0xff] %v457_v38  ;;  %v487_v53 = vld [vmem:[%s4761_s26 + $0x128] sm:$0xff]  ;;  %v489_v54 = vld [vmem:[%s4761_s26 + $0x130] sm:$0xff]  ;;  %v491_v55 = vld [vmem:[%s4761_s26 + $0x138] sm:$0xff] }
  0x58   : > { %460 = vst [vmem:[%s4766_s28 + $0x38] sm:$0xff] %v459_v39  ;;  %v493_v56 = vld [vmem:[%s4761_s26 + $0x140] sm:$0xff]  ;;  %v495_v57 = vld [vmem:[%s4761_s26 + $0x148] sm:$0xff]  ;;  %v497_v58 = vld [vmem:[%s4761_s26 + $0x150] sm:$0xff] }
  0x59   : > { %462 = vst [vmem:[%s4766_s28 + $0x40] sm:$0xff] %v461_v40  ;;  %v499_v59 = vld [vmem:[%s4761_s26 + $0x158] sm:$0xff]  ;;  %v501_v60 = vld [vmem:[%s4761_s26 + $0x160] sm:$0xff]  ;;  %v503_v61 = vld [vmem:[%s4761_s26 + $0x168] sm:$0xff] }
  0x5a   : > { %464 = vst [vmem:[%s4766_s28 + $0x48] sm:$0xff] %v463_v41  ;;  %v505_v62 = vld [vmem:[%s4761_s26 + $0x170] sm:$0xff]  ;;  %v507_v63 = vld [vmem:[%s4761_s26 + $0x178] sm:$0xff] }
  0x5b   : > { %466 = vst [vmem:[%s4766_s28 + $0x50] sm:$0xff] %v465_v42 }
  0x5c   : > { %468 = vst [vmem:[%s4766_s28 + $0x58] sm:$0xff] %v467_v43 }
  0x5d   : > { %470 = vst [vmem:[%s4766_s28 + $0x60] sm:$0xff] %v469_v44 }
  0x5e   : > { %472 = vst [vmem:[%s4766_s28 + $0x68] sm:$0xff] %v471_v45 }
  0x5f   : > { %474 = vst [vmem:[%s4766_s28 + $0x70] sm:$0xff] %v473_v46 }
  0x60   : > { %476 = vst [vmem:[%s4766_s28 + $0x78] sm:$0xff] %v475_v47 }
  0x61   : > { %478 = vst [vmem:[%s4766_s28 + $0x80] sm:$0xff] %v477_v48 }
  0x62   : > { %480 = vst [vmem:[%s4766_s28 + $0x88] sm:$0xff] %v479_v49 }
  0x63   : > { %482 = vst [vmem:[%s4766_s28 + $0x90] sm:$0xff] %v481_v50 }
  0x64   : > { %484 = vst [vmem:[%s4766_s28 + $0x98] sm:$0xff] %v483_v51 }
  0x65   : > { %486 = vst [vmem:[%s4766_s28 + $0xa0] sm:$0xff] %v485_v52 }
  0x66   : > { %488 = vst [vmem:[%s4766_s28 + $0xa8] sm:$0xff] %v487_v53 }
  0x67   : > { %490 = vst [vmem:[%s4766_s28 + $0xb0] sm:$0xff] %v489_v54 }
  0x68   : > { %492 = vst [vmem:[%s4766_s28 + $0xb8] sm:$0xff] %v491_v55 }
  0x69   : > { %494 = vst [vmem:[%s4766_s28 + $0xc0] sm:$0xff] %v493_v56 }
  0x6a   : > { %496 = vst [vmem:[%s4766_s28 + $0xc8] sm:$0xff] %v495_v57 }
  0x6b   : > { %498 = vst [vmem:[%s4766_s28 + $0xd0] sm:$0xff] %v497_v58 }
  0x6c   : > { %500 = vst [vmem:[%s4766_s28 + $0xd8] sm:$0xff] %v499_v59 }
  0x6d   : > { %502 = vst [vmem:[%s4766_s28 + $0xe0] sm:$0xff] %v501_v60 }
  0x6e   : > { %504 = vst [vmem:[%s4766_s28 + $0xe8] sm:$0xff] %v503_v61 }
  0x6f   : > { %506 = vst [vmem:[%s4766_s28 + $0xf0] sm:$0xff] %v505_v62 }
  0x70   : > { %508 = vst [vmem:[%s4766_s28 + $0xf8] sm:$0xff] %v507_v63 }
  0x71 PF: > { %517 = sbr.rel (%p4667_p5) target bundleno = 2155 (0x86b), region = 104 }
  0x76   : > { %s4832_s9 = sand.u32 1, %s4504_s18   ;;  %s527_s29 = sand.u32 1, %s4496_s16  }
  0x77   : > { %s3900_s30 = sshll.u32 %s4832_s9, 8  ;;  %s3901_s3 = sshll.u32 %s527_s29, 8 }
  0x78   : > { %s4836_s5 = scalar_lea.vmem [#allocation6], %s3900_s30  ;;  %s4838_s6 = scalar_lea.vmem [#allocation7], %s3901_s3 }
  0x79   : > { %4483 = dma.done.wait (%p4663_p4), [#allocation10], 16  }
  0x7a   : > { %4485 = vsyncadd (%p4663_p4), [#allocation10], 4294967280 }
  0x7b   : > { %538 = sfence }
  0x7c   : > { %s3903_s14 = sshll.u32 %s4832_s9, 1  ;;  %p3904_p3 = scmp.ne.s32.totalorder %s4512_s20, 0 }
  0x7d   : > { %s4845_s25 = scalar_lea.vmem [#allocation11], %s3903_s14 }
  0x7e   : > { %567 = sbr.rel (%p3904_p3) target bundleno = 395 (0x18b), region = 120 }
  0x83   : > { %v572_v0 = vld [vmem:[%s4836_s5 + $0x20] sm:$0xff]  ;;  %v570_v1 = vld [vmem:[%s4836_s5 + $0x10] sm:$0xff]  ;;  %v4531_v3 = vmov 0   ;;  %v573_v4 = vld [vmem:[%s4836_s5 + $0x28] sm:$0xff]  ;;  %vm892_vm0 = vcmask 7168  }
  0x84   : > { %v568_v2 = vld [vmem:[%s4836_s5] sm:$0xff]  ;;  %4193 = vset.pattern.permute.xlu2 %v4531_v3  ;;  %4192 = vset.pattern.permute.xlu1 %v4531_v3  ;;  %v571_v5 = vld [vmem:[%s4836_s5 + $0x18] sm:$0xff]  ;;  %v569_v6 = vld [vmem:[%s4836_s5 + $0x8] sm:$0xff] }
  0x85   : > { %4191 = vset.pattern.permute.xlu0 %v4531_v3  ;;  %623 = vperm.xlu2 %4193, %v572_v0   ;;  %v576_v7 = vld [vmem:[%s4836_s5 + $0x40] sm:$0xff]  ;;  %v575_v8 = vld [vmem:[%s4836_s5 + $0x38] sm:$0xff]  ;;  %v574_v9 = vld [vmem:[%s4836_s5 + $0x30] sm:$0xff] }
  0x86   : > { %613 = vperm.xlu1 %4192, %v570_v1   ;;  %603 = vperm.xlu0 %4191, %v568_v2   ;;  %v579_v10 = vld [vmem:[%s4836_s5 + $0x58] sm:$0xff]  ;;  %v578_v11 = vld [vmem:[%s4836_s5 + $0x50] sm:$0xff]  ;;  %v577_v12 = vld [vmem:[%s4836_s5 + $0x48] sm:$0xff] }
  0x87   : > { %v582_v13 = vld [vmem:[%s4836_s5 + $0x70] sm:$0xff]  ;;  %v581_v14 = vld [vmem:[%s4836_s5 + $0x68] sm:$0xff]  ;;  %v580_v15 = vld [vmem:[%s4836_s5 + $0x60] sm:$0xff] }
  0x88   : > { %v585_v16 = vld [vmem:[%s4836_s5 + $0x88] sm:$0xff]  ;;  %v584_v17 = vld [vmem:[%s4836_s5 + $0x80] sm:$0xff]  ;;  %v583_v18 = vld [vmem:[%s4836_s5 + $0x78] sm:$0xff] }
  0x89   : > { %v588_v19 = vld [vmem:[%s4836_s5 + $0xa0] sm:$0xff]  ;;  %v587_v20 = vld [vmem:[%s4836_s5 + $0x98] sm:$0xff]  ;;  %v586_v21 = vld [vmem:[%s4836_s5 + $0x90] sm:$0xff] }
  0x8a   : > { %v591_v22 = vld [vmem:[%s4836_s5 + $0xb8] sm:$0xff]  ;;  %v590_v23 = vld [vmem:[%s4836_s5 + $0xb0] sm:$0xff]  ;;  %v589_v24 = vld [vmem:[%s4836_s5 + $0xa8] sm:$0xff] }
  0x8b   : > { %v594_v25 = vld [vmem:[%s4836_s5 + $0xd0] sm:$0xff]  ;;  %v593_v26 = vld [vmem:[%s4836_s5 + $0xc8] sm:$0xff]  ;;  %v592_v27 = vld [vmem:[%s4836_s5 + $0xc0] sm:$0xff] }
  0x8c   : > { %v597_v28 = vld [vmem:[%s4836_s5 + $0xe8] sm:$0xff]  ;;  %v596_v29 = vld [vmem:[%s4836_s5 + $0xe0] sm:$0xff]  ;;  %v595_v30 = vld [vmem:[%s4836_s5 + $0xd8] sm:$0xff] }
  0x8d   : > { %628 = vperm.xlu2 %4193, %v573_v4   ;;  %v599_v31 = vld [vmem:[%s4836_s5 + $0xf8] sm:$0xff]  ;;  %v598_v32 = vld [vmem:[%s4836_s5 + $0xf0] sm:$0xff]  ;;  %v4883_v34 = vld [vmem:[%s6434_s2] ss:$0 sm:$0xff] }
  0x8e   : > { %618 = vperm.xlu1 %4192, %v571_v5   ;;  %608 = vperm.xlu0 %4191, %v569_v6   ;;  %v4889_v36 = vld [vmem:[%s6434_s2 + $0x1] ss:$0 sm:$0xff] }
  0x95   : > { %643 = vperm.xlu2 %4193, %v576_v7  }
  0x96   : > { %638 = vperm.xlu1 %4192, %v575_v8   ;;  %633 = vperm.xlu0 %4191, %v574_v9  }
  0x9d   : > { %658 = vperm.xlu2 %4193, %v579_v10  }
  0x9e   : > { %653 = vperm.xlu1 %4192, %v578_v11   ;;  %648 = vperm.xlu0 %4191, %v577_v12  }
  0xa5   : > { %673 = vperm.xlu2 %4193, %v582_v13  }
  0xa6   : > { %668 = vperm.xlu1 %4192, %v581_v14   ;;  %663 = vperm.xlu0 %4191, %v580_v15  }
  0xad   : > { %688 = vperm.xlu2 %4193, %v585_v16  }
  0xae   : > { %683 = vperm.xlu1 %4192, %v584_v17   ;;  %678 = vperm.xlu0 %4191, %v583_v18  }
  0xb5   : > { %703 = vperm.xlu2 %4193, %v588_v19  }
  0xb6   : > { %698 = vperm.xlu1 %4192, %v587_v20   ;;  %693 = vperm.xlu0 %4191, %v586_v21  }
  0xbd   : > { %718 = vperm.xlu2 %4193, %v591_v22  }
  0xbe   : > { %713 = vperm.xlu1 %4192, %v590_v23   ;;  %708 = vperm.xlu0 %4191, %v589_v24  }
  0xc5   : > { %733 = vperm.xlu2 %4193, %v594_v25  }
  0xc6   : > { %728 = vperm.xlu1 %4192, %v593_v26   ;;  %723 = vperm.xlu0 %4191, %v592_v27  }
  0xcd   : > { %748 = vperm.xlu2 %4193, %v597_v28  }
  0xce   : > { %743 = vperm.xlu1 %4192, %v596_v29   ;;  %738 = vperm.xlu0 %4191, %v595_v30  }
  0xd6   : > { %758 = vperm.xlu1 %4192, %v599_v31   ;;  %753 = vperm.xlu0 %4191, %v598_v32  }
  0xdf   : > { %v624_v33 = vpop.permute.xlu2 %623 }
  0xe0   : > { %v766_v35 = vmul.f32 %v4883_v34, %v624_v33 }
  0xe2   : > { %v800_v38 = vadd.f32 %v4889_v36, %v766_v35 }
  0xe7   : > { %v629_v37 = vpop.permute.xlu2 %628 }
  0xe8   : > { %v767_v39 = vmul.f32 %v4883_v34, %v629_v37 }
  0xea   : > { %v801_v40 = vadd.f32 %v4889_v36, %v767_v39 }
  0xec   : > { %v4006_v41 = vpack.c.bf16 %v801_v40, %v800_v38 }
  0xee   : > { %4074 = vst [vmem:[#allocation2 + $0x58] sm:$0xff] %v4006_v41  }
  0xef   : > { %v644_v42 = vpop.permute.xlu2 %643 }
  0xf0   : > { %v770_v2 = vmul.f32 %v4883_v34, %v644_v42 }
  0xf2   : > { %v804_v8 = vadd.f32 %v4889_v36, %v770_v2 }
  0xf7   : > { %v659_v45 = vpop.permute.xlu2 %658 }
  0xf8   : > { %v614_v43 = vpop.permute.xlu1 %613  ;;  %v604_v44 = vpop.permute.xlu0 %603  ;;  %v773_v3 = vmul.f32 %v4883_v34, %v659_v45 }
  0xf9   : > { %v764_v46 = vmul.f32 %v4883_v34, %v614_v43  ;;  %v762_v47 = vmul.f32 %v4883_v34, %v604_v44 }
  0xfa   : > { %v807_v9 = vadd.f32 %v4889_v36, %v773_v3 }
  0xfb   : > { %v798_v52 = vadd.f32 %v4889_v36, %v764_v46  ;;  %v796_v53 = vadd.f32 %v4889_v36, %v762_v47 }
  0xff   : > { %v674_v60 = vpop.permute.xlu2 %673 }
 0x100   : > { %v619_v48 = vpop.permute.xlu1 %618  ;;  %v609_v49 = vpop.permute.xlu0 %608  ;;  %v776_v23 = vmul.f32 %v4883_v34, %v674_v60 }
 0x101   : > { %v765_v50 = vmul.f32 %v4883_v34, %v619_v48  ;;  %v763_v51 = vmul.f32 %v4883_v34, %v609_v49  ;;  %v4532_v49 = vmov -inf  }
 0x102   : > { %v810_v29 = vadd.f32 %v4889_v36, %v776_v23  ;;  %893 = vst.msk [vmem:[#allocation3] sm:$0xff] %vm892_vm0, %v4532_v49 }
 0x103   : > { %v799_v54 = vadd.f32 %v4889_v36, %v765_v50  ;;  %v797_v55 = vadd.f32 %v4889_v36, %v763_v51  ;;  %894 = vst.msk [vmem:[#allocation3 + $0x8] sm:$0xff] %vm892_vm0, %v4532_v49 }
 0x104   : > { %895 = vst.msk [vmem:[#allocation3 + $0x10] sm:$0xff] %vm892_vm0, %v4532_v49 }
 0x105   : > { %v4001_v56 = vpack.c.bf16 %v799_v54, %v798_v52  ;;  %v3996_v57 = vpack.c.bf16 %v797_v55, %v796_v53  ;;  %896 = vst.msk [vmem:[#allocation3 + $0x18] sm:$0xff] %vm892_vm0, %v4532_v49 }
 0x106   : > { %897 = vst.msk [vmem:[#allocation3 + $0x20] sm:$0xff] %vm892_vm0, %v4532_v49 }
 0x107   : > { %4073 = vst [vmem:[#allocation2] sm:$0xff] %v4001_v56   ;;  %v689_v10 = vpop.permute.xlu2 %688 }
 0x108   : > { %3997 = vst [vmem:[#allocation2 + $0x30] sm:$0xff] %v3996_v57   ;;  %v639_v58 = vpop.permute.xlu1 %638  ;;  %v634_v59 = vpop.permute.xlu0 %633  ;;  %v779_v24 = vmul.f32 %v4883_v34, %v689_v10 }
 0x109   : > { %v769_v61 = vmul.f32 %v4883_v34, %v639_v58  ;;  %v768_v62 = vmul.f32 %v4883_v34, %v634_v59  ;;  %898 = vst.msk [vmem:[#allocation3 + $0x28] sm:$0xff] %vm892_vm0, %v4532_v49 }
 0x10a   : > { %v813_v30 = vadd.f32 %v4889_v36, %v779_v24  ;;  %899 = vst.msk [vmem:[#allocation3 + $0x30] sm:$0xff] %vm892_vm0, %v4532_v49 }
 0x10b   : > { %v803_v63 = vadd.f32 %v4889_v36, %v769_v61  ;;  %v802_v0 = vadd.f32 %v4889_v36, %v768_v62  ;;  %900 = vst.msk [vmem:[#allocation3 + $0x38] sm:$0xff] %vm892_vm0, %v4532_v49 }
 0x10c   : > { %901 = vst.msk [vmem:[#allocation3 + $0x40] sm:$0xff] %vm892_vm0, %v4532_v49 }
 0x10d   : > { %v4011_v1 = vpack.c.bf16 %v803_v63, %v802_v0  ;;  %902 = vst.msk [vmem:[#allocation3 + $0x48] sm:$0xff] %vm892_vm0, %v4532_v49 }
 0x10e   : > { %903 = vst.msk [vmem:[#allocation3 + $0x50] sm:$0xff] %vm892_vm0, %v4532_v49 }
 0x10f   : > { %4075 = vst [vmem:[#allocation2 + $0x18] sm:$0xff] %v4011_v1   ;;  %v704_v21 = vpop.permute.xlu2 %703 }
 0x110   : > { %v654_v4 = vpop.permute.xlu1 %653  ;;  %v649_v5 = vpop.permute.xlu0 %648  ;;  %v782_v45 = vmul.f32 %v4883_v34, %v704_v21  ;;  %904 = vst.msk [vmem:[#allocation3 + $0x58] sm:$0xff] %vm892_vm0, %v4532_v49 }
 0x111   : > { %v772_v6 = vmul.f32 %v4883_v34, %v654_v4  ;;  %v771_v7 = vmul.f32 %v4883_v34, %v649_v5  ;;  %905 = vst.msk [vmem:[#allocation3 + $0x60] sm:$0xff] %vm892_vm0, %v4532_v49 }
 0x112   : > { %v816_v53 = vadd.f32 %v4889_v36, %v782_v45  ;;  %906 = vst.msk [vmem:[#allocation3 + $0x68] sm:$0xff] %vm892_vm0, %v4532_v49 }
 0x113   : > { %v806_v11 = vadd.f32 %v4889_v36, %v772_v6  ;;  %v805_v12 = vadd.f32 %v4889_v36, %v771_v7  ;;  %907 = vst.msk [vmem:[#allocation3 + $0x70] sm:$0xff] %vm892_vm0, %v4532_v49 }
 0x114   : > { %908 = vst.msk [vmem:[#allocation3 + $0x78] sm:$0xff] %vm892_vm0, %v4532_v49 }
 0x115   : > { %v4021_v13 = vpack.c.bf16 %v807_v9, %v806_v11  ;;  %v4016_v14 = vpack.c.bf16 %v805_v12, %v804_v8  ;;  %909 = vst.msk [vmem:[#allocation3 + $0x80] sm:$0xff] %vm892_vm0, %v4532_v49 }
 0x116   : > { %910 = vst.msk [vmem:[#allocation3 + $0x88] sm:$0xff] %vm892_vm0, %v4532_v49 }
 0x117   : > { %4077 = vst [vmem:[#allocation2 + $0x68] sm:$0xff] %v4021_v13   ;;  %v719_v37 = vpop.permute.xlu2 %718 }
 0x118   : > { %4076 = vst [vmem:[#allocation2 + $0x50] sm:$0xff] %v4016_v14   ;;  %v669_v15 = vpop.permute.xlu1 %668  ;;  %v664_v16 = vpop.permute.xlu0 %663  ;;  %v785_v46 = vmul.f32 %v4883_v34, %v719_v37 }
 0x119   : > { %v775_v17 = vmul.f32 %v4883_v34, %v669_v15  ;;  %v774_v18 = vmul.f32 %v4883_v34, %v664_v16  ;;  %911 = vst.msk [vmem:[#allocation3 + $0x90] sm:$0xff] %vm892_vm0, %v4532_v49 }
 0x11a   : > { %v819_v54 = vadd.f32 %v4889_v36, %v785_v46  ;;  %912 = vst.msk [vmem:[#allocation3 + $0x98] sm:$0xff] %vm892_vm0, %v4532_v49 }
 0x11b   : > { %v809_v19 = vadd.f32 %v4889_v36, %v775_v17  ;;  %v808_v20 = vadd.f32 %v4889_v36, %v774_v18  ;;  %913 = vst.msk [vmem:[#allocation3 + $0xa0] sm:$0xff] %vm892_vm0, %v4532_v49 }
 0x11c   : > { %914 = vst.msk [vmem:[#allocation3 + $0xa8] sm:$0xff] %vm892_vm0, %v4532_v49 }
 0x11d   : > { %v4026_v22 = vpack.c.bf16 %v809_v19, %v808_v20  ;;  %915 = vst.msk [vmem:[#allocation3 + $0xb0] sm:$0xff] %vm892_vm0, %v4532_v49 }
 0x11e   : > { %916 = vst.msk [vmem:[#allocation3 + $0xb8] sm:$0xff] %vm892_vm0, %v4532_v49 }
 0x11f   : > { %4078 = vst [vmem:[#allocation2 + $0x8] sm:$0xff] %v4026_v22   ;;  %v734_v52 = vpop.permute.xlu2 %733 }
 0x120   : > { %v684_v25 = vpop.permute.xlu1 %683  ;;  %v679_v26 = vpop.permute.xlu0 %678  ;;  %v788_v3 = vmul.f32 %v4883_v34, %v734_v52  ;;  %917 = vst.msk [vmem:[#allocation3 + $0xc0] sm:$0xff] %vm892_vm0, %v4532_v49 }
 0x121   : > { %v778_v27 = vmul.f32 %v4883_v34, %v684_v25  ;;  %v777_v28 = vmul.f32 %v4883_v34, %v679_v26  ;;  %918 = vst.msk [vmem:[#allocation3 + $0xc8] sm:$0xff] %vm892_vm0, %v4532_v49 }
 0x122   : > { %v822_v9 = vadd.f32 %v4889_v36, %v788_v3  ;;  %919 = vst.msk [vmem:[#allocation3 + $0xd0] sm:$0xff] %vm892_vm0, %v4532_v49 }
 0x123   : > { %v812_v31 = vadd.f32 %v4889_v36, %v778_v27  ;;  %v811_v32 = vadd.f32 %v4889_v36, %v777_v28  ;;  %920 = vst.msk [vmem:[#allocation3 + $0xd8] sm:$0xff] %vm892_vm0, %v4532_v49 }
 0x124   : > { %921 = vst.msk [vmem:[#allocation3 + $0xe0] sm:$0xff] %vm892_vm0, %v4532_v49 }
 0x125   : > { %v4036_v33 = vpack.c.bf16 %v813_v30, %v812_v31  ;;  %v4031_v35 = vpack.c.bf16 %v811_v32, %v810_v29  ;;  %922 = vst.msk [vmem:[#allocation3 + $0xe8] sm:$0xff] %vm892_vm0, %v4532_v49 }
 0x126   : > { %923 = vst.msk [vmem:[#allocation3 + $0xf0] sm:$0xff] %vm892_vm0, %v4532_v49 }
 0x127   : > { %4080 = vst [vmem:[#allocation2 + $0x40] sm:$0xff] %v4036_v33   ;;  %v749_v1 = vpop.permute.xlu2 %748 }
 0x128   : > { %4079 = vst [vmem:[#allocation2 + $0x48] sm:$0xff] %v4031_v35   ;;  %v699_v38 = vpop.permute.xlu1 %698  ;;  %v694_v39 = vpop.permute.xlu0 %693  ;;  %v791_v4 = vmul.f32 %v4883_v34, %v749_v1 }
 0x129   : > { %v781_v40 = vmul.f32 %v4883_v34, %v699_v38  ;;  %v780_v41 = vmul.f32 %v4883_v34, %v694_v39  ;;  %924 = vst.msk [vmem:[#allocation3 + $0xf8] sm:$0xff] %vm892_vm0, %v4532_v49 }
 0x12a   : > { %v825_v10 = vadd.f32 %v4889_v36, %v791_v4 }
 0x12b   : > { %v815_v42 = vadd.f32 %v4889_v36, %v781_v40  ;;  %v814_v43 = vadd.f32 %v4889_v36, %v780_v41 }
 0x12d   : > { %v4041_v44 = vpack.c.bf16 %v815_v42, %v814_v43 }
 0x12f   : > { %4081 = vst [vmem:[#allocation2 + $0x20] sm:$0xff] %v4041_v44  }
 0x130   : > { %v714_v47 = vpop.permute.xlu1 %713  ;;  %v709_v48 = vpop.permute.xlu0 %708 }
 0x131   : > { %v784_v50 = vmul.f32 %v4883_v34, %v714_v47  ;;  %v783_v51 = vmul.f32 %v4883_v34, %v709_v48 }
 0x133   : > { %v818_v55 = vadd.f32 %v4889_v36, %v784_v50  ;;  %v817_v56 = vadd.f32 %v4889_v36, %v783_v51 }
 0x135   : > { %v4051_v57 = vpack.c.bf16 %v819_v54, %v818_v55  ;;  %v4046_v58 = vpack.c.bf16 %v817_v56, %v816_v53 }
 0x137   : > { %4083 = vst [vmem:[#allocation2 + $0x38] sm:$0xff] %v4051_v57  }
 0x138   : > { %4082 = vst [vmem:[#allocation2 + $0x10] sm:$0xff] %v4046_v58   ;;  %v729_v59 = vpop.permute.xlu1 %728  ;;  %v724_v60 = vpop.permute.xlu0 %723 }
 0x139   : > { %v787_v61 = vmul.f32 %v4883_v34, %v729_v59  ;;  %v786_v62 = vmul.f32 %v4883_v34, %v724_v60 }
 0x13b   : > { %v821_v63 = vadd.f32 %v4889_v36, %v787_v61  ;;  %v820_v0 = vadd.f32 %v4889_v36, %v786_v62 }
 0x13d   : > { %v4056_v2 = vpack.c.bf16 %v821_v63, %v820_v0 }
 0x13f   : > { %4084 = vst [vmem:[#allocation2 + $0x60] sm:$0xff] %v4056_v2  }
 0x140   : > { %v744_v5 = vpop.permute.xlu1 %743  ;;  %v739_v6 = vpop.permute.xlu0 %738 }
 0x141   : > { %v790_v7 = vmul.f32 %v4883_v34, %v744_v5  ;;  %v789_v8 = vmul.f32 %v4883_v34, %v739_v6 }
 0x143   : > { %v824_v11 = vadd.f32 %v4889_v36, %v790_v7  ;;  %v823_v12 = vadd.f32 %v4889_v36, %v789_v8 }
 0x145   : > { %v4066_v13 = vpack.c.bf16 %v825_v10, %v824_v11  ;;  %v4061_v14 = vpack.c.bf16 %v823_v12, %v822_v9 }
 0x147   : > { %4086 = vst [vmem:[#allocation2 + $0x78] sm:$0xff] %v4066_v13  }
 0x148   : > { %4085 = vst [vmem:[#allocation2 + $0x70] sm:$0xff] %v4061_v14   ;;  %v759_v15 = vpop.permute.xlu1 %758  ;;  %v754_v16 = vpop.permute.xlu0 %753 }
 0x149   : > { %v793_v17 = vmul.f32 %v4883_v34, %v759_v15  ;;  %v792_v18 = vmul.f32 %v4883_v34, %v754_v16  ;;  %v4533_v34 = vmov 0.0  }
 0x14a   : > { %925 = vst.msk [vmem:[#allocation4] sm:$0xff] %vm892_vm0, %v4533_v34 }
 0x14b   : > { %v827_v19 = vadd.f32 %v4889_v36, %v793_v17  ;;  %v826_v20 = vadd.f32 %v4889_v36, %v792_v18  ;;  %926 = vst.msk [vmem:[#allocation4 + $0x8] sm:$0xff] %vm892_vm0, %v4533_v34 }
 0x14c   : > { %927 = vst.msk [vmem:[#allocation4 + $0x10] sm:$0xff] %vm892_vm0, %v4533_v34 }
 0x14d   : > { %v4071_v21 = vpack.c.bf16 %v827_v19, %v826_v20  ;;  %928 = vst.msk [vmem:[#allocation4 + $0x18] sm:$0xff] %vm892_vm0, %v4533_v34 }
 0x14e   : > { %929 = vst.msk [vmem:[#allocation4 + $0x20] sm:$0xff] %vm892_vm0, %v4533_v34 }
 0x14f   : > { %4087 = vst [vmem:[#allocation2 + $0x28] sm:$0xff] %v4071_v21  }
 0x150   : > { %930 = vst.msk [vmem:[#allocation4 + $0x28] sm:$0xff] %vm892_vm0, %v4533_v34 }
 0x151   : > { %931 = vst.msk [vmem:[#allocation4 + $0x30] sm:$0xff] %vm892_vm0, %v4533_v34 }
 0x152   : > { %932 = vst.msk [vmem:[#allocation4 + $0x38] sm:$0xff] %vm892_vm0, %v4533_v34 }
 0x153   : > { %933 = vst.msk [vmem:[#allocation4 + $0x40] sm:$0xff] %vm892_vm0, %v4533_v34 }
 0x154   : > { %934 = vst.msk [vmem:[#allocation4 + $0x48] sm:$0xff] %vm892_vm0, %v4533_v34 }
 0x155   : > { %935 = vst.msk [vmem:[#allocation4 + $0x50] sm:$0xff] %vm892_vm0, %v4533_v34 }
 0x156   : > { %936 = vst.msk [vmem:[#allocation4 + $0x58] sm:$0xff] %vm892_vm0, %v4533_v34 }
 0x157   : > { %937 = vst.msk [vmem:[#allocation4 + $0x60] sm:$0xff] %vm892_vm0, %v4533_v34 }
 0x158   : > { %938 = vst.msk [vmem:[#allocation4 + $0x68] sm:$0xff] %vm892_vm0, %v4533_v34 }
 0x159   : > { %939 = vst.msk [vmem:[#allocation4 + $0x70] sm:$0xff] %vm892_vm0, %v4533_v34 }
 0x15a   : > { %940 = vst.msk [vmem:[#allocation4 + $0x78] sm:$0xff] %vm892_vm0, %v4533_v34 }
 0x15b   : > { %941 = vst.msk [vmem:[#allocation4 + $0x80] sm:$0xff] %vm892_vm0, %v4533_v34 }
 0x15c   : > { %942 = vst.msk [vmem:[#allocation4 + $0x88] sm:$0xff] %vm892_vm0, %v4533_v34 }
 0x15d   : > { %943 = vst.msk [vmem:[#allocation4 + $0x90] sm:$0xff] %vm892_vm0, %v4533_v34 }
 0x15e   : > { %944 = vst.msk [vmem:[#allocation4 + $0x98] sm:$0xff] %vm892_vm0, %v4533_v34 }
 0x15f   : > { %945 = vst.msk [vmem:[#allocation4 + $0xa0] sm:$0xff] %vm892_vm0, %v4533_v34 }
 0x160   : > { %946 = vst.msk [vmem:[#allocation4 + $0xa8] sm:$0xff] %vm892_vm0, %v4533_v34 }
 0x161   : > { %947 = vst.msk [vmem:[#allocation4 + $0xb0] sm:$0xff] %vm892_vm0, %v4533_v34 }
 0x162   : > { %948 = vst.msk [vmem:[#allocation4 + $0xb8] sm:$0xff] %vm892_vm0, %v4533_v34 }
 0x163   : > { %949 = vst.msk [vmem:[#allocation4 + $0xc0] sm:$0xff] %vm892_vm0, %v4533_v34 }
 0x164   : > { %950 = vst.msk [vmem:[#allocation4 + $0xc8] sm:$0xff] %vm892_vm0, %v4533_v34 }
 0x165   : > { %951 = vst.msk [vmem:[#allocation4 + $0xd0] sm:$0xff] %vm892_vm0, %v4533_v34 }
 0x166   : > { %952 = vst.msk [vmem:[#allocation4 + $0xd8] sm:$0xff] %vm892_vm0, %v4533_v34 }
 0x167   : > { %953 = vst.msk [vmem:[#allocation4 + $0xe0] sm:$0xff] %vm892_vm0, %v4533_v34 }
 0x168   : > { %954 = vst.msk [vmem:[#allocation4 + $0xe8] sm:$0xff] %vm892_vm0, %v4533_v34 }
 0x169   : > { %955 = vst.msk [vmem:[#allocation4 + $0xf0] sm:$0xff] %vm892_vm0, %v4533_v34 }
 0x16a   : > { %956 = vst.msk [vmem:[#allocation4 + $0xf8] sm:$0xff] %vm892_vm0, %v4533_v34 }
 0x16b   : > { %957 = vst [vmem:[#allocation5 + $0xa8] sm:$0xff] %v4533_v34 }
 0x16c   : > { %958 = vst [vmem:[#allocation5 + $0x68] sm:$0xff] %v4533_v34 }
 0x16d   : > { %959 = vst [vmem:[#allocation5 + $0x10] sm:$0xff] %v4533_v34 }
 0x16e   : > { %960 = vst [vmem:[#allocation5 + $0xc0] sm:$0xff] %v4533_v34 }
 0x16f   : > { %961 = vst [vmem:[#allocation5 + $0xc8] sm:$0xff] %v4533_v34 }
 0x170   : > { %962 = vst [vmem:[#allocation5 + $0xb0] sm:$0xff] %v4533_v34 }
 0x171   : > { %963 = vst [vmem:[#allocation5 + $0x70] sm:$0xff] %v4533_v34 }
 0x172   : > { %964 = vst [vmem:[#allocation5 + $0x38] sm:$0xff] %v4533_v34 }
 0x173   : > { %965 = vst [vmem:[#allocation5 + $0x48] sm:$0xff] %v4533_v34 }
 0x174   : > { %966 = vst [vmem:[#allocation5 + $0xf8] sm:$0xff] %v4533_v34 }
 0x175   : > { %967 = vst [vmem:[#allocation5 + $0x78] sm:$0xff] %v4533_v34 }
 0x176   : > { %968 = vst [vmem:[#allocation5 + $0x88] sm:$0xff] %v4533_v34 }
 0x177   : > { %969 = vst [vmem:[#allocation5 + $0xf0] sm:$0xff] %v4533_v34 }
 0x178   : > { %970 = vst [vmem:[#allocation5 + $0x18] sm:$0xff] %v4533_v34 }
 0x179   : > { %971 = vst [vmem:[#allocation5 + $0x30] sm:$0xff] %v4533_v34 }
 0x17a   : > { %972 = vst [vmem:[#allocation5 + $0x50] sm:$0xff] %v4533_v34 }
 0x17b   : > { %973 = vst [vmem:[#allocation5 + $0xb8] sm:$0xff] %v4533_v34 }
 0x17c   : > { %974 = vst [vmem:[#allocation5 + $0xd0] sm:$0xff] %v4533_v34 }
 0x17d   : > { %975 = vst [vmem:[#allocation5 + $0xd8] sm:$0xff] %v4533_v34 }
 0x17e   : > { %976 = vst [vmem:[#allocation5 + $0x58] sm:$0xff] %v4533_v34 }
 0x17f   : > { %977 = vst [vmem:[#allocation5 + $0x80] sm:$0xff] %v4533_v34 }
 0x180   : > { %978 = vst [vmem:[#allocation5 + $0x40] sm:$0xff] %v4533_v34 }
 0x181   : > { %979 = vst [vmem:[#allocation5 + $0x28] sm:$0xff] %v4533_v34 }
 0x182   : > { %980 = vst [vmem:[#allocation5] sm:$0xff] %v4533_v34 }
 0x183   : > { %981 = vst [vmem:[#allocation5 + $0x90] sm:$0xff] %v4533_v34 }
 0x184   : > { %982 = vst [vmem:[#allocation5 + $0xe8] sm:$0xff] %v4533_v34 }
 0x185   : > { %983 = vst [vmem:[#allocation5 + $0xa0] sm:$0xff] %v4533_v34 }
 0x186   : > { %984 = vst [vmem:[#allocation5 + $0x20] sm:$0xff] %v4533_v34 }
 0x187   : > { %985 = vst [vmem:[#allocation5 + $0x8] sm:$0xff] %v4533_v34 }
 0x188   : > { %986 = vst [vmem:[#allocation5 + $0xe0] sm:$0xff] %v4533_v34 }
 0x189   : > { %987 = vst [vmem:[#allocation5 + $0x60] sm:$0xff] %v4533_v34 }
 0x18a   : > { %988 = vst [vmem:[#allocation5 + $0x98] sm:$0xff] %v4533_v34 }
 0x18b PF: > { %v993_v36 = vld [vmem:[%s4838_s6 + $0x20] sm:$0xff]  ;;  %v991_v22 = vld [vmem:[%s4838_s6 + $0x10] sm:$0xff]  ;;  %v4534_v24 = vmov 0   ;;  %v994_v25 = vld [vmem:[%s4838_s6 + $0x28] sm:$0xff]  ;;  %vm2343_vm1 = vcmask 7168   ;;  %p3969_p7 = scmp.ne.s32.totalorder %s4512_s20, 1 }
 0x18c   : > { %v989_v23 = vld [vmem:[%s4838_s6] sm:$0xff]  ;;  %4198 = vset.pattern.permute.xlu2 %v4534_v24  ;;  %4197 = vset.pattern.permute.xlu1 %v4534_v24  ;;  %v992_v26 = vld [vmem:[%s4838_s6 + $0x18] sm:$0xff]  ;;  %v990_v27 = vld [vmem:[%s4838_s6 + $0x8] sm:$0xff]  ;;  %s3440_s26 = sld [smem:[#allocation8]] (!%p3969_p7) }
 0x18d   : > { %4196 = vset.pattern.permute.xlu0 %v4534_v24  ;;  %1044 = vperm.xlu2 %4198, %v993_v36   ;;  %v997_v28 = vld [vmem:[%s4838_s6 + $0x40] sm:$0xff]  ;;  %v996_v29 = vld [vmem:[%s4838_s6 + $0x38] sm:$0xff]  ;;  %v995_v30 = vld [vmem:[%s4838_s6 + $0x30] sm:$0xff]  ;;  %s3970_s28 = sld [smem:[#allocation8 + $0x1]] (!%p3969_p7) }
 0x18e   : > { %1034 = vperm.xlu1 %4197, %v991_v22   ;;  %1024 = vperm.xlu0 %4196, %v989_v23   ;;  %v1000_v31 = vld [vmem:[%s4838_s6 + $0x58] sm:$0xff]  ;;  %v999_v32 = vld [vmem:[%s4838_s6 + $0x50] sm:$0xff]  ;;  %v998_v33 = vld [vmem:[%s4838_s6 + $0x48] sm:$0xff] }
 0x18f   : > { %v1003_v35 = vld [vmem:[%s4838_s6 + $0x70] sm:$0xff]  ;;  %v1002_v37 = vld [vmem:[%s4838_s6 + $0x68] sm:$0xff]  ;;  %v1001_v38 = vld [vmem:[%s4838_s6 + $0x60] sm:$0xff] }
 0x190   : > { %v1006_v39 = vld [vmem:[%s4838_s6 + $0x88] sm:$0xff]  ;;  %v1005_v40 = vld [vmem:[%s4838_s6 + $0x80] sm:$0xff]  ;;  %v1004_v41 = vld [vmem:[%s4838_s6 + $0x78] sm:$0xff] }
 0x191   : > { %v1009_v42 = vld [vmem:[%s4838_s6 + $0xa0] sm:$0xff]  ;;  %v1008_v43 = vld [vmem:[%s4838_s6 + $0x98] sm:$0xff]  ;;  %v1007_v44 = vld [vmem:[%s4838_s6 + $0x90] sm:$0xff] }
 0x192   : > { %v1012_v45 = vld [vmem:[%s4838_s6 + $0xb8] sm:$0xff]  ;;  %v1011_v46 = vld [vmem:[%s4838_s6 + $0xb0] sm:$0xff]  ;;  %v1010_v47 = vld [vmem:[%s4838_s6 + $0xa8] sm:$0xff] }
 0x193   : > { %v1015_v48 = vld [vmem:[%s4838_s6 + $0xd0] sm:$0xff]  ;;  %v1014_v49 = vld [vmem:[%s4838_s6 + $0xc8] sm:$0xff]  ;;  %v1013_v50 = vld [vmem:[%s4838_s6 + $0xc0] sm:$0xff] }
 0x194   : > { %v1018_v51 = vld [vmem:[%s4838_s6 + $0xe8] sm:$0xff]  ;;  %v1017_v52 = vld [vmem:[%s4838_s6 + $0xe0] sm:$0xff]  ;;  %v1016_v53 = vld [vmem:[%s4838_s6 + $0xd8] sm:$0xff] }
 0x195   : > { %1049 = vperm.xlu2 %4198, %v994_v25   ;;  %v1020_v54 = vld [vmem:[%s4838_s6 + $0xf8] sm:$0xff]  ;;  %v1019_v55 = vld [vmem:[%s4838_s6 + $0xf0] sm:$0xff]  ;;  %v5171_v5 = vld [vmem:[%s6434_s2 + $0x2] ss:$0 sm:$0xff] }
 0x196   : > { %1039 = vperm.xlu1 %4197, %v992_v26   ;;  %1029 = vperm.xlu0 %4196, %v990_v27   ;;  %v5176_v6 = vld [vmem:[%s6434_s2 + $0x4] ss:$0 sm:$0xff]  ;;  %v5183_v11 = vld [vmem:[%s6434_s2 + $0x3] ss:$0 sm:$0xff]  ;;  %v5190_v13 = vld [vmem:[%s6434_s2 + $0x5] ss:$0 sm:$0xff] }
 0x19d   : > { %1064 = vperm.xlu2 %4198, %v997_v28  }
 0x19e   : > { %1059 = vperm.xlu1 %4197, %v996_v29   ;;  %1054 = vperm.xlu0 %4196, %v995_v30  }
 0x1a5   : > { %1079 = vperm.xlu2 %4198, %v1000_v31  }
 0x1a6   : > { %1074 = vperm.xlu1 %4197, %v999_v32   ;;  %1069 = vperm.xlu0 %4196, %v998_v33  }
 0x1ad   : > { %1094 = vperm.xlu2 %4198, %v1003_v35  }
 0x1ae   : > { %1089 = vperm.xlu1 %4197, %v1002_v37   ;;  %1084 = vperm.xlu0 %4196, %v1001_v38  }
 0x1b5   : > { %1109 = vperm.xlu2 %4198, %v1006_v39  }
 0x1b6   : > { %1104 = vperm.xlu1 %4197, %v1005_v40   ;;  %1099 = vperm.xlu0 %4196, %v1004_v41  }
 0x1bd   : > { %1124 = vperm.xlu2 %4198, %v1009_v42  }
 0x1be   : > { %1119 = vperm.xlu1 %4197, %v1008_v43   ;;  %1114 = vperm.xlu0 %4196, %v1007_v44  }
 0x1c5   : > { %1139 = vperm.xlu2 %4198, %v1012_v45  }
 0x1c6   : > { %1134 = vperm.xlu1 %4197, %v1011_v46   ;;  %1129 = vperm.xlu0 %4196, %v1010_v47  }
 0x1cd   : > { %1154 = vperm.xlu2 %4198, %v1015_v48  }
 0x1ce   : > { %1149 = vperm.xlu1 %4197, %v1014_v49   ;;  %1144 = vperm.xlu0 %4196, %v1013_v50  }
 0x1d5   : > { %1169 = vperm.xlu2 %4198, %v1018_v51  }
 0x1d6   : > { %1164 = vperm.xlu1 %4197, %v1017_v52   ;;  %1159 = vperm.xlu0 %4196, %v1016_v53  }
 0x1de   : > { %1179 = vperm.xlu1 %4197, %v1020_v54   ;;  %1174 = vperm.xlu0 %4196, %v1019_v55  }
 0x1e7   : > { %v5146_v56 = vpop.permute.xlu2 %1044 }
 0x1e8   : > { %v5202_v20 = vmul.f32 %v5176_v6, %v5146_v56 }
 0x1ef   : > { %v5148_v57 = vpop.permute.xlu2 %1049 }
 0x1f0   : > { %v5206_v21 = vmul.f32 %v5176_v6, %v5148_v57 }
 0x1f7   : > { %v5154_v60 = vpop.permute.xlu2 %1064 }
 0x1f8   : > { %v1291_v16 = vmul.f32 %v5176_v6, %v5154_v60 }
 0x1fa   : > { %v5225_v35 = vadd.f32 %v5190_v13, %v1291_v16 }
 0x1ff   : > { %v5160_v63 = vpop.permute.xlu2 %1079 }
 0x200   : > { %v5150_v58 = vpop.permute.xlu1 %1034  ;;  %v5152_v59 = vpop.permute.xlu0 %1024  ;;  %v1294_v17 = vmul.f32 %v5176_v6, %v5160_v63 }
 0x202   : > { %v5222_v33 = vadd.f32 %v5190_v13, %v1294_v17 }
 0x207   : > { %v1095_v4 = vpop.permute.xlu2 %1094 }
 0x208   : > { %v5156_v61 = vpop.permute.xlu1 %1039  ;;  %v5158_v62 = vpop.permute.xlu0 %1029  ;;  %v1197_v7 = vmul.f32 %v5171_v5, %v1095_v4  ;;  %v1297_v10 = vmul.f32 %v5176_v6, %v1095_v4 }
 0x20a   : > { %v1231_v14 = vadd.f32 %v5183_v11, %v1197_v7  ;;  %v1331_v19 = vadd.f32 %v5190_v13, %v1297_v10 }
 0x20c   : > { %v1263_v26 = vpack.c.bf16 %v1231_v14, %v1231_v14  ;;  %v1363_v32 = vpack.c.bf16 %v1331_v19, %v1331_v19 }
 0x20e   : > { %v1491_v42 = vunpack.c.l.b16 %v1263_v26  ;;  %v2710_v51 = vunpack.c.l.b16 %v1363_v32 }
 0x20f   : > { %v5185_v12 = vpop.permute.xlu2 %1109 }
 0x210   : > { %v5162_v0 = vpop.permute.xlu1 %1059  ;;  %v5164_v1 = vpop.permute.xlu0 %1054  ;;  %v1200_v34 = vmul.f32 %v5171_v5, %v5185_v12 }
 0x211   : > { %v1290_v50 = vmul.f32 %v5176_v6, %v5162_v0  ;;  %v1289_v54 = vmul.f32 %v5176_v6, %v5164_v1 }
 0x212   : > { %v1234_v37 = vadd.f32 %v5183_v11, %v1200_v34 }
 0x214   : > { %v1266_v7 = vpack.c.bf16 %v1234_v37, %v1234_v37 }
 0x216   : > { %v5263_v32 = vunpack.c.l.b16 %v1266_v7 }
 0x217   : > { %v5235_v45 = vpop.permute.xlu2 %1124 }
 0x218   : > { %v1075_v2 = vpop.permute.xlu1 %1074  ;;  %v5166_v3 = vpop.permute.xlu0 %1069 }
 0x219   : > { %v1293_v36 = vmul.f32 %v5176_v6, %v1075_v2  ;;  %v1292_v41 = vmul.f32 %v5176_v6, %v5166_v3 }
 0x21b   : > { %v1327_v44 = vadd.f32 %v5190_v13, %v1293_v36  ;;  %v1326_v16 = vadd.f32 %v5190_v13, %v1292_v41 }
 0x220   : > { %v1090_v8 = vpop.permute.xlu1 %1089  ;;  %v1085_v9 = vpop.permute.xlu0 %1084 }
 0x221   : > { %v1295_v15 = vmul.f32 %v5176_v6, %v1085_v9  ;;  %v1296_v18 = vmul.f32 %v5176_v6, %v1090_v8  ;;  %v1196_v22 = vmul.f32 %v5171_v5, %v1090_v8  ;;  %v1195_v23 = vmul.f32 %v5171_v5, %v1085_v9 }
 0x222   : > { %v1193_v8 = vmul.f32 %v5171_v5, %v1075_v2 }
 0x223   : > { %v1329_v30 = vadd.f32 %v5190_v13, %v1295_v15  ;;  %v1330_v31 = vadd.f32 %v5190_v13, %v1296_v18  ;;  %v1229_v43 = vadd.f32 %v5183_v11, %v1195_v23  ;;  %v1230_v46 = vadd.f32 %v5183_v11, %v1196_v22 }
 0x224   : > { %v1359_v15 = vpack.c.bf16 %v1327_v44, %v1327_v44  ;;  %v1321_v44 = vadd.f32 %v5190_v13, %v5202_v20 }
 0x225   : > { %v1361_v49 = vpack.c.bf16 %v1329_v30, %v1329_v30  ;;  %v1362_v52 = vpack.c.bf16 %v1330_v31, %v1330_v31  ;;  %v1261_v14 = vpack.c.bf16 %v1229_v43, %v1229_v43  ;;  %v1262_v34 = vpack.c.bf16 %v1230_v46, %v1230_v46  ;;  %v5267_v43 = vpop.permute.xlu2 %1139 }
 0x226   : > { %v1323_v30 = vadd.f32 %v5190_v13, %v1289_v54  ;;  %v1324_v31 = vadd.f32 %v5190_v13, %v1290_v50  ;;  %v2706_v37 = vunpack.c.l.b16 %v1359_v15  ;;  %v1322_v46 = vadd.f32 %v5190_v13, %v5206_v21 }
 0x227   : > { %v2708_v19 = vunpack.c.l.b16 %v1361_v49  ;;  %v2709_v23 = vunpack.c.l.b16 %v1362_v52  ;;  %v1489_v41 = vunpack.c.l.b16 %v1261_v14  ;;  %v1286_v49 = vmul.f32 %v5176_v6, %v5156_v61 }
 0x228   : > { %v5213_v24 = vpop.permute.xlu1 %1104  ;;  %v1100_v25 = vpop.permute.xlu0 %1099  ;;  %v1192_v21 = vmul.f32 %v5171_v5, %v5166_v3  ;;  %v1285_v3 = vmul.f32 %v5176_v6, %v5150_v58 }
 0x229   : > { %v1199_v27 = vmul.f32 %v5171_v5, %v5213_v24  ;;  %v1198_v28 = vmul.f32 %v5171_v5, %v1100_v25  ;;  %v1298_v29 = vmul.f32 %v5176_v6, %v1100_v25  ;;  %v1194_v25 = vmul.f32 %v5171_v5, %v5160_v63 }
 0x22b   : > { %v1233_v38 = vadd.f32 %v5183_v11, %v1199_v27  ;;  %v1232_v39 = vadd.f32 %v5183_v11, %v1198_v28  ;;  %v1332_v40 = vadd.f32 %v5190_v13, %v1298_v29  ;;  %v1360_v28 = vpack.c.bf16 %v5222_v33, %v5222_v33 }
 0x22c   : > { %v1227_v29 = vadd.f32 %v5183_v11, %v1193_v8  ;;  %v1228_v20 = vadd.f32 %v5183_v11, %v1194_v25 }
 0x22d   : > { %v1264_v47 = vpack.c.bf16 %v1232_v39, %v1232_v39  ;;  %v1364_v48 = vpack.c.bf16 %v1332_v40, %v1332_v40  ;;  %v1265_v53 = vpack.c.bf16 %v1233_v38, %v1233_v38  ;;  %v1358_v38 = vpack.c.bf16 %v1326_v16, %v1326_v16 }
 0x22e   : > { %v2718_v40 = vpack.c.b16 %v2709_v23, %v2708_v19  ;;  %v2707_v52 = vunpack.c.l.b16 %v1360_v28  ;;  %v1259_v54 = vpack.c.bf16 %v1227_v29, %v1227_v29  ;;  %v1187_v16 = vmul.f32 %v5171_v5, %v5146_v56 }
 0x22f   : > { %v1492_v55 = vunpack.c.l.b16 %v1264_v47  ;;  %v2711_v4 = vunpack.c.l.b16 %v1364_v48  ;;  %v5252_v2 = vunpack.c.l.b16 %v1265_v53  ;;  %v1357_v53 = vpack.c.bf16 %v5225_v35, %v5225_v35 }
 0x230   : > { %v5243_v9 = vpop.permute.xlu1 %1119  ;;  %v5245_v10 = vpop.permute.xlu0 %1114  ;;  %v2717_v8 = vpack.c.b16 %v2707_v52, %v2706_v37  ;;  %v2705_v14 = vunpack.c.l.b16 %v1358_v38  ;;  %v1188_v35 = vmul.f32 %v5171_v5, %v5148_v57  ;;  %v1260_v19 = vpack.c.bf16 %v1228_v20, %v1228_v20 }
 0x231   : > { %v1202_v17 = vmul.f32 %v5171_v5, %v5243_v9  ;;  %v1201_v18 = vmul.f32 %v5171_v5, %v5245_v10  ;;  %v1500_v36 = vpack.c.b16 %v1492_v55, %v1491_v42  ;;  %v2719_v22 = vpack.c.b16 %v2711_v4, %v2710_v51 }
 0x232   : > { %v1490_v42 = vunpack.c.l.b16 %v1262_v34  ;;  %v1638_v33 = vpack.c.b16 %v5263_v32, %v5252_v2  ;;  %v1355_v55 = vpack.c.bf16 %v1323_v30, %v1323_v30  ;;  %v1356_v4 = vpack.c.bf16 %v1324_v31, %v1324_v31  ;;  %v3984_v2 = vld [vmem:[#allocation2 + $0x48] sm:$0xff]  ;;  %v3990_v32 = vld [vmem:[#allocation2 + $0x70] sm:$0xff] }
 0x233   : > { %v1236_v26 = vadd.f32 %v5183_v11, %v1202_v17  ;;  %v1235_v27 = vadd.f32 %v5183_v11, %v1201_v18  ;;  %1509 = vmatpush.bf16.xpose.msra.mxu0 %v1500_v36  ;;  %2728 = vmatpush.bf16.msra.mxu2 %v2719_v22  ;;  %v1191_v17 = vmul.f32 %v5171_v5, %v5154_v60  ;;  %v2704_v18 = vunpack.c.l.b16 %v1357_v53 }
 0x234   : > { %v1499_v7 = vpack.c.b16 %v1490_v42, %v1489_v41  ;;  %v1353_v34 = vpack.c.bf16 %v1321_v44, %v1321_v44  ;;  %v1284_v36 = vmul.f32 %v5176_v6, %v5158_v62  ;;  %v2702_v22 = vunpack.c.l.b16 %v1355_v55 }
 0x235   : > { %v1267_v63 = vpack.c.bf16 %v1235_v27, %v1235_v27  ;;  %v1268_v39 = vpack.c.bf16 %v1236_v26, %v1236_v26  ;;  %v1354_v23 = vpack.c.bf16 %v1322_v46, %v1322_v46  ;;  %v1320_v56 = vadd.f32 %v5190_v13, %v1286_v49 }
 0x236   : > { %v2716_v25 = vpack.c.b16 %v2705_v14, %v2704_v18  ;;  %v1487_v57 = vunpack.c.l.b16 %v1259_v54  ;;  %v2703_v26 = vunpack.c.l.b16 %v1356_v4  ;;  %v1226_v60 = vadd.f32 %v5183_v11, %v1192_v21 }
 0x237   : > { %v5273_v47 = vunpack.c.l.b16 %v1267_v63  ;;  %v5275_v48 = vunpack.c.l.b16 %v1268_v39  ;;  %2729 = vmatpush.bf16.msra.mxu2 %v2718_v40  ;;  %v1283_v27 = vmul.f32 %v5176_v6, %v5152_v59  ;;  %v1225_v28 = vadd.f32 %v5183_v11, %v1191_v17  ;;  %v5315_v40 = vpop.permute.xlu2 %1154 }
 0x238   : > { %v5279_v50 = vpop.permute.xlu1 %1134  ;;  %v5281_v51 = vpop.permute.xlu0 %1129  ;;  %v1221_v29 = vadd.f32 %v5183_v11, %v1187_v16  ;;  %v1190_v30 = vmul.f32 %v5171_v5, %v5162_v0  ;;  %v1189_v31 = vmul.f32 %v5171_v5, %v5164_v1  ;;  %v1488_v63 = vunpack.c.l.b16 %v1260_v19 }
 0x239   : > { %v1639_v15 = vpack.c.b16 %v5275_v48, %v5273_v47  ;;  %v1319_v39 = vadd.f32 %v5190_v13, %v1285_v3  ;;  %v2700_v41 = vunpack.c.l.b16 %v1353_v34  ;;  %v2701_v42 = vunpack.c.l.b16 %v1354_v23  ;;  %v3988_v47 = vld [vmem:[#allocation2 + $0x38] sm:$0xff]  ;;  %v3983_v48 = vld [vmem:[#allocation2 + $0x8] sm:$0xff] }
 0x23a   : > { %v1318_v44 = vadd.f32 %v5190_v13, %v1284_v36  ;;  %v1222_v46 = vadd.f32 %v5183_v11, %v1188_v35  ;;  %v1498_v0 = vpack.c.b16 %v1488_v63, %v1487_v57  ;;  %v2715_v49 = vpack.c.b16 %v2703_v26, %v2702_v22 }
 0x23b   : > { %1510 = vmatpush.bf16.xpose.msra.mxu0 %v1499_v7  ;;  %2730 = vmatpush.bf16.msra.mxu2 %v2717_v8  ;;  %v1258_v52 = vpack.c.bf16 %v1226_v60, %v1226_v60  ;;  %v1352_v1 = vpack.c.bf16 %v1320_v56, %v1320_v56  ;;  %v1257_v53 = vpack.c.bf16 %v1225_v28, %v1225_v28 }
 0x23c   : > { %v1317_v20 = vadd.f32 %v5190_v13, %v1283_v27  ;;  %v1351_v21 = vpack.c.bf16 %v1319_v39, %v1319_v39  ;;  %v1223_v54 = vadd.f32 %v5183_v11, %v1189_v31  ;;  %v1224_v55 = vadd.f32 %v5183_v11, %v1190_v30 }
 0x23d   : > { %v1253_v4 = vpack.c.bf16 %v1221_v29, %v1221_v29  ;;  %v1254_v7 = vpack.c.bf16 %v1222_v46, %v1222_v46  ;;  %v2714_v8 = vpack.c.b16 %v2701_v42, %v2700_v41  ;;  %v1486_v14 = vunpack.c.l.b16 %v1258_v52 }
 0x23e   : > { %v2699_v16 = vunpack.c.l.b16 %v1352_v1  ;;  %v1350_v35 = vpack.c.bf16 %v1318_v44, %v1318_v44  ;;  %v1185_v17 = vmul.f32 %v5171_v5, %v5150_v58  ;;  %v1186_v3 = vmul.f32 %v5171_v5, %v5156_v61 }
 0x23f   : > { %2731 = vmatpush.bf16.msra.mxu2 %v2716_v25  ;;  %v1485_v18 = vunpack.c.l.b16 %v1257_v53  ;;  %v2698_v36 = vunpack.c.l.b16 %v1351_v21  ;;  %v1349_v22 = vpack.c.bf16 %v1317_v20, %v1317_v20  ;;  %v1255_v23 = vpack.c.bf16 %v1223_v54, %v1223_v54  ;;  %v1170_v61 = vpop.permute.xlu2 %1169 }
 0x240   : > { %v5310_v37 = vpop.permute.xlu1 %1149  ;;  %v5312_v38 = vpop.permute.xlu0 %1144  ;;  %v1256_v56 = vpack.c.bf16 %v1224_v55, %v1224_v55  ;;  %v5328_v25 = vunpack.c.l.b16 %v1253_v4  ;;  %v2697_v60 = vunpack.c.l.b16 %v1350_v35  ;;  %v5330_v27 = vunpack.c.l.b16 %v1254_v7 }
 0x241   : > { %v1497_v57 = vpack.c.b16 %v1486_v14, %v1485_v18  ;;  %v2713_v26 = vpack.c.b16 %v2699_v16, %v2698_v36  ;;  %v1183_v58 = vmul.f32 %v5171_v5, %v5152_v59  ;;  %v1219_v28 = vadd.f32 %v5183_v11, %v1185_v17 }
 0x242   : > { %v5336_v29 = vadd.f32 %v5183_v11, %v1186_v3  ;;  %v2696_v31 = vunpack.c.l.b16 %v1349_v22  ;;  %v1483_v63 = vunpack.c.l.b16 %v1255_v23  ;;  %v1484_v39 = vunpack.c.l.b16 %v1256_v56 }
 0x243   : > { %1511 = vmatpush.bf16.xpose.msra.mxu0 %v1498_v0  ;;  %2732 = vmatpush.bf16.msra.mxu2 %v2715_v49  ;;  %v1312_v41 = vmul.f32 %v5176_v6, %v1170_v61  ;;  %v1495_v44 = vpack.c.b16 %v5330_v27, %v5328_v25  ;;  %v1184_v59 = vmul.f32 %v5171_v5, %v5158_v62 }
 0x244   : > { %v2712_v42 = vpack.c.b16 %v2697_v60, %v2696_v31  ;;  %v1251_v46 = vpack.c.bf16 %v1219_v28, %v1219_v28  ;;  %v1252_v0 = vpack.c.bf16 %v5336_v29, %v5336_v29  ;;  %v5347_v49 = vadd.f32 %v5183_v11, %v1183_v58 }
 0x245   : > { %v1496_v54 = vpack.c.b16 %v1484_v39, %v1483_v63  ;;  %v1212_v14 = vmul.f32 %v5171_v5, %v1170_v61  ;;  %v1346_v16 = vadd.f32 %v5190_v13, %v1312_v41  ;;  %v1308_v35 = vmul.f32 %v5176_v6, %v5310_v37 }
 0x246   : > { %v1307_v36 = vmul.f32 %v5176_v6, %v5312_v38  ;;  %v1305_v61 = vmul.f32 %v5176_v6, %v5279_v50 }
 0x247   : > { %2733 = vmatpush.bf16.msra.mxu2 %v2714_v8  ;;  %v1309_v8 = vmul.f32 %v5176_v6, %v5315_v40  ;;  %v1246_v58 = vadd.f32 %v5183_v11, %v1212_v14  ;;  %v1378_v28 = vpack.c.bf16 %v1346_v16, %v1346_v16  ;;  %v1342_v39 = vadd.f32 %v5190_v13, %v1308_v35 }
 0x248   : > { %v1165_v19 = vpop.permute.xlu1 %1164  ;;  %v5326_v34 = vpop.permute.xlu0 %1159  ;;  %v1341_v41 = vadd.f32 %v5190_v13, %v1307_v36  ;;  %v1218_v14 = vadd.f32 %v5183_v11, %v1184_v59  ;;  %v1339_v16 = vadd.f32 %v5190_v13, %v1305_v61  ;;  %v1480_v35 = vunpack.c.l.b16 %v1252_v0 }
 0x249   : > { %v1311_v30 = vmul.f32 %v5176_v6, %v1165_v19  ;;  %v1211_v52 = vmul.f32 %v5171_v5, %v1165_v19  ;;  %v1310_v53 = vmul.f32 %v5176_v6, %v5326_v34  ;;  %v1343_v27 = vadd.f32 %v5190_v13, %v1309_v8 }
 0x24a   : > { %v2854_v8 = vunpack.c.l.b16 %v1378_v28  ;;  %v1303_v36 = vmul.f32 %v5176_v6, %v5235_v45  ;;  %v1302_v59 = vmul.f32 %v5176_v6, %v5243_v9 }
 0x24b   : > { %1512 = vmatpush.bf16.xpose.msra.mxu0 %v1497_v57  ;;  %2734 = vmatpush.bf16.msra.mxu2 %v2713_v26  ;;  %v1345_v1 = vadd.f32 %v5190_v13, %v1311_v30  ;;  %v1245_v22 = vadd.f32 %v5183_v11, %v1211_v52  ;;  %v1344_v23 = vadd.f32 %v5190_v13, %v1310_v53 }
 0x24c   : > { %v1337_v9 = vadd.f32 %v5190_v13, %v1303_v36 }
 0x24d   : > { %v1377_v56 = vpack.c.bf16 %v1345_v1, %v1345_v1  ;;  %v1277_v52 = vpack.c.bf16 %v1245_v22, %v1245_v22 }
 0x24f   : > { %2735 = vmatpush.bf16.msra.mxu2 %v2712_v42  ;;  %v1210_v42 = vmul.f32 %v5171_v5, %v5326_v34  ;;  %v1278_v34 = vpack.c.bf16 %v1246_v58, %v1246_v58 }
 0x250   : > { %v1180_v20 = vpop.permute.xlu1 %1179  ;;  %v1175_v21 = vpop.permute.xlu0 %1174 }
 0x251   : > { %v1214_v62 = vmul.f32 %v5171_v5, %v1180_v20  ;;  %v1314_v55 = vmul.f32 %v5176_v6, %v1180_v20  ;;  %v1213_v4 = vmul.f32 %v5171_v5, %v1175_v21  ;;  %v1313_v7 = vmul.f32 %v5176_v6, %v1175_v21 }
 0x252   : > { %v2853_v20 = vunpack.c.l.b16 %v1377_v56  ;;  %v1376_v21 = vpack.c.bf16 %v1344_v23, %v1344_v23 }
 0x253   : > { %v1247_v17 = vadd.f32 %v5183_v11, %v1213_v4  ;;  %v1248_v3 = vadd.f32 %v5183_v11, %v1214_v62  ;;  %v1347_v18 = vadd.f32 %v5190_v13, %v1313_v7  ;;  %v1348_v19 = vadd.f32 %v5190_v13, %v1314_v55  ;;  %1513 = vmatpush.bf16.xpose.msra.mxu0 %v1496_v54 }
 0x254   : > { %v1306_v54 = vmul.f32 %v5176_v6, %v5267_v43  ;;  %v1209_v62 = vmul.f32 %v5171_v5, %v5315_v40  ;;  %v1479_v55 = vunpack.c.l.b16 %v1251_v46  ;;  %v1375_v4 = vpack.c.bf16 %v1343_v27, %v1343_v27 }
 0x255   : > { %v1279_v25 = vpack.c.bf16 %v1247_v17, %v1247_v17  ;;  %v1280_v57 = vpack.c.bf16 %v1248_v3, %v1248_v3  ;;  %v1379_v26 = vpack.c.bf16 %v1347_v18, %v1347_v18  ;;  %v1380_v60 = vpack.c.bf16 %v1348_v19, %v1348_v19 }
 0x256   : > { %v1304_v7 = vmul.f32 %v5176_v6, %v5281_v51  ;;  %v1373_v17 = vpack.c.bf16 %v1341_v41, %v1341_v41  ;;  %v1374_v3 = vpack.c.bf16 %v1342_v39, %v1342_v39  ;;  %v1244_v18 = vadd.f32 %v5183_v11, %v1210_v42 }
 0x257   : > { %v1636_v29 = vunpack.c.l.b16 %v1279_v25  ;;  %v1637_v30 = vunpack.c.l.b16 %v1280_v57  ;;  %v2855_v31 = vunpack.c.l.b16 %v1379_v26  ;;  %v2856_v63 = vunpack.c.l.b16 %v1380_v60 }
 0x258   : > { %v2863_v40 = vpack.c.b16 %v2854_v8, %v2853_v20  ;;  %v1634_v46 = vunpack.c.l.b16 %v1277_v52  ;;  %v2852_v19 = vunpack.c.l.b16 %v1376_v21  ;;  %v1340_v22 = vadd.f32 %v5190_v13, %v1306_v54 }
 0x259   : > { %v1645_v1 = vpack.c.b16 %v1637_v30, %v1636_v29  ;;  %v2864_v53 = vpack.c.b16 %v2856_v63, %v2855_v31  ;;  %v1243_v23 = vadd.f32 %v5183_v11, %v1209_v62  ;;  %v2851_v56 = vunpack.c.l.b16 %v1375_v4 }
 0x25a   : > { %v1338_v0 = vadd.f32 %v5190_v13, %v1304_v7  ;;  %v1635_v25 = vunpack.c.l.b16 %v1278_v34  ;;  %v1208_v57 = vmul.f32 %v5171_v5, %v5310_v37  ;;  %v1207_v26 = vmul.f32 %v5171_v5, %v5312_v38 }
 0x25b   : > { %1654 = vmatpush.bf16.xpose.msra.mxu1 %v1645_v1  ;;  %2873 = vmatpush.bf16.msra.mxu3 %v2864_v53  ;;  %v2849_v60 = vunpack.c.l.b16 %v1373_v17  ;;  %v1371_v27 = vpack.c.bf16 %v1339_v16, %v1339_v16  ;;  %v2862_v61 = vpack.c.b16 %v2852_v19, %v2851_v56  ;;  %v2850_v28 = vunpack.c.l.b16 %v1374_v3 }
 0x25c   : > { %1514 = vmatpush.bf16.xpose.msra.mxu0 %v1495_v44  ;;  %v1301_v44 = vmul.f32 %v5176_v6, %v5245_v10  ;;  %v1644_v58 = vpack.c.b16 %v1635_v25, %v1634_v46  ;;  %v1276_v29 = vpack.c.bf16 %v1244_v18, %v1244_v18  ;;  %v1494_v30 = vpack.c.b16 %v1480_v35, %v1479_v55  ;;  %v3977_v25 = vld [vmem:[#allocation2 + $0x30] sm:$0xff] }
 0x25d   : > { %v1249_v10 = vpack.c.bf16 %v5347_v49, %v5347_v49  ;;  %v1250_v31 = vpack.c.bf16 %v1218_v14, %v1218_v14  ;;  %v1299_v63 = vmul.f32 %v5176_v6, %v5213_v24  ;;  %v1275_v37 = vpack.c.bf16 %v1243_v23, %v1243_v23 }
 0x25e   : > { %v1372_v38 = vpack.c.bf16 %v1340_v22, %v1340_v22  ;;  %v1336_v39 = vadd.f32 %v5190_v13, %v1302_v59  ;;  %v1335_v41 = vadd.f32 %v5190_v13, %v1301_v44  ;;  %v2847_v42 = vunpack.c.l.b16 %v1371_v27 }
 0x25f   : > { %2874 = vmatpush.bf16.msra.mxu3 %v2863_v40  ;;  %v1370_v52 = vpack.c.bf16 %v1338_v0, %v1338_v0  ;;  %v1242_v1 = vadd.f32 %v5183_v11, %v1208_v57  ;;  %v1241_v53 = vadd.f32 %v5183_v11, %v1207_v26  ;;  %v2861_v49 = vpack.c.b16 %v2850_v28, %v2849_v60 }
 0x260   : > { %v1633_v20 = vunpack.c.l.b16 %v1276_v29  ;;  %v1300_v24 = vmul.f32 %v5176_v6, %v5185_v12  ;;  %v1477_v21 = vunpack.c.l.b16 %v1249_v10  ;;  %v1478_v54 = vunpack.c.l.b16 %v1250_v31 }
 0x261   : > { %v1333_v62 = vadd.f32 %v5190_v13, %v1299_v63  ;;  %v1632_v55 = vunpack.c.l.b16 %v1275_v37  ;;  %v2848_v4 = vunpack.c.l.b16 %v1372_v38  ;;  %v1369_v7 = vpack.c.bf16 %v1337_v9, %v1337_v9 }
 0x262   : > { %v1205_v8 = vmul.f32 %v5171_v5, %v5279_v50  ;;  %v2846_v34 = vunpack.c.l.b16 %v1370_v52  ;;  %v1367_v14 = vpack.c.bf16 %v1335_v41, %v1335_v41  ;;  %v1368_v16 = vpack.c.bf16 %v1336_v39, %v1336_v39  ;;  %v3979_v39 = vld [vmem:[#allocation2 + $0x58] sm:$0xff]  ;;  %v3981_v52 = vld [vmem:[#allocation2 + $0x50] sm:$0xff] }
 0x263   : > { %1655 = vmatpush.bf16.xpose.msra.mxu1 %v1644_v58  ;;  %2875 = vmatpush.bf16.msra.mxu3 %v2862_v61  ;;  %v1643_v35 = vpack.c.b16 %v1633_v20, %v1632_v55  ;;  %v2860_v17 = vpack.c.b16 %v2848_v4, %v2847_v42  ;;  %v1273_v3 = vpack.c.bf16 %v1241_v53, %v1241_v53  ;;  %v2845_v46 = vunpack.c.l.b16 %v1369_v7  ;;  %v3980_v41 = vld [vmem:[#allocation2 + $0x18] sm:$0xff]  ;;  %v3986_v42 = vld [vmem:[#allocation2 + $0x20] sm:$0xff]  ;;  %v3982_v53 = vld [vmem:[#allocation2 + $0x68] sm:$0xff] }
 0x264   : > { %1515 = vmatpush.bf16.xpose.msra.mxu0 %v1494_v30  ;;  %v1274_v18 = vpack.c.bf16 %v1242_v1, %v1242_v1  ;;  %v1493_v40 = vpack.c.b16 %v1478_v54, %v1477_v21  ;;  %v1334_v6 = vadd.f32 %v5190_v13, %v1300_v24  ;;  %v1206_v12 = vmul.f32 %v5171_v5, %v5267_v43  ;;  %v3987_v1 = vld [vmem:[#allocation2 + $0x10] sm:$0xff]  ;;  %v3992_v21 = vld [vmem:[#allocation2 + $0x28] sm:$0xff] }
 0x265   : > { %v2843_v19 = vunpack.c.l.b16 %v1367_v14  ;;  %v2844_v36 = vunpack.c.l.b16 %v1368_v16  ;;  %v1365_v50 = vpack.c.bf16 %v1333_v62, %v1333_v62  ;;  %v1239_v22 = vadd.f32 %v5183_v11, %v1205_v8 }
 0x266   : > { %v2859_v23 = vpack.c.b16 %v2846_v34, %v2845_v46  ;;  %v1630_v56 = vunpack.c.l.b16 %v1273_v3  ;;  %v1631_v59 = vunpack.c.l.b16 %v1274_v18  ;;  %v1240_v44 = vadd.f32 %v5183_v11, %v1206_v12 }
 0x267   : > { %2876 = vmatpush.bf16.msra.mxu3 %v2861_v49  ;;  %v1366_v0 = vpack.c.bf16 %v1334_v6, %v1334_v6  ;;  %v2841_v13 = vunpack.c.l.b16 %v1365_v50  ;;  %v1204_v43 = vmul.f32 %v5171_v5, %v5281_v51  ;;  %v2858_v26 = vpack.c.b16 %v2844_v36, %v2843_v19  ;;  %v3991_v49 = vld [vmem:[#allocation2 + $0x78] sm:$0xff]  ;;  %v5494_v36 = vld [vmem:[#allocation3] sm:$0xff] }
 0x268   : > { %v1642_v57 = vpack.c.b16 %v1631_v59, %v1630_v56  ;;  %v1271_v60 = vpack.c.bf16 %v1239_v22, %v1239_v22  ;;  %v1203_v27 = vmul.f32 %v5171_v5, %v5235_v45  ;;  %v1272_v61 = vpack.c.bf16 %v1240_v44, %v1240_v44  ;;  %v3978_v5 = vld [vmem:[#allocation2] sm:$0xff] }
 0x269   : > { %v2842_v58 = vunpack.c.l.b16 %v1366_v0  ;;  %v1238_v28 = vadd.f32 %v5183_v11, %v1204_v43 }
 0x26a   : > { %v1628_v9 = vunpack.c.l.b16 %v1271_v60  ;;  %v1237_v30 = vadd.f32 %v5183_v11, %v1203_v27  ;;  %v1629_v10 = vunpack.c.l.b16 %v1272_v61  ;;  %v3985_v11 = vld [vmem:[#allocation2 + $0x40] sm:$0xff] }
 0x26b   : > { %1656 = vmatpush.bf16.xpose.msra.mxu1 %v1643_v35  ;;  %2877 = vmatpush.bf16.msra.mxu3 %v2860_v17  ;;  %v2857_v29 = vpack.c.b16 %v2842_v58, %v2841_v13  ;;  %v1270_v31 = vpack.c.bf16 %v1238_v28, %v1238_v28  ;;  %v1704_v13 = vld [vmem:[#allocation3 + $0x8] sm:$0xff] }
 0x26c   : > { %1516 = vmatpush.bf16.xpose.msra.mxu0 %v1493_v40  ;;  %v1641_v51 = vpack.c.b16 %v1629_v10, %v1628_v9  ;;  %v1269_v63 = vpack.c.bf16 %v1237_v30, %v1237_v30  ;;  %v5542_v9 = vld [vmem:[#allocation3 + $0x80] sm:$0xff] }
 0x26d   : > { %v1627_v37 = vunpack.c.l.b16 %v1270_v31 }
 0x26e   : > { %v1626_v38 = vunpack.c.l.b16 %v1269_v63  ;;  %v1720_v63 = vld [vmem:[#allocation3 + $0x88] sm:$0xff] }
 0x26f   : > { %2878 = vmatpush.bf16.msra.mxu3 %v2859_v23 }
 0x270   : > { %v1640_v45 = vpack.c.b16 %v1627_v37, %v1626_v38  ;;  %v5554_v37 = vld [vmem:[#allocation3 + $0x18] sm:$0xff] }
 0x273   : > { %1657 = vmatpush.bf16.xpose.msra.mxu1 %v1642_v57  ;;  %2879 = vmatpush.bf16.msra.mxu3 %v2858_v26  ;;  %v5517_v57 = vld [vmem:[#allocation3 + $0x10] sm:$0xff] }
 0x274   : > { %1517 = vmatmul.bf16.vlgmr.msra.gmra.mxu0 %v3977_v25 }
 0x277   : > { %2880 = vmatpush.bf16.msra.mxu3 %v2857_v29 }
 0x27b   : > { %1658 = vmatpush.bf16.xpose.msra.mxu1 %v1641_v51 }
 0x283   : > { %1659 = vmatpush.bf16.xpose.msra.mxu1 %v1640_v45 }
 0x284   : > { %1522 = vmatmul.bf16.gmra.mxu0 %v3978_v5 }
 0x28b   : > { %1660 = vmatpush.bf16.xpose.msra.mxu1 %v1639_v15  ;;  %v3989_v15 = vld [vmem:[#allocation2 + $0x60] sm:$0xff] }
 0x293   : > { %1661 = vmatpush.bf16.xpose.msra.mxu1 %v1638_v33 }
 0x294   : > { %1527 = vmatmul.bf16.gmra.mxu0 %v3979_v39 }
 0x29a   : > { %1662 = vmatmul.bf16.vlgmr.msra.gmra.mxu1 %v3985_v11  ;;  %v1721_v11 = vld [vmem:[#allocation3 + $0x90] sm:$0xff] }
 0x2a4   : > { %1532 = vmatmul.bf16.gmra.mxu0 %v3980_v41 }
 0x2aa   : > { %1667 = vmatmul.bf16.gmra.mxu1 %v3986_v42 }
 0x2b4   : > { %1537 = vmatmul.bf16.gmra.mxu0 %v3981_v52 }
 0x2ba   : > { %1672 = vmatmul.bf16.gmra.mxu1 %v3987_v1 }
 0x2c4   : > { %1542 = vmatmul.bf16.gmra.mxu0 %v3982_v53  ;;  %v5563_v53 = vld [vmem:[#allocation3 + $0x98] sm:$0xff] }
 0x2ca   : > { %1677 = vmatmul.bf16.gmra.mxu1 %v3988_v47 }
 0x2d4   : > { %1547 = vmatmul.bf16.gmra.mxu0 %v3983_v48 }
 0x2da   : > { %1682 = vmatmul.bf16.gmra.mxu1 %v3989_v15 }
 0x2e4   : > { %1552 = vmatmul.bf16.gmra.mxu0 %v3984_v2  ;;  %v1723_v2 = vld [vmem:[#allocation3 + $0xa0] sm:$0xff] }
 0x2ea   : > { %1687 = vmatmul.bf16.gmra.mxu1 %v3990_v32  ;;  %v5571_v32 = vld [vmem:[#allocation3 + $0x20] sm:$0xff] }
 0x2f1   : > { %v5432_v33 = vpop.f32.mrf.mxu0 }
 0x2f2   : > { %1735 = vmax.xlane.f32.xlu2 %v5432_v33 }
 0x2f9   : > { %v5435_v20 = vpop.f32.mrf.mxu0 }
 0x2fa   : > { %1692 = vmatmul.bf16.gmra.mxu1 %v3991_v49  ;;  %1737 = vmax.xlane.f32.xlu0 %v5435_v20 }
 0x301   : > { %v5438_v24 = vpop.f32.mrf.mxu0 }
 0x302   : > { %1739 = vmax.xlane.f32.xlu1 %v5438_v24 }
 0x309   : > { %v5444_v62 = vpop.f32.mrf.mxu0 }
 0x30a   : > { %1697 = vmatmul.bf16.gmra.mxu1 %v3992_v21 }
 0x311   : > { %v5450_v4 = vpop.f32.mrf.mxu0 }
 0x317   : > { %v5441_v54 = vpop.f32.mrf.mxu1 }
 0x318   : > { %1767 = vmax.xlane.f32.xlu2 %v5441_v54 }
 0x319   : > { %v5455_v8 = vpop.f32.mrf.mxu0 }
 0x31f   : > { %v5446_v55 = vpop.f32.mrf.mxu1 }
 0x320   : > { %1769 = vmax.xlane.f32.xlu0 %v5446_v55  ;;  %1741 = vmax.xlane.f32.xlu2 %v5444_v62 }
 0x321   : > { %v5460_v14 = vpop.f32.mrf.mxu0 }
 0x327   : > { %v5452_v7 = vpop.f32.mrf.mxu1 }
 0x328   : > { %1771 = vmax.xlane.f32.xlu1 %v5452_v7 }
 0x329   : > { %v5468_v17 = vpop.f32.mrf.mxu0 }
 0x32f   : > { %v5457_v34 = vpop.f32.mrf.mxu1 }
 0x330   : > { %1773 = vmax.xlane.f32.xlu2 %v5457_v34 }
 0x331   : > { %v5476_v18 = vpop.f32.mrf.mxu0 }
 0x337   : > { %v5462_v16 = vpop.f32.mrf.mxu1 }
 0x338   : > { %1775 = vmax.xlane.f32.xlu0 %v5462_v16  ;;  %1743 = vmax.xlane.f32.xlu2 %v5450_v4 }
 0x339   : > { %v5482_v6 = vpop.f32.mrf.mxu0 }
 0x33f   : > { %v5466_v35 = vpop.f32.mrf.mxu1 }
 0x340   : > { %1745 = vmax.xlane.f32.xlu0 %v5455_v8  ;;  %1777 = vmax.xlane.f32.xlu1 %v5466_v35 }
 0x341   : > { %v5488_v46 = vpop.f32.mrf.mxu0 }
 0x347   : > { %v5472_v3 = vpop.f32.mrf.mxu1 }
 0x348   : > { %1779 = vmax.xlane.f32.xlu2 %v5472_v3  ;;  %1747 = vmax.xlane.f32.xlu1 %v5460_v14 }
 0x349   : > { %v5501_v56 = vpop.f32.mrf.mxu0 }
 0x34f   : > { %v5478_v40 = vpop.f32.mrf.mxu1 }
 0x350   : > { %1749 = vmax.xlane.f32.xlu2 %v5468_v17  ;;  %1781 = vmax.xlane.f32.xlu0 %v5478_v40 }
 0x351   : > { %v5513_v0 = vpop.f32.mrf.mxu0 }
 0x357   : > { %v5484_v12 = vpop.f32.mrf.mxu1 }
 0x358   : > { %1783 = vmax.xlane.f32.xlu1 %v5484_v12  ;;  %1751 = vmax.xlane.f32.xlu0 %v5476_v18 }
 0x359   : > { %v5530_v58 = vpop.f32.mrf.mxu0 }
 0x35a   : > { %6480 = vst [vmem:[#allocation16_spill] sm:$0xff] %v5530_v58 }
 0x35f   : > { %v5490_v19 = vpop.f32.mrf.mxu1 }
 0x360   : > { %1753 = vmax.xlane.f32.xlu1 %v5482_v6  ;;  %1785 = vmax.xlane.f32.xlu2 %v5490_v19 }
 0x361   : > { %v5536_v28 = vpop.f32.mrf.mxu0 }
 0x362   : > { %6482 = vst [vmem:[#allocation18_spill] sm:$0xff] %v5536_v28 }
 0x365   : > { %v1736_v50 = vpop.xlane.xlu2 %1735 }
 0x366   : > { %v5497_v22 = vmax.f32 %v5494_v36, %v1736_v50 }
 0x367   : > { %v5499_v23 = vpop.f32.mrf.mxu1 }
 0x368   : > { %1787 = vmax.xlane.f32.xlu0 %v5499_v23  ;;  %1755 = vmax.xlane.f32.xlu2 %v5488_v46  ;;  %2986 = vst.msk [vmem:[#allocation3] sm:$0xff] %vm2343_vm1, %v5497_v22 }
 0x36d   : > { %v1738_v25 = vpop.xlane.xlu0 %1737 }
 0x36e   : > { %v5515_v43 = vmax.f32 %v1704_v13, %v1738_v25 }
 0x36f   : > { %v5509_v44 = vpop.f32.mrf.mxu1 }
 0x370   : > { %1757 = vmax.xlane.f32.xlu0 %v5501_v56  ;;  %1789 = vmax.xlane.f32.xlu1 %v5509_v44  ;;  %2987 = vst.msk [vmem:[#allocation3 + $0x8] sm:$0xff] %vm2343_vm1, %v5515_v43  ;;  %v1832_v52 = vsub.f32 %v1704_v13, %v5515_v43 }
 0x372   : > { %v1865_v1 = vmul.f32 1.442695, %v1832_v52 }
 0x374   : > { %4203 = vpow2.f32 %v1865_v1 }
 0x375   : > { %v1740_v26 = vpop.xlane.xlu1 %1739 }
 0x376   : > { %v5522_v60 = vmax.f32 %v5517_v57, %v1740_v26 }
 0x377   : > { %v5524_v27 = vpop.f32.mrf.mxu1 }
 0x378   : > { %6479 = vst [vmem:[#allocation15_spill] sm:$0xff] %v5524_v27  ;;  %1791 = vmax.xlane.f32.xlu2 %v5524_v27  ;;  %1759 = vmax.xlane.f32.xlu1 %v5513_v0 }
 0x379   : > { %2988 = vst.msk [vmem:[#allocation3 + $0x10] sm:$0xff] %vm2343_vm1, %v5522_v60 }
 0x37a   : > { %v5573_v49 = vpop.eup %4203 }
 0x37b   : > { %6485 = vst [vmem:[#allocation21_spill] sm:$0xff] %v5573_v49 }
 0x37f   : > { %v5532_v61 = vpop.f32.mrf.mxu1 }
 0x380   : > { %6481 = vst [vmem:[#allocation17_spill] sm:$0xff] %v5532_v61  ;;  %1761 = vmax.xlane.f32.xlu2 %v5530_v58  ;;  %1793 = vmax.xlane.f32.xlu0 %v5532_v61 }
 0x387   : > { %v5538_v29 = vpop.f32.mrf.mxu1 }
 0x388   : > { %6483 = vst [vmem:[#allocation19_spill] sm:$0xff] %v5538_v29  ;;  %1763 = vmax.xlane.f32.xlu0 %v5536_v28  ;;  %1795 = vmax.xlane.f32.xlu1 %v5538_v29 }
 0x38b   : > { %v1768_v30 = vpop.xlane.xlu2 %1767 }
 0x38c   : > { %v5545_v10 = vmax.f32 %v5542_v9, %v1768_v30 }
 0x38e   : > { %3002 = vst.msk [vmem:[#allocation3 + $0x80] sm:$0xff] %vm2343_vm1, %v5545_v10 }
 0x38f   : > { %v5551_v31 = vpop.f32.mrf.mxu1 }
 0x390   : > { %6484 = vst [vmem:[#allocation20_spill] sm:$0xff] %v5551_v31  ;;  %1797 = vmax.xlane.f32.xlu2 %v5551_v31 }
 0x393   : > { %v1770_v38 = vpop.xlane.xlu0 %1769  ;;  %v1742_v5 = vpop.xlane.xlu2 %1741 }
 0x394   : > { %v1816_v45 = vmax.f32 %v1720_v63, %v1770_v38  ;;  %v1802_v39 = vmax.f32 %v5554_v37, %v1742_v5  ;;  %v1724_v5 = vld [vmem:[#allocation3 + $0xa8] sm:$0xff] }
 0x396   : > { %3003 = vst.msk [vmem:[#allocation3 + $0x88] sm:$0xff] %vm2343_vm1, %v1816_v45  ;;  %v1848_v15 = vsub.f32 %v1720_v63, %v1816_v45  ;;  %v1833_v63 = vsub.f32 %v5517_v57, %v5522_v60  ;;  %v5592_v57 = vld [vmem:[#allocation3 + $0xb0] sm:$0xff] }
 0x397   : > { %2989 = vst.msk [vmem:[#allocation3 + $0x18] sm:$0xff] %vm2343_vm1, %v1802_v39 }
 0x398   : > { %v1897_v26 = vmul.f32 1.442695, %v1848_v15 }
 0x39a   : > { %4205 = vpow2.f32 %v1897_v26 }
 0x39b   : > { %v1772_v41 = vpop.xlane.xlu1 %1771 }
 0x39c   : > { %v1817_v42 = vmax.f32 %v1721_v11, %v1772_v41  ;;  %1929 = vperm.xlu0 %4196, %v5497_v22  }
 0x39e   : > { %3004 = vst.msk [vmem:[#allocation3 + $0x90] sm:$0xff] %vm2343_vm1, %v1817_v42  ;;  %v1849_v30 = vsub.f32 %v1721_v11, %v1817_v42  ;;  %v1867_v11 = vmul.f32 1.442695, %v1833_v63  ;;  %v1834_v63 = vsub.f32 %v5554_v37, %v1802_v39 }
 0x3a0   : > { %v1899_v38 = vmul.f32 1.442695, %v1849_v30  ;;  %v5588_v15 = vpop.eup %4205 }
 0x3a1   : > { %2009 = vperm.xlu1 %4197, %v5545_v10   ;;  %6486 = vst [vmem:[#allocation22_spill] sm:$0xff] %v5588_v15 }
 0x3a2   : > { %4207 = vpow2.f32 %v1899_v38 }
 0x3a3   : > { %v1774_v47 = vpop.xlane.xlu2 %1773  ;;  %4209 = vpow2.f32 %v1867_v11  ;;  %v5613_v11 = vld [vmem:[#allocation3 + $0x38] sm:$0xff] }
 0x3a4   : > { %v5566_v48 = vmax.f32 %v5563_v53, %v1774_v47  ;;  %2014 = vperm.xlu0 %4196, %v1816_v45   ;;  %v5584_v45 = vld [vmem:[#allocation3 + $0x28] sm:$0xff] }
 0x3a6   : > { %3005 = vst.msk [vmem:[#allocation3 + $0x98] sm:$0xff] %vm2343_vm1, %v5566_v48 }
 0x3a8   : > { %1939 = vperm.xlu2 %4198, %v5522_v60   ;;  %v5594_v60 = vld [vmem:[#allocation3 + $0x30] sm:$0xff] }
 0x3ab   : > { %v1776_v21 = vpop.xlane.xlu0 %1775  ;;  %v1744_v50 = vpop.xlane.xlu2 %1743 }
 0x3ac   : > { %v1819_v13 = vmax.f32 %v1723_v2, %v1776_v21  ;;  %2415 = vperm.xlu0 %4196, %v5573_v49   ;;  %v5577_v25 = vmax.f32 %v5571_v32, %v1744_v50  ;;  %v5651_v49 = vld [vmem:[#allocation3 + $0x48] sm:$0xff] }
 0x3ae   : > { %3006 = vst.msk [vmem:[#allocation3 + $0xa0] sm:$0xff] %vm2343_vm1, %v1819_v13 }
 0x3af   : > { %2990 = vst.msk [vmem:[#allocation3 + $0x20] sm:$0xff] %vm2343_vm1, %v5577_v25 }
 0x3b0   : > { %2019 = vperm.xlu2 %4198, %v1817_v42   ;;  %v5596_v42 = vpop.eup %4207 }
 0x3b1   : > { %6487 = vst [vmem:[#allocation23_spill] sm:$0xff] %v5596_v42  ;;  %v5608_v38 = vpop.eup %4209 }
 0x3b2   : > { %6488 = vst [vmem:[#allocation24_spill] sm:$0xff] %v5608_v38 }
 0x3b3   : > { %v1778_v41 = vpop.xlane.xlu1 %1777  ;;  %v1746_v52 = vpop.xlane.xlu0 %1745 }
 0x3b4   : > { %v1820_v1 = vmax.f32 %v1724_v5, %v1778_v41  ;;  %v1804_v47 = vmax.f32 %v5584_v45, %v1746_v52  ;;  %1944 = vperm.xlu0 %4196, %v1802_v39   ;;  %v1869_v41 = vmul.f32 1.442695, %v1834_v63  ;;  %v1851_v52 = vsub.f32 %v1723_v2, %v1819_v13  ;;  %v5627_v2 = vld [vmem:[#allocation3 + $0xc0] sm:$0xff] }
 0x3b5   : > { %v5629_v63 = vld [vmem:[#allocation3 + $0x40] sm:$0xff] }
 0x3b6   : > { %3007 = vst.msk [vmem:[#allocation3 + $0xa8] sm:$0xff] %vm2343_vm1, %v1820_v1  ;;  %4211 = vpow2.f32 %v1869_v41  ;;  %v1903_v59 = vmul.f32 1.442695, %v1851_v52 }
 0x3b7   : > { %2991 = vst.msk [vmem:[#allocation3 + $0x28] sm:$0xff] %vm2343_vm1, %v1804_v47 }
 0x3b8   : > { %2495 = vperm.xlu2 %4198, %v5588_v15   ;;  %4213 = vpow2.f32 %v1903_v59  ;;  %v1852_v59 = vsub.f32 %v1724_v5, %v1820_v1 }
 0x3bb   : > { %v1780_v21 = vpop.xlane.xlu2 %1779  ;;  %v1748_v50 = vpop.xlane.xlu1 %1747 }
 0x3bc   : > { %v5599_v26 = vmax.f32 %v5592_v57, %v1780_v21  ;;  %2500 = vperm.xlu0 %4196, %v5596_v42   ;;  %v5603_v30 = vmax.f32 %v5594_v60, %v1748_v50  ;;  %v5615_v21 = vld [vmem:[#allocation3 + $0xb8] sm:$0xff]  ;;  %v1905_v42 = vmul.f32 1.442695, %v1852_v59  ;;  %v5668_v59 = vld [vmem:[#allocation3 + $0x50] sm:$0xff] }
 0x3be   : > { %3008 = vst.msk [vmem:[#allocation3 + $0xb0] sm:$0xff] %vm2343_vm1, %v5599_v26  ;;  %4215 = vpow2.f32 %v1905_v42 }
 0x3bf   : > { %2992 = vst.msk [vmem:[#allocation3 + $0x30] sm:$0xff] %vm2343_vm1, %v5603_v30 }
 0x3c0   : > { %2420 = vperm.xlu2 %4198, %v5608_v38   ;;  %v5633_v38 = vpop.eup %4211 }
 0x3c1   : > { %6490 = vst [vmem:[#allocation26_spill] sm:$0xff] %v5633_v38  ;;  %v5645_v15 = vpop.eup %4213 }
 0x3c2   : > { %6491 = vst [vmem:[#allocation27_spill] sm:$0xff] %v5645_v15 }
 0x3c3   : > { %v1750_v50 = vpop.xlane.xlu2 %1749  ;;  %v1782_v51 = vpop.xlane.xlu0 %1781 }
 0x3c4   : > { %v5618_v37 = vmax.f32 %v5613_v11, %v1750_v50  ;;  %v5621_v39 = vmax.f32 %v5615_v21, %v1782_v51  ;;  %2029 = vperm.xlu0 %4196, %v1819_v13   ;;  %v5631_v50 = vpop.f32.mrf.mxu0 }
 0x3c5   : > { %6489 = vst [vmem:[#allocation25_spill] sm:$0xff] %v5631_v50 }
 0x3c6   : > { %2993 = vst.msk [vmem:[#allocation3 + $0x38] sm:$0xff] %vm2343_vm1, %v5618_v37 }
 0x3c7   : > { %3009 = vst.msk [vmem:[#allocation3 + $0xb8] sm:$0xff] %vm2343_vm1, %v5621_v39 }
 0x3c8   : > { %2034 = vperm.xlu2 %4198, %v1820_v1  }
 0x3cb   : > { %v1784_v51 = vpop.xlane.xlu1 %1783  ;;  %1765 = vmax.xlane.f32.xlu1 %v5631_v50  ;;  %v1752_v13 = vpop.xlane.xlu0 %1751 }
 0x3cc   : > { %v5637_v41 = vmax.f32 %v5627_v2, %v1784_v51  ;;  %2425 = vperm.xlu0 %4196, %v5633_v38   ;;  %v5641_v52 = vmax.f32 %v5629_v63, %v1752_v13  ;;  %v1836_v51 = vsub.f32 %v5584_v45, %v1804_v47  ;;  %v5653_v38 = vld [vmem:[#allocation3 + $0xc8] sm:$0xff]  ;;  %v5666_v45 = vld [vmem:[#allocation3 + $0xd0] sm:$0xff] }
 0x3ce   : > { %3010 = vst.msk [vmem:[#allocation3 + $0xc0] sm:$0xff] %vm2343_vm1, %v5637_v41  ;;  %v1873_v28 = vmul.f32 1.442695, %v1836_v51  ;;  %v1837_v51 = vsub.f32 %v5594_v60, %v5603_v30  ;;  %v1854_v60 = vsub.f32 %v5615_v21, %v5621_v39  ;;  %v5719_v21 = vld [vmem:[#allocation3 + $0x60] sm:$0xff] }
 0x3cf   : > { %2994 = vst.msk [vmem:[#allocation3 + $0x40] sm:$0xff] %vm2343_vm1, %v5641_v52 }
 0x3d0   : > { %2510 = vperm.xlu2 %4198, %v5645_v15   ;;  %4217 = vpow2.f32 %v1873_v28  ;;  %v5697_v28 = vld [vmem:[#allocation3 + $0x58] sm:$0xff] }
 0x3d3   : > { %v1754_v13 = vpop.xlane.xlu1 %1753  ;;  %v1786_v31 = vpop.xlane.xlu2 %1785 }
 0x3d4   : > { %v5656_v5 = vmax.f32 %v5651_v49, %v1754_v13  ;;  %v5659_v1 = vmax.f32 %v5653_v38, %v1786_v31  ;;  %1954 = vperm.xlu0 %4196, %v1804_v47   ;;  %v5670_v13 = vpop.eup %4215 }
 0x3d5   : > { %6492 = vst [vmem:[#allocation28_spill] sm:$0xff] %v5670_v13 }
 0x3d6   : > { %2995 = vst.msk [vmem:[#allocation3 + $0x48] sm:$0xff] %vm2343_vm1, %v5656_v5  ;;  %v5685_v50 = vpop.eup %4217 }
 0x3d7   : > { %3011 = vst.msk [vmem:[#allocation3 + $0xc8] sm:$0xff] %vm2343_vm1, %v5659_v1 }
 0x3d8   : > { %1959 = vperm.xlu2 %4198, %v5603_v30   ;;  %6493 = vst [vmem:[#allocation29_spill] sm:$0xff] %v5685_v50  ;;  %v5695_v30 = vld [vmem:[#allocation3 + $0xd8] sm:$0xff] }
 0x3db   : > { %v1788_v31 = vpop.xlane.xlu0 %1787  ;;  %v1756_v15 = vpop.xlane.xlu2 %1755 }
 0x3dc   : > { %v5673_v47 = vmax.f32 %v5666_v45, %v1788_v31  ;;  %2515 = vperm.xlu0 %4196, %v5670_v13   ;;  %v5677_v42 = vmax.f32 %v5668_v59, %v1756_v15  ;;  %v6494_v31 = vsub.f32 %v5494_v36, %v5497_v22  ;;  %v1875_v15 = vmul.f32 1.442695, %v1837_v51 }
 0x3dd   : > { %v1909_v36 = vmul.f32 1.442695, %v1854_v60 }
 0x3de   : > { %3012 = vst.msk [vmem:[#allocation3 + $0xd0] sm:$0xff] %vm2343_vm1, %v5673_v47  ;;  %v1863_v13 = vmul.f32 1.442695, %v6494_v31 }
 0x3df   : > { %2996 = vst.msk [vmem:[#allocation3 + $0x50] sm:$0xff] %vm2343_vm1, %v5677_v42 }
 0x3e0   : > { %2435 = vperm.xlu2 %4198, %v5685_v50   ;;  %4219 = vpow2.f32 %v1863_v13 }
 0x3e1   : > { %4221 = vpow2.f32 %v1875_v15 }
 0x3e2   : > { %4223 = vpow2.f32 %v1909_v36 }
 0x3e3   : > { %v1790_v58 = vpop.xlane.xlu1 %1789  ;;  %v1758_v29 = vpop.xlane.xlu0 %1757 }
 0x3e4   : > { %v5700_v27 = vmax.f32 %v5695_v30, %v1790_v58  ;;  %v5703_v61 = vmax.f32 %v5697_v28, %v1758_v29  ;;  %1934 = vperm.xlu1 %4197, %v5515_v43   ;;  %2044 = vperm.xlu0 %4196, %v5621_v39   ;;  %v6495_v58 = vsub.f32 %v5542_v9, %v5545_v10  ;;  %v5717_v43 = vld [vmem:[#allocation3 + $0xe0] sm:$0xff] }
 0x3e5   : > { %v1855_v10 = vsub.f32 %v5627_v2, %v5637_v41 }
 0x3e6   : > { %3013 = vst.msk [vmem:[#allocation3 + $0xd8] sm:$0xff] %vm2343_vm1, %v5700_v27  ;;  %v1895_v29 = vmul.f32 1.442695, %v6495_v58  ;;  %v5721_v39 = vpop.eup %4219  ;;  %v1839_v58 = vsub.f32 %v5629_v63, %v5641_v52 }
 0x3e7   : > { %2997 = vst.msk [vmem:[#allocation3 + $0x58] sm:$0xff] %vm2343_vm1, %v5703_v61  ;;  %v5723_v13 = vpop.eup %4221  ;;  %v1911_v36 = vmul.f32 1.442695, %v1855_v10  ;;  %v1840_v10 = vsub.f32 %v5651_v49, %v5656_v5 }
 0x3e8   : > { %2049 = vperm.xlu2 %4198, %v5637_v41   ;;  %6496 = vst [vmem:[#allocation30_spill] sm:$0xff] %v5723_v13  ;;  %4225 = vpow2.f32 %v1895_v29  ;;  %v5737_v60 = vpop.eup %4223  ;;  %v5746_v29 = vld [vmem:[#allocation3 + $0xe8] sm:$0xff]  ;;  %v1879_v63 = vmul.f32 1.442695, %v1839_v58  ;;  %v1850_v58 = vsub.f32 %v5563_v53, %v5566_v48 }
 0x3e9   : > { %6497 = vst [vmem:[#allocation31_spill] sm:$0xff] %v5737_v60  ;;  %4227 = vpow2.f32 %v1911_v36 }
 0x3ea   : > { %6498 = vst [vmem:[#allocation32_spill] sm:$0xff] %v5746_v29  ;;  %4229 = vpow2.f32 %v1879_v63 }
 0x3eb   : > { %v1792_v51 = vpop.xlane.xlu2 %1791  ;;  %v1760_v31 = vpop.xlane.xlu1 %1759 }
 0x3ec   : > { %v5726_v15 = vmax.f32 %v5717_v43, %v1792_v51  ;;  %2410 = vperm.xlu1 %4197, %v5721_v39   ;;  %2440 = vperm.xlu0 %4196, %v5723_v13   ;;  %v5731_v9 = vmax.f32 %v5719_v21, %v1760_v31  ;;  %v5744_v51 = vld [vmem:[#allocation3 + $0x68] sm:$0xff] }
 0x3ee   : > { %3014 = vst.msk [vmem:[#allocation3 + $0xe0] sm:$0xff] %vm2343_vm1, %v5726_v15  ;;  %v5748_v31 = vpop.eup %4225  ;;  %v1843_v53 = vsub.f32 %v5719_v21, %v5731_v9 }
 0x3ef   : > { %2998 = vst.msk [vmem:[#allocation3 + $0x60] sm:$0xff] %vm2343_vm1, %v5731_v9 }
 0x3f0   : > { %2525 = vperm.xlu2 %4198, %v5737_v60   ;;  %v5769_v60 = vpop.eup %4227 }
 0x3f1   : > { %6499 = vst [vmem:[#allocation33_spill] sm:$0xff] %v5769_v60 }
 0x3f3   : > { %v1762_v2 = vpop.xlane.xlu2 %1761  ;;  %v1794_v41 = vpop.xlane.xlu0 %1793 }
 0x3f4   : > { %v5751_v22 = vmax.f32 %v5744_v51, %v1762_v2  ;;  %v5754_v50 = vmax.f32 %v5746_v29, %v1794_v41  ;;  %2490 = vperm.xlu1 %4197, %v5748_v31   ;;  %1969 = vperm.xlu0 %4196, %v5641_v52   ;;  %v5765_v2 = vld [vmem:[#allocation3 + $0xf0] sm:$0xff]  ;;  %v1835_v29 = vsub.f32 %v5571_v32, %v5577_v25 }
 0x3f5   : > { %v5767_v41 = vld [vmem:[#allocation3 + $0x70] sm:$0xff] }
 0x3f6   : > { %2999 = vst.msk [vmem:[#allocation3 + $0x68] sm:$0xff] %vm2343_vm1, %v5751_v22 }
 0x3f7   : > { %3015 = vst.msk [vmem:[#allocation3 + $0xe8] sm:$0xff] %vm2343_vm1, %v5754_v50 }
 0x3f8   : > { %1974 = vperm.xlu2 %4198, %v5656_v5  }
 0x3fb   : > { %v1796_v52 = vpop.xlane.xlu1 %1795  ;;  %v1764_v36 = vpop.xlane.xlu0 %1763 }
 0x3fc   : > { %v5774_v13 = vmax.f32 %v5765_v2, %v1796_v52  ;;  %2024 = vperm.xlu1 %4197, %v5566_v48   ;;  %2530 = vperm.xlu0 %4196, %v5769_v60   ;;  %v5779_v63 = vmax.f32 %v5767_v41, %v1764_v36  ;;  %v5789_v52 = vpop.eup %4229  ;;  %v1901_v48 = vmul.f32 1.442695, %v1850_v58  ;;  %v1881_v36 = vmul.f32 1.442695, %v1840_v10  ;;  %v5794_v60 = vld [vmem:[#allocation3 + $0xf8] sm:$0xff] }
 0x3fd   : > { %6500 = vst [vmem:[#allocation34_spill] sm:$0xff] %v5789_v52  ;;  %v1871_v10 = vmul.f32 1.442695, %v1835_v29  ;;  %v1842_v58 = vsub.f32 %v5697_v28, %v5703_v61 }
 0x3fe   : > { %3016 = vst.msk [vmem:[#allocation3 + $0xf0] sm:$0xff] %vm2343_vm1, %v5774_v13  ;;  %4231 = vpow2.f32 %v1901_v48 }
 0x3ff   : > { %3000 = vst.msk [vmem:[#allocation3 + $0x70] sm:$0xff] %vm2343_vm1, %v5779_v63  ;;  %4233 = vpow2.f32 %v1881_v36  ;;  %v1885_v32 = vmul.f32 1.442695, %v1842_v58 }
 0x400   : > { %2450 = vperm.xlu2 %4198, %v5789_v52   ;;  %4235 = vpow2.f32 %v1871_v10 }
 0x401   : > { %4237 = vpow2.f32 %v1885_v32  ;;  %v1887_v32 = vmul.f32 1.442695, %v1843_v53 }
 0x403   : > { %v1798_v49 = vpop.xlane.xlu2 %1797 }
 0x404   : > { %v5797_v5 = vmax.f32 %v5794_v60, %v1798_v49  ;;  %1949 = vperm.xlu1 %4197, %v5577_v25   ;;  %2059 = vperm.xlu0 %4196, %v5673_v47   ;;  %v5808_v48 = vpop.eup %4231 }
 0x405   : > { %6501 = vst [vmem:[#allocation35_spill] sm:$0xff] %v5808_v48  ;;  %v5810_v49 = vpop.eup %4233 }
 0x406   : > { %3017 = vst.msk [vmem:[#allocation3 + $0xf8] sm:$0xff] %vm2343_vm1, %v5797_v5  ;;  %v5817_v36 = vpop.eup %4235 }
 0x407   : > { %6502 = vst [vmem:[#allocation36_spill] sm:$0xff] %v5810_v49  ;;  %v5824_v58 = vpop.eup %4237 }
 0x408   : > { %2064 = vperm.xlu2 %4198, %v5700_v27   ;;  %6503 = vst [vmem:[#allocation37_spill] sm:$0xff] %v5824_v58 }
 0x40c   : > { %2505 = vperm.xlu1 %4197, %v5808_v48   ;;  %2455 = vperm.xlu0 %4196, %v5810_v49  }
 0x40e   : > { %v5814_v25 = vpop.permute.xlu0 %1929 }
 0x410   : > { %1989 = vperm.xlu2 %4198, %v5731_v9  }
 0x413   : > { %v2010_v29 = vpop.permute.xlu1 %2009 }
 0x414   : > { %v2103_v28 = vsub.f32 %v5441_v54, %v2010_v29  ;;  %2430 = vperm.xlu1 %4197, %v5817_v36   ;;  %1984 = vperm.xlu0 %4196, %v5703_v61   ;;  %v1853_v54 = vsub.f32 %v5592_v57, %v5599_v26  ;;  %v1838_v57 = vsub.f32 %v5613_v11, %v5618_v37 }
 0x416   : > { %v2151_v52 = vmul.f32 1.442695, %v2103_v28  ;;  %v2015_v10 = vpop.permute.xlu0 %2014  ;;  %v1907_v53 = vmul.f32 1.442695, %v1853_v54  ;;  %v1877_v28 = vmul.f32 1.442695, %v1838_v57 }
 0x417   : > { %v2104_v49 = vsub.f32 %v5446_v55, %v2015_v10  ;;  %v6505_v10 = vsub.f32 %v5695_v30, %v5700_v27  ;;  %v1718_v30 = vld [vmem:[#allocation3 + $0x78] sm:$0xff] }
 0x418   : > { %4239 = vpow2.f32 %v2151_v52  ;;  %2465 = vperm.xlu2 %4198, %v5824_v58  }
 0x419   : > { %v2153_v48 = vmul.f32 1.442695, %v2104_v49 }
 0x41b   : > { %4241 = vpow2.f32 %v2153_v48 }
 0x41c   : > { %2039 = vperm.xlu1 %4197, %v5599_v26   ;;  %2074 = vperm.xlu0 %4196, %v5754_v50   ;;  %4243 = vpow2.f32 %v1887_v32  ;;  %v1917_v32 = vmul.f32 1.442695, %v6505_v10 }
 0x41d   : > { %4245 = vpow2.f32 %v1907_v53 }
 0x41e   : > { %v5832_v61 = vpop.eup %4239  ;;  %v5834_v21 = vpop.permute.xlu0 %2415  ;;  %4247 = vpow2.f32 %v1877_v28 }
 0x41f   : > { %v2616_v55 = vpack.c.bf16 %v5832_v61, %v5832_v61  ;;  %4249 = vpow2.f32 %v1917_v32  ;;  %v6508_v32 = vsub.f32 %v5767_v41, %v5779_v63 }
 0x420   : > { %2079 = vperm.xlu2 %4198, %v5774_v13  }
 0x421   : > { %v5839_v9 = vpop.eup %4241  ;;  %v2793_v26 = vunpack.c.l.b16 %v2616_v55 }
 0x422   : > { %v2617_v52 = vpack.c.bf16 %v5839_v9, %v5839_v9  ;;  %v5843_v48 = vpop.eup %4243 }
 0x423   : > { %6504 = vst [vmem:[#allocation38_spill] sm:$0xff] %v5843_v48  ;;  %v5852_v58 = vpop.eup %4245 }
 0x424   : > { %1964 = vperm.xlu1 %4197, %v5618_v37   ;;  %2470 = vperm.xlu0 %4196, %v5843_v48   ;;  %v2794_v49 = vunpack.c.l.b16 %v2617_v52  ;;  %v5856_v11 = vpop.eup %4247  ;;  %v1940_v37 = vpop.permute.xlu2 %1939  ;;  %v1841_v52 = vsub.f32 %v5668_v59, %v5677_v42  ;;  %v1891_v59 = vmul.f32 1.442695, %v6508_v32 }
 0x425   : > { %v5858_v55 = vpop.eup %4249 }
 0x426   : > { %v2809_v29 = vpack.c.b16 %v2794_v49, %v2793_v26  ;;  %v1945_v54 = vpop.permute.xlu0 %1944  ;;  %6506 = vst [vmem:[#allocation39_spill] sm:$0xff] %v5858_v55  ;;  %v6507_v26 = vsub.f32 %v5666_v45, %v5673_v47  ;;  %v1883_v10 = vmul.f32 1.442695, %v1841_v52 }
 0x428   : > { %2881 = vmatmul.bf16.vlgmr.msra.gmra.mxu3 %v2809_v29  ;;  %v1915_v49 = vmul.f32 1.442695, %v6507_v26 }
 0x42a   : > { %4251 = vpow2.f32 %v1915_v49  ;;  %v1844_v49 = vsub.f32 %v5744_v51, %v5751_v22  ;;  %v2089_v51 = vsub.f32 %v5438_v24, %v1940_v37  ;;  %v1856_v24 = vsub.f32 %v5653_v38, %v5659_v1 }
 0x42b   : > { %4253 = vpow2.f32 %v1883_v10 }
 0x42c   : > { %2520 = vperm.xlu1 %4197, %v5852_v58   ;;  %1999 = vperm.xlu0 %4196, %v5779_v63   ;;  %v5864_v27 = vpop.permute.xlu2 %2019  ;;  %4255 = vpow2.f32 %v1891_v59  ;;  %v1889_v32 = vmul.f32 1.442695, %v1844_v49 }
 0x42e   : > { %v5860_v53 = vpop.permute.xlu0 %2500 }
 0x430   : > { %v5883_v45 = vpop.eup %4251 }
 0x431   : > { %6509 = vst [vmem:[#allocation40_spill] sm:$0xff] %v5883_v45  ;;  %v5886_v47 = vpop.eup %4253 }
 0x432   : > { %6510 = vst [vmem:[#allocation41_spill] sm:$0xff] %v5886_v47  ;;  %v5891_v52 = vpop.eup %4255 }
 0x433   : > { %6511 = vst [vmem:[#allocation42_spill] sm:$0xff] %v5891_v52 }
 0x434   : > { %2445 = vperm.xlu1 %4197, %v5856_v11   ;;  %2545 = vperm.xlu0 %4196, %v5858_v55   ;;  %v5879_v48 = vpop.permute.xlu2 %2495 }
 0x436   : > { %v5869_v57 = vpop.permute.xlu0 %2029 }
 0x43c   : > { %2054 = vperm.xlu1 %4197, %v5659_v1   ;;  %v5893_v41 = vpop.permute.xlu2 %2420  ;;  %v1859_v1 = vsub.f32 %v5717_v43, %v5726_v15 }
 0x43e   : > { %v1766_v29 = vpop.xlane.xlu1 %1765  ;;  %v5881_v55 = vpop.permute.xlu0 %2425 }
 0x43f   : > { %v1814_v28 = vmax.f32 %v1718_v30, %v1766_v29 }
 0x441   : > { %3001 = vst.msk [vmem:[#allocation3 + $0x78] sm:$0xff] %vm2343_vm1, %v1814_v28  ;;  %2004 = vperm.xlu2 %4198, %v1814_v28  }
 0x444   : > { %1979 = vperm.xlu1 %4197, %v5677_v42   ;;  %v2087_v42 = vsub.f32 %v5432_v33, %v5814_v25  ;;  %v5900_v33 = vpop.permute.xlu2 %2034 }
 0x446   : > { %v1955_v63 = vpop.permute.xlu0 %1954  ;;  %v2119_v26 = vmul.f32 1.442695, %v2087_v42  ;;  %v2090_v42 = vsub.f32 %v5444_v62, %v1945_v54 }
 0x448   : > { %4257 = vpow2.f32 %v2119_v26  ;;  %v2125_v49 = vmul.f32 1.442695, %v2090_v42  ;;  %v2105_v42 = vsub.f32 %v5452_v7, %v5864_v27  ;;  %v2092_v27 = vsub.f32 %v5455_v8, %v1955_v63 }
 0x449   : > { %2540 = vperm.xlu2 %4198, %v5883_v45  }
 0x44c   : > { %2460 = vperm.xlu1 %4197, %v5886_v47   ;;  %v5915_v47 = vpop.permute.xlu2 %2510 }
 0x44e   : > { %v5902_v25 = vpop.permute.xlu0 %2515 }
 0x451   : > { %2480 = vperm.xlu2 %4198, %v5891_v52   ;;  %v4258_v52 = vpop.eup %4257 }
 0x452   : > { %v2600_v26 = vpack.c.bf16 %v4258_v52, %v4258_v52 }
 0x454   : > { %2069 = vperm.xlu1 %4197, %v5726_v15   ;;  %v2648_v62 = vunpack.c.l.b16 %v2600_v26  ;;  %v2155_v26 = vmul.f32 1.442695, %v2105_v42  ;;  %v2129_v42 = vmul.f32 1.442695, %v2092_v27 }
 0x456   : > { %v1935_v29 = vpop.permute.xlu1 %1934  ;;  %v5920_v37 = vpop.permute.xlu0 %2044 }
 0x457   : > { %v2088_v10 = vsub.f32 %v5435_v20, %v1935_v29 }
 0x459   : > { %v2121_v59 = vmul.f32 1.442695, %v2088_v10 }
 0x45b   : > { %4259 = vpow2.f32 %v2121_v59  ;;  %v2123_v59 = vmul.f32 1.442695, %v2089_v51 }
 0x45c   : > { %1994 = vperm.xlu1 %4197, %v5751_v22   ;;  %4261 = vpow2.f32 %v1889_v32  ;;  %v1846_v22 = vsub.f32 %v1718_v30, %v1814_v28  ;;  %v1913_v28 = vmul.f32 1.442695, %v1856_v24  ;;  %v1919_v24 = vmul.f32 1.442695, %v1859_v1 }
 0x45d   : > { %4263 = vpow2.f32 %v2125_v49  ;;  %v5933_v49 = vpop.permute.xlu2 %1959 }
 0x45e   : > { %v5906_v45 = vpop.permute.xlu1 %2410  ;;  %2247 = vadd.xlane.f32.xlu0 %v4258_v52  ;;  %4265 = vpow2.f32 %v2123_v59  ;;  %v1893_v30 = vmul.f32 1.442695, %v1846_v22  ;;  %v5938_v59 = vpop.permute.xlu0 %2440 }
 0x460   : > { %4267 = vpow2.f32 %v1893_v30 }
 0x461   : > { %v5909_v20 = vpop.eup %4259  ;;  %4269 = vpow2.f32 %v1913_v28 }
 0x462   : > { %v2601_v29 = vpack.c.bf16 %v5909_v20, %v5909_v20  ;;  %v5913_v10 = vpop.eup %4261  ;;  %4271 = vpow2.f32 %v2155_v26  ;;  %v2108_v26 = vsub.f32 %v5466_v35, %v5900_v33 }
 0x463   : > { %6512 = vst [vmem:[#allocation43_spill] sm:$0xff] %v5913_v10  ;;  %v5926_v51 = vpop.eup %4263 }
 0x464   : > { %2475 = vperm.xlu1 %4197, %v5913_v10   ;;  %v2649_v54 = vunpack.c.l.b16 %v2601_v29  ;;  %v5929_v38 = vpop.eup %4265  ;;  %v2603_v7 = vpack.c.bf16 %v5926_v51, %v5926_v51  ;;  %v2161_v35 = vmul.f32 1.442695, %v2108_v26 }
 0x466   : > { %v5922_v52 = vpop.permute.xlu1 %2490  ;;  %v2664_v32 = vpack.c.b16 %v2649_v54, %v2648_v62  ;;  %v2602_v62 = vpack.c.bf16 %v5929_v38, %v5929_v38  ;;  %v5943_v54 = vpop.eup %4267  ;;  %v2651_v15 = vunpack.c.l.b16 %v2603_v7 }
 0x467   : > { %6513 = vst [vmem:[#allocation44_spill] sm:$0xff] %v5943_v54 }
 0x468   : > { %2736 = vmatmul.bf16.vlgmr.msra.gmra.mxu2 %v2664_v32  ;;  %v5946_v32 = vpop.eup %4269  ;;  %v2650_v8 = vunpack.c.l.b16 %v2602_v62  ;;  %v5960_v62 = vpop.permute.xlu0 %1969 }
 0x469   : > { %v5949_v63 = vpop.eup %4271 }
 0x46a   : > { %v2665_v28 = vpack.c.b16 %v2651_v15, %v2650_v8  ;;  %v2618_v7 = vpack.c.bf16 %v5949_v63, %v5949_v63 }
 0x46c   : > { %2084 = vperm.xlu1 %4197, %v5797_v5  }
 0x46e   : > { %v2025_v29 = vpop.permute.xlu1 %2024 }
 0x46f   : > { %v2106_v22 = vsub.f32 %v5457_v34, %v2025_v29  ;;  %v2107_v34 = vsub.f32 %v5462_v16, %v5869_v57  ;;  %v5956_v29 = vpop.permute.xlu2 %2435 }
 0x470   : > { %v5977_v26 = vpop.permute.xlu0 %2530 }
 0x471   : > { %v2157_v43 = vmul.f32 1.442695, %v2106_v22  ;;  %v2159_v22 = vmul.f32 1.442695, %v2107_v34 }
 0x472   : > { %2485 = vperm.xlu0 %4196, %v5943_v54  }
 0x473   : > { %4273 = vpow2.f32 %v2157_v43 }
 0x474   : > { %2535 = vperm.xlu1 %4197, %v5946_v32   ;;  %4275 = vpow2.f32 %v1919_v24 }
 0x475   : > { %4277 = vpow2.f32 %v2129_v42 }
 0x476   : > { %v1950_v30 = vpop.permute.xlu1 %1949 }
 0x477   : > { %v2091_v1 = vsub.f32 %v5450_v4, %v1950_v30  ;;  %v2795_v4 = vunpack.c.l.b16 %v2618_v7  ;;  %v5972_v34 = vpop.permute.xlu2 %2049 }
 0x478   : > { %2741 = vmatmul.bf16.gmra.mxu2 %v2665_v28  ;;  %v5991_v54 = vpop.permute.xlu0 %2059 }
 0x479   : > { %v4274_v27 = vpop.eup %4273  ;;  %v2127_v24 = vmul.f32 1.442695, %v2091_v1 }
 0x47a   : > { %2279 = vadd.xlane.f32.xlu2 %v5832_v61  ;;  %v2619_v16 = vpack.c.bf16 %v4274_v27, %v4274_v27  ;;  %v5963_v57 = vpop.eup %4275 }
 0x47b   : > { %4279 = vpow2.f32 %v2127_v24  ;;  %v5966_v43 = vpop.eup %4277 }
 0x47c   : > { %2550 = vperm.xlu1 %4197, %v5963_v57   ;;  %v2796_v33 = vunpack.c.l.b16 %v2619_v16  ;;  %4281 = vpow2.f32 %v2159_v22  ;;  %v2605_v61 = vpack.c.bf16 %v5966_v43, %v5966_v43 }
 0x47d   : > { %4283 = vpow2.f32 %v2161_v35 }
 0x47e   : > { %v5968_v15 = vpop.permute.xlu1 %2505  ;;  %v2810_v42 = vpack.c.b16 %v2796_v33, %v2795_v4  ;;  %v2653_v7 = vunpack.c.l.b16 %v2605_v61  ;;  %v2110_v4 = vsub.f32 %v5478_v40, %v5920_v37 }
 0x480   : > { %2886 = vmatmul.bf16.gmra.mxu3 %v2810_v42  ;;  %v2165_v42 = vmul.f32 1.442695, %v2110_v4 }
 0x481   : > { %v4280_v8 = vpop.eup %4279 }
 0x482   : > { %2249 = vadd.xlane.f32.xlu2 %v5909_v20  ;;  %v2604_v30 = vpack.c.bf16 %v4280_v8, %v4280_v8  ;;  %v5975_v28 = vpop.eup %4281  ;;  %4285 = vpow2.f32 %v2165_v42 }
 0x483   : > { %v5979_v22 = vpop.eup %4283  ;;  %v2620_v35 = vpack.c.bf16 %v5975_v28, %v5975_v28 }
 0x484   : > { %v2652_v1 = vunpack.c.l.b16 %v2604_v30  ;;  %v2621_v20 = vpack.c.bf16 %v5979_v22, %v5979_v22  ;;  %v5989_v30 = vpop.permute.xlu2 %2525 }
 0x485   : > { %v2797_v33 = vunpack.c.l.b16 %v2620_v35 }
 0x486   : > { %v5981_v24 = vpop.permute.xlu1 %2430  ;;  %v2666_v16 = vpack.c.b16 %v2653_v7, %v2652_v1  ;;  %v2798_v61 = vunpack.c.l.b16 %v2621_v20  ;;  %v2093_v7 = vsub.f32 %v5460_v14, %v5933_v49  ;;  %v5998_v20 = vpop.permute.xlu0 %2455 }
 0x488   : > { %2746 = vmatmul.bf16.gmra.mxu2 %v2666_v16  ;;  %v2811_v1 = vpack.c.b16 %v2798_v61, %v2797_v33  ;;  %v2131_v16 = vmul.f32 1.442695, %v2093_v7 }
 0x48a   : > { %2285 = vadd.xlane.f32.xlu2 %v4274_v27  ;;  %v5996_v27 = vpop.eup %4285 }
 0x48b   : > { %v2623_v14 = vpack.c.bf16 %v5996_v27, %v5996_v27 }
 0x48c   : > { %v1975_v35 = vpop.permute.xlu2 %1974 }
 0x48e   : > { %v2040_v10 = vpop.permute.xlu1 %2039 }
 0x48f   : > { %v2109_v40 = vsub.f32 %v5472_v3, %v2040_v10 }
 0x490   : > { %2891 = vmatmul.bf16.gmra.mxu3 %v2811_v1  ;;  %v2095_v1 = vsub.f32 %v5476_v18, %v5960_v62  ;;  %v2111_v62 = vsub.f32 %v5484_v12, %v5972_v34  ;;  %v2393_v34 = vld [vmem:[#allocation5 + $0xd0] sm:$0xff] }
 0x491   : > { %v2163_v37 = vmul.f32 1.442695, %v2109_v40 }
 0x492   : > { %2255 = vadd.xlane.f32.xlu2 %v4280_v8  ;;  %v2800_v8 = vunpack.c.l.b16 %v2623_v14 }
 0x493   : > { %4287 = vpow2.f32 %v2163_v37 }
 0x494   : > { %4289 = vpow2.f32 %v2131_v16  ;;  %v6009_v37 = vpop.permute.xlu2 %2450 }
 0x496   : > { %v1965_v4 = vpop.permute.xlu1 %1964 }
 0x497   : > { %v2094_v33 = vsub.f32 %v5468_v17, %v1965_v4  ;;  %v2096_v17 = vsub.f32 %v5482_v6, %v1975_v35  ;;  %v2392_v35 = vld [vmem:[#allocation5 + $0xb8] sm:$0xff] }
 0x499   : > { %v4288_v49 = vpop.eup %4287  ;;  %v2133_v42 = vmul.f32 1.442695, %v2094_v33  ;;  %v2135_v33 = vmul.f32 1.442695, %v2095_v1 }
 0x49a   : > { %2291 = vadd.xlane.f32.xlu2 %v4288_v49  ;;  %v2622_v3 = vpack.c.bf16 %v4288_v49, %v4288_v49  ;;  %v4290_v61 = vpop.eup %4289  ;;  %v1985_v49 = vpop.permute.xlu0 %1984 }
 0x49b   : > { %4291 = vpow2.f32 %v2133_v42  ;;  %v2606_v16 = vpack.c.bf16 %v4290_v61, %v4290_v61  ;;  %v2137_v42 = vmul.f32 1.442695, %v2096_v17 }
 0x49c   : > { %2283 = vadd.xlane.f32.xlu0 %v5949_v63  ;;  %v2799_v10 = vunpack.c.l.b16 %v2622_v3  ;;  %4293 = vpow2.f32 %v2135_v33 }
 0x49d   : > { %v2654_v14 = vunpack.c.l.b16 %v2606_v16  ;;  %4295 = vpow2.f32 %v2137_v42 }
 0x49e   : > { %v6006_v7 = vpop.permute.xlu1 %2520  ;;  %v2812_v40 = vpack.c.b16 %v2800_v8, %v2799_v10  ;;  %v2584_v10 = vmul.f32 %v5922_v52, %v2392_v35  ;;  %v2065_v8 = vpop.permute.xlu2 %2064  ;;  %v2098_v52 = vsub.f32 %v5501_v56, %v1985_v49 }
 0x4a0   : > { %2896 = vmatmul.bf16.gmra.mxu3 %v2812_v40 }
 0x4a1   : > { %v4292_v4 = vpop.eup %4291 }
 0x4a2   : > { %2261 = vadd.xlane.f32.xlu2 %v4292_v4  ;;  %v2607_v63 = vpack.c.bf16 %v4292_v4, %v4292_v4  ;;  %v6018_v1 = vpop.eup %4293  ;;  %v6020_v40 = vpop.permute.xlu0 %2074 }
 0x4a3   : > { %v2608_v12 = vpack.c.bf16 %v6018_v1, %v6018_v1 }
 0x4a4   : > { %2253 = vadd.xlane.f32.xlu0 %v5926_v51  ;;  %v2655_v3 = vunpack.c.l.b16 %v2607_v63  ;;  %v2167_v51 = vmul.f32 1.442695, %v2111_v62 }
 0x4a6   : > { %v6012_v18 = vpop.permute.xlu1 %2445  ;;  %2281 = vadd.xlane.f32.xlu1 %v5839_v9  ;;  %v2667_v6 = vpack.c.b16 %v2655_v3, %v2654_v14  ;;  %v4296_v9 = vpop.eup %4295  ;;  %4297 = vpow2.f32 %v2167_v51  ;;  %v2585_v14 = vmul.f32 %v5879_v48, %v2393_v34  ;;  %v2656_v3 = vunpack.c.l.b16 %v2608_v12 }
 0x4a7   : > { %v2609_v63 = vpack.c.bf16 %v4296_v9, %v4296_v9  ;;  %v2113_v51 = vsub.f32 %v5499_v23, %v5991_v54  ;;  %v2114_v48 = vsub.f32 %v5509_v44, %v2065_v8 }
 0x4a8   : > { %2751 = vmatmul.bf16.gmra.mxu2 %v2667_v6 }
 0x4a9   : > { %v2173_v23 = vmul.f32 1.442695, %v2114_v48  ;;  %v6515_v48 = vld [vmem:[#allocation15_spill] sm:$0xff] }
 0x4ab   : > { %v2882_v17 = vpop.f32.mrf.mxu3 }
 0x4ac   : > { %v2938_v16 = vadd.f32 %v2882_v17, %v2584_v10  ;;  %2289 = vadd.xlane.f32.xlu0 %v5979_v22  ;;  %v2141_v22 = vmul.f32 1.442695, %v2098_v52  ;;  %v4298_v35 = vpop.eup %4297  ;;  %v1990_v10 = vpop.permute.xlu2 %1989 }
 0x4ad   : > { %v6031_v17 = vpop.permute.xlu0 %2470 }
 0x4ae   : > { %2970 = vst [vmem:[#allocation5 + $0xb8] sm:$0xff] %v2938_v16  ;;  %v2055_v4 = vpop.permute.xlu1 %2054  ;;  %2251 = vadd.xlane.f32.xlu1 %v5929_v38  ;;  %v2657_v38 = vunpack.c.l.b16 %v2609_v63 }
 0x4af   : > { %v2112_v33 = vsub.f32 %v5490_v19, %v2055_v4  ;;  %v2171_v4 = vmul.f32 1.442695, %v2113_v51 }
 0x4b0   : > { %v2668_v56 = vpack.c.b16 %v2657_v38, %v2656_v3  ;;  %v2099_v38 = vsub.f32 %v5513_v0, %v1990_v10 }
 0x4b1   : > { %v2169_v42 = vmul.f32 1.442695, %v2112_v33 }
 0x4b3   : > { %4299 = vpow2.f32 %v2169_v42  ;;  %v2884_v6 = vpop.f32.mrf.mxu3 }
 0x4b4   : > { %v2939_v62 = vadd.f32 %v2884_v6, %v2585_v14  ;;  %2259 = vadd.xlane.f32.xlu0 %v4290_v61  ;;  %4301 = vpow2.f32 %v2141_v22  ;;  %v2624_v61 = vpack.c.bf16 %v4298_v35, %v4298_v35  ;;  %v6041_v44 = vpop.permute.xlu2 %2465 }
 0x4b5   : > { %v2000_v8 = vpop.permute.xlu0 %1999 }
 0x4b6   : > { %2971 = vst [vmem:[#allocation5 + $0xd0] sm:$0xff] %v2939_v62  ;;  %v1980_v19 = vpop.permute.xlu1 %1979  ;;  %2287 = vadd.xlane.f32.xlu1 %v5975_v28  ;;  %v2801_v54 = vunpack.c.l.b16 %v2624_v61 }
 0x4b7   : > { %v2097_v49 = vsub.f32 %v5488_v46, %v1980_v19  ;;  %v6514_v19 = vld [vmem:[#allocation17_spill] sm:$0xff] }
 0x4b8   : > { %2756 = vmatmul.bf16.gmra.mxu2 %v2668_v56  ;;  %v2116_v56 = vsub.f32 %v6514_v19, %v6020_v40 }
 0x4b9   : > { %v4300_v16 = vpop.eup %4299  ;;  %v2139_v12 = vmul.f32 1.442695, %v2097_v49 }
 0x4ba   : > { %2297 = vadd.xlane.f32.xlu2 %v4300_v16  ;;  %v2625_v34 = vpack.c.bf16 %v4300_v16, %v4300_v16  ;;  %v6036_v33 = vpop.eup %4301  ;;  %v2143_v16 = vmul.f32 1.442695, %v2099_v38 }
 0x4bb   : > { %4303 = vpow2.f32 %v2139_v12  ;;  %v2611_v63 = vpack.c.bf16 %v6036_v33, %v6036_v33 }
 0x4bc   : > { %2295 = vadd.xlane.f32.xlu0 %v4298_v35  ;;  %v2802_v52 = vunpack.c.l.b16 %v2625_v34  ;;  %4305 = vpow2.f32 %v2171_v4  ;;  %v2080_v4 = vpop.permute.xlu2 %2079 }
 0x4bd   : > { %4307 = vpow2.f32 %v2173_v23  ;;  %v2659_v6 = vunpack.c.l.b16 %v2611_v63  ;;  %v2177_v23 = vmul.f32 1.442695, %v2116_v56  ;;  %v6519_v56 = vld [vmem:[#allocation18_spill] sm:$0xff] }
 0x4be   : > { %v6038_v28 = vpop.permute.xlu1 %2460  ;;  %2257 = vadd.xlane.f32.xlu1 %v5966_v43  ;;  %v2813_v46 = vpack.c.b16 %v2802_v52, %v2801_v54  ;;  %v2183_v54 = vld [vmem:[#allocation4] sm:$0xff] }
 0x4c0   : > { %2901 = vmatmul.bf16.gmra.mxu3 %v2813_v46  ;;  %v6517_v46 = vld [vmem:[#allocation16_spill] sm:$0xff] }
 0x4c1   : > { %v4304_v42 = vpop.eup %4303 }
 0x4c2   : > { %2267 = vadd.xlane.f32.xlu2 %v4304_v42  ;;  %v2610_v14 = vpack.c.bf16 %v4304_v42, %v4304_v42  ;;  %v4306_v3 = vpop.eup %4305  ;;  %v2215_v42 = vmul.f32 %v5721_v39, %v2183_v54 }
 0x4c3   : > { %v4308_v62 = vpop.eup %4307  ;;  %v2626_v51 = vpack.c.bf16 %v4306_v3, %v4306_v3 }
 0x4c4   : > { %2265 = vadd.xlane.f32.xlu0 %v4296_v9  ;;  %v2658_v22 = vunpack.c.l.b16 %v2610_v14  ;;  %v2627_v61 = vpack.c.bf16 %v4308_v62, %v4308_v62  ;;  %v6050_v9 = vpop.permute.xlu0 %2545 }
 0x4c5   : > { %v2803_v34 = vunpack.c.l.b16 %v2626_v51  ;;  %v6518_v51 = vld [vmem:[#allocation25_spill] sm:$0xff] }
 0x4c6   : > { %v2070_v43 = vpop.permute.xlu1 %2069  ;;  %2293 = vadd.xlane.f32.xlu1 %v5996_v27  ;;  %v2669_v35 = vpack.c.b16 %v2659_v6, %v2658_v22  ;;  %v2804_v0 = vunpack.c.l.b16 %v2627_v61  ;;  %v6516_v27 = vld [vmem:[#allocation19_spill] sm:$0xff]  ;;  %v2005_v6 = vpop.permute.xlu2 %2004 }
 0x4c7   : > { %v2115_v49 = vsub.f32 %v6515_v48, %v2070_v43  ;;  %v2117_v10 = vsub.f32 %v6516_v27, %v2080_v4  ;;  %v2102_v19 = vsub.f32 %v6518_v51, %v2005_v6  ;;  %v2101_v48 = vsub.f32 %v6519_v56, %v2000_v8 }
 0x4c8   : > { %2761 = vmatmul.bf16.gmra.mxu2 %v2669_v35  ;;  %v2814_v40 = vpack.c.b16 %v2804_v0, %v2803_v34 }
 0x4c9   : > { %v2175_v12 = vmul.f32 1.442695, %v2115_v49  ;;  %v2179_v22 = vmul.f32 1.442695, %v2117_v10  ;;  %v2149_v61 = vmul.f32 1.442695, %v2102_v19 }
 0x4ca   : > { %v2147_v34 = vmul.f32 1.442695, %v2101_v48 }
 0x4cb   : > { %4309 = vpow2.f32 %v2175_v12 }
 0x4cc   : > { %2301 = vadd.xlane.f32.xlu0 %v4308_v62  ;;  %4311 = vpow2.f32 %v2143_v16 }
 0x4cd   : > { %4313 = vpow2.f32 %v2177_v23 }
 0x4ce   : > { %v1995_v52 = vpop.permute.xlu1 %1994  ;;  %2263 = vadd.xlane.f32.xlu1 %v6018_v1  ;;  %v6061_v10 = vpop.permute.xlu2 %2540 }
 0x4cf   : > { %v2100_v63 = vsub.f32 %v6517_v46, %v1995_v52 }
 0x4d0   : > { %2906 = vmatmul.bf16.gmra.mxu3 %v2814_v40 }
 0x4d1   : > { %v4310_v14 = vpop.eup %4309  ;;  %v2145_v38 = vmul.f32 1.442695, %v2100_v63  ;;  %v2248_v62 = vpop.xlane.xlu0 %2247  ;;  %v6520_v63 = vld [vmem:[#allocation20_spill] sm:$0xff] }
 0x4d2   : > { %v2311_v43 = vadd.f32 %v2248_v62, %v2215_v42  ;;  %2303 = vadd.xlane.f32.xlu2 %v4310_v14  ;;  %v4312_v35 = vpop.eup %4311  ;;  %v2628_v39 = vpack.c.bf16 %v4310_v14, %v4310_v14 }
 0x4d3   : > { %4315 = vpow2.f32 %v2145_v38  ;;  %v4314_v1 = vpop.eup %4313  ;;  %v2612_v16 = vpack.c.bf16 %v4312_v35, %v4312_v35 }
 0x4d4   : > { %2344 = vst.msk [vmem:[#allocation4] sm:$0xff] %vm2343_vm1, %v2311_v43  ;;  %2271 = vadd.xlane.f32.xlu0 %v4312_v35  ;;  %4317 = vpow2.f32 %v2179_v22  ;;  %v2629_v4 = vpack.c.bf16 %v4314_v1, %v4314_v1  ;;  %v2805_v0 = vunpack.c.l.b16 %v2628_v39  ;;  %v2376_v43 = vld [vmem:[#allocation5 + $0xa8] sm:$0xff]  ;;  %v2199_v35 = vld [vmem:[#allocation4 + $0x80] sm:$0xff] }
 0x4d5   : > { %4319 = vpow2.f32 %v2149_v61  ;;  %v2660_v54 = vunpack.c.l.b16 %v2612_v16  ;;  %v2568_v56 = vmul.f32 %v5906_v45, %v2376_v43  ;;  %v2231_v16 = vmul.f32 %v5748_v31, %v2199_v35  ;;  %v2184_v31 = vld [vmem:[#allocation4 + $0x8] sm:$0xff]  ;;  %v2378_v43 = vld [vmem:[#allocation5 + $0x10] sm:$0xff] }
 0x4d6   : > { %v6059_v49 = vpop.permute.xlu1 %2475  ;;  %2299 = vadd.xlane.f32.xlu1 %v4306_v3  ;;  %v2806_v8 = vunpack.c.l.b16 %v2629_v4  ;;  %4321 = vpow2.f32 %v2147_v34  ;;  %v6065_v38 = vpop.permute.xlu2 %2480  ;;  %v1862_v35 = vsub.f32 %v5794_v60, %v5797_v5  ;;  %v2187_v5 = vld [vmem:[#allocation4 + $0x20] sm:$0xff] }
 0x4d8   : > { %v2815_v46 = vpack.c.b16 %v2806_v8, %v2805_v0  ;;  %v2377_v8 = vld [vmem:[#allocation5 + $0x68] sm:$0xff] }
 0x4d9   : > { %v4316_v12 = vpop.eup %4315 }
 0x4da   : > { %2273 = vadd.xlane.f32.xlu2 %v4316_v12  ;;  %v2613_v23 = vpack.c.bf16 %v4316_v12, %v4316_v12  ;;  %v4318_v27 = vpop.eup %4317 }
 0x4db   : > { %v4320_v22 = vpop.eup %4319  ;;  %v2630_v19 = vpack.c.bf16 %v4318_v27, %v4318_v27 }
 0x4dc   : > { %2307 = vadd.xlane.f32.xlu0 %v4318_v27  ;;  %v2661_v52 = vunpack.c.l.b16 %v2613_v23  ;;  %v4322_v6 = vpop.eup %4321  ;;  %v2615_v51 = vpack.c.bf16 %v4320_v22, %v4320_v22 }
 0x4dd   : > { %v2614_v62 = vpack.c.bf16 %v4322_v6, %v4322_v6  ;;  %v2807_v34 = vunpack.c.l.b16 %v2630_v19 }
 0x4de   : > { %v2085_v40 = vpop.permute.xlu1 %2084  ;;  %2269 = vadd.xlane.f32.xlu1 %v6036_v33  ;;  %v2670_v3 = vpack.c.b16 %v2661_v52, %v2660_v54  ;;  %v2663_v12 = vunpack.c.l.b16 %v2615_v51  ;;  %v2570_v51 = vmul.f32 %v5893_v41, %v2378_v43  ;;  %v6526_v43 = vld [vmem:[#allocation23_spill] sm:$0xff] }
 0x4df   : > { %v2118_v42 = vsub.f32 %v6520_v63, %v2085_v40  ;;  %v2662_v48 = vunpack.c.l.b16 %v2614_v62  ;;  %v2569_v40 = vmul.f32 %v5834_v21, %v2377_v8  ;;  %v6522_v63 = vld [vmem:[#allocation21_spill] sm:$0xff] }
 0x4e0   : > { %2766 = vmatmul.bf16.gmra.mxu2 %v2670_v3  ;;  %2911 = vmatmul.bf16.gmra.mxu3 %v2815_v46  ;;  %v2202_v21 = vld [vmem:[#allocation4 + $0x98] sm:$0xff] }
 0x4e1   : > { %v2181_v14 = vmul.f32 1.442695, %v2118_v42  ;;  %v2671_v52 = vpack.c.b16 %v2663_v12, %v2662_v48  ;;  %v6525_v48 = vld [vmem:[#allocation35_spill] sm:$0xff]  ;;  %v2395_v8 = vld [vmem:[#allocation5 + $0x58] sm:$0xff] }
 0x4e3   : > { %4323 = vpow2.f32 %v2181_v14 }
 0x4e4   : > { %2277 = vadd.xlane.f32.xlu0 %v4320_v22  ;;  %v6523_v22 = vld [vmem:[#allocation32_spill] sm:$0xff] }
 0x4e6   : > { %2305 = vadd.xlane.f32.xlu1 %v4314_v1  ;;  %v6521_v1 = vsub.f32 %v5765_v2, %v5774_v13  ;;  %v2216_v13 = vmul.f32 %v6522_v63, %v2184_v31  ;;  %v2380_v31 = vld [vmem:[#allocation5 + $0xc8] sm:$0xff] }
 0x4e8   : > { %v1923_v0 = vmul.f32 1.442695, %v6521_v1 }
 0x4e9   : > { %v4324_v33 = vpop.eup %4323 }
 0x4ea   : > { %2309 = vadd.xlane.f32.xlu2 %v4324_v33  ;;  %v2631_v39 = vpack.c.bf16 %v4324_v33, %v4324_v33  ;;  %4325 = vpow2.f32 %v1923_v0  ;;  %v1925_v33 = vmul.f32 1.442695, %v1862_v35 }
 0x4eb   : > { %v2737_v61 = vpop.f32.mrf.mxu2 }
 0x4ec   : > { %v2922_v4 = vadd.f32 %v2737_v61, %v2568_v56  ;;  %v2808_v23 = vunpack.c.l.b16 %v2631_v39  ;;  %v2234_v39 = vmul.f32 %v6525_v48, %v2202_v21  ;;  %v2396_v21 = vld [vmem:[#allocation5 + $0x80] sm:$0xff] }
 0x4ed   : > { %v2280_v54 = vpop.xlane.xlu2 %2279 }
 0x4ee   : > { %2954 = vst [vmem:[#allocation5 + $0xa8] sm:$0xff] %v2922_v4  ;;  %v2327_v27 = vadd.f32 %v2280_v54, %v2231_v16  ;;  %2275 = vadd.xlane.f32.xlu1 %v4322_v6  ;;  %v2816_v45 = vpack.c.b16 %v2808_v23, %v2807_v34  ;;  %v6524_v6 = vsub.f32 %v6523_v22, %v5754_v50  ;;  %v2394_v16 = vld [vmem:[#allocation5 + $0xd8] sm:$0xff]  ;;  %v2379_v4 = vld [vmem:[#allocation5 + $0xc0] sm:$0xff] }
 0x4ef   : > { %v2586_v12 = vmul.f32 %v5860_v53, %v2394_v16  ;;  %v2571_v41 = vmul.f32 %v5881_v55, %v2379_v4  ;;  %v2219_v54 = vmul.f32 %v5817_v36, %v2187_v5  ;;  %v6097_v53 = vpop.permute.xlu1 %2535  ;;  %v2205_v55 = vld [vmem:[#allocation4 + $0xb0] sm:$0xff]  ;;  %v2572_v36 = vmul.f32 %v5981_v24, %v2380_v31  ;;  %v2204_v31 = vld [vmem:[#allocation4 + $0xa8] sm:$0xff] }
 0x4f0   : > { %2360 = vst.msk [vmem:[#allocation4 + $0x80] sm:$0xff] %vm2343_vm1, %v2327_v27  ;;  %2771 = vmatmul.bf16.gmra.mxu2 %v2671_v52  ;;  %2916 = vmatmul.bf16.gmra.mxu3 %v2816_v45  ;;  %v6075_v14 = vpop.eup %4325  ;;  %v1921_v62 = vmul.f32 1.442695, %v6524_v6  ;;  %v2237_v22 = vmul.f32 %v5852_v58, %v2205_v55 }
 0x4f2   : > { %4327 = vpow2.f32 %v1921_v62 }
 0x4f3   : > { %v2739_v3 = vpop.f32.mrf.mxu2  ;;  %4329 = vpow2.f32 %v1925_v33  ;;  %v2190_v33 = vld [vmem:[#allocation4 + $0x38] sm:$0xff] }
 0x4f4   : > { %v2923_v46 = vadd.f32 %v2739_v3, %v2569_v40  ;;  %v6095_v40 = vpop.permute.xlu0 %2485  ;;  %v2587_v3 = vmul.f32 %v5968_v15, %v2395_v8  ;;  %v2222_v4 = vmul.f32 %v5856_v11, %v2190_v33  ;;  %v2399_v33 = vld [vmem:[#allocation5] sm:$0xff] }
 0x4f5   : > { %v2250_v2 = vpop.xlane.xlu2 %2249 }
 0x4f6   : > { %2955 = vst [vmem:[#allocation5 + $0x68] sm:$0xff] %v2923_v46  ;;  %v2312_v42 = vadd.f32 %v2250_v2, %v2216_v13  ;;  %v2201_v13 = vld [vmem:[#allocation4 + $0x90] sm:$0xff] }
 0x4f7   : > { %v2233_v35 = vmul.f32 %v6526_v43, %v2201_v13  ;;  %v6106_v24 = vpop.permute.xlu1 %2550 }
 0x4f8   : > { %2345 = vst.msk [vmem:[#allocation4 + $0x8] sm:$0xff] %vm2343_vm1, %v2312_v42  ;;  %2560 = vperm.xlu0 %4196, %v6075_v14   ;;  %v6087_v60 = vpop.eup %4327 }
 0x4f9   : > { %v6093_v52 = vpop.eup %4329 }
 0x4fb   : > { %v2742_v19 = vpop.f32.mrf.mxu2 }
 0x4fc   : > { %v2924_v56 = vadd.f32 %v2742_v19, %v2570_v51  ;;  %v2381_v51 = vld [vmem:[#allocation5 + $0xb0] sm:$0xff] }
 0x4fd   : > { %v2286_v61 = vpop.xlane.xlu2 %2285  ;;  %v2573_v48 = vmul.f32 %v5956_v29, %v2381_v51  ;;  %v2203_v51 = vld [vmem:[#allocation4 + $0xa0] sm:$0xff] }
 0x4fe   : > { %2956 = vst [vmem:[#allocation5 + $0x10] sm:$0xff] %v2924_v56  ;;  %v2330_v50 = vadd.f32 %v2286_v61, %v2234_v39  ;;  %v2588_v56 = vmul.f32 %v5915_v47, %v2396_v21  ;;  %v2186_v61 = vld [vmem:[#allocation4 + $0x18] sm:$0xff] }
 0x500   : > { %2363 = vst.msk [vmem:[#allocation4 + $0x98] sm:$0xff] %vm2343_vm1, %v2330_v50 }
 0x502   : > { %2555 = vperm.xlu2 %4198, %v6087_v60  }
 0x503   : > { %v2744_v34 = vpop.f32.mrf.mxu2  ;;  %v2887_v23 = vpop.f32.mrf.mxu3 }
 0x504   : > { %v2925_v1 = vadd.f32 %v2744_v34, %v2571_v41  ;;  %v2940_v0 = vadd.f32 %v2887_v23, %v2586_v12  ;;  %v2200_v12 = vld [vmem:[#allocation4 + $0x88] sm:$0xff]  ;;  %v6527_v34 = vld [vmem:[#allocation26_spill] sm:$0xff] }
 0x505   : > { %v2256_v27 = vpop.xlane.xlu2 %2255  ;;  %v2218_v23 = vmul.f32 %v6527_v34, %v2186_v61  ;;  %v2207_v34 = vld [vmem:[#allocation4 + $0xc0] sm:$0xff] }
 0x506   : > { %2957 = vst [vmem:[#allocation5 + $0xc0] sm:$0xff] %v2925_v1  ;;  %v2315_v45 = vadd.f32 %v2256_v27, %v2219_v54  ;;  %v2397_v1 = vld [vmem:[#allocation5 + $0x40] sm:$0xff] }
 0x507   : > { %2972 = vst [vmem:[#allocation5 + $0xd8] sm:$0xff] %v2940_v0  ;;  %2565 = vperm.xlu1 %4197, %v6093_v52   ;;  %v6528_v0 = vld [vmem:[#allocation22_spill] sm:$0xff] }
 0x508   : > { %2348 = vst.msk [vmem:[#allocation4 + $0x20] sm:$0xff] %vm2343_vm1, %v2315_v45  ;;  %v2232_v54 = vmul.f32 %v6528_v0, %v2200_v12  ;;  %v2589_v45 = vmul.f32 %v5902_v25, %v2397_v1  ;;  %v2188_v0 = vld [vmem:[#allocation4 + $0x28] sm:$0xff] }
 0x50b   : > { %v2747_v46 = vpop.f32.mrf.mxu2  ;;  %v2889_v63 = vpop.f32.mrf.mxu3 }
 0x50c   : > { %v2926_v2 = vadd.f32 %v2747_v46, %v2572_v36  ;;  %v2941_v42 = vadd.f32 %v2889_v63, %v2587_v3  ;;  %v2185_v3 = vld [vmem:[#allocation4 + $0x10] sm:$0xff]  ;;  %v2398_v63 = vld [vmem:[#allocation5 + $0x28] sm:$0xff] }
 0x50d   : > { %v2292_v6 = vpop.xlane.xlu2 %2291  ;;  %v6529_v36 = vld [vmem:[#allocation28_spill] sm:$0xff]  ;;  %v2590_v25 = vmul.f32 %v6006_v7, %v2398_v63 }
 0x50e   : > { %2958 = vst [vmem:[#allocation5 + $0xc8] sm:$0xff] %v2926_v2  ;;  %v2333_v62 = vadd.f32 %v2292_v6, %v2237_v22  ;;  %v2236_v46 = vmul.f32 %v6529_v36, %v2204_v31  ;;  %v2208_v7 = vld [vmem:[#allocation4 + $0xc8] sm:$0xff] }
 0x50f   : > { %2973 = vst [vmem:[#allocation5 + $0x58] sm:$0xff] %v2941_v42  ;;  %v2284_v19 = vpop.xlane.xlu0 %2283  ;;  %v6530_v42 = vld [vmem:[#allocation24_spill] sm:$0xff] }
 0x510   : > { %2366 = vst.msk [vmem:[#allocation4 + $0xb0] sm:$0xff] %vm2343_vm1, %v2333_v62  ;;  %v2329_v15 = vadd.f32 %v2284_v19, %v2233_v35  ;;  %v2217_v22 = vmul.f32 %v6530_v42, %v2185_v3  ;;  %v2189_v35 = vld [vmem:[#allocation4 + $0x30] sm:$0xff]  ;;  %v6531_v19 = vld [vmem:[#allocation30_spill] sm:$0xff]  ;;  %v2192_v63 = vld [vmem:[#allocation4 + $0x48] sm:$0xff] }
 0x511   : > { %v2193_v3 = vld [vmem:[#allocation4 + $0x50] sm:$0xff] }
 0x512   : > { %2362 = vst.msk [vmem:[#allocation4 + $0x90] sm:$0xff] %vm2343_vm1, %v2329_v15  ;;  %v2221_v15 = vmul.f32 %v6531_v19, %v2189_v35  ;;  %v2384_v35 = vld [vmem:[#allocation5 + $0x48] sm:$0xff] }
 0x513   : > { %v2749_v58 = vpop.f32.mrf.mxu2  ;;  %v2892_v39 = vpop.f32.mrf.mxu3 }
 0x514   : > { %v2927_v50 = vadd.f32 %v2749_v58, %v2573_v48  ;;  %v2942_v16 = vadd.f32 %v2892_v39, %v2588_v56  ;;  %v2382_v56 = vld [vmem:[#allocation5 + $0x70] sm:$0xff]  ;;  %v6532_v39 = vld [vmem:[#allocation27_spill] sm:$0xff] }
 0x515   : > { %v2262_v5 = vpop.xlane.xlu2 %2261  ;;  %v2235_v61 = vmul.f32 %v6532_v39, %v2203_v51  ;;  %v6537_v51 = vld [vmem:[#allocation31_spill] sm:$0xff] }
 0x516   : > { %2959 = vst [vmem:[#allocation5 + $0xb0] sm:$0xff] %v2927_v50  ;;  %v2318_v41 = vadd.f32 %v2262_v5, %v2222_v4  ;;  %v2574_v4 = vmul.f32 %v5938_v59, %v2382_v56 }
 0x517   : > { %2974 = vst [vmem:[#allocation5 + $0x80] sm:$0xff] %v2942_v16  ;;  %v2254_v47 = vpop.xlane.xlu0 %2253  ;;  %v2591_v16 = vmul.f32 %v5989_v30, %v2399_v33  ;;  %v2576_v33 = vmul.f32 %v6009_v37, %v2384_v35  ;;  %v2211_v37 = vld [vmem:[#allocation4 + $0xe0] sm:$0xff] }
 0x518   : > { %2351 = vst.msk [vmem:[#allocation4 + $0x38] sm:$0xff] %vm2343_vm1, %v2318_v41  ;;  %v2314_v29 = vadd.f32 %v2254_v47, %v2218_v23  ;;  %v2240_v47 = vmul.f32 %v5946_v32, %v2208_v7 }
 0x519   : > { %v2282_v27 = vpop.xlane.xlu1 %2281 }
 0x51a   : > { %2347 = vst.msk [vmem:[#allocation4 + $0x18] sm:$0xff] %vm2343_vm1, %v2314_v29  ;;  %v2328_v11 = vadd.f32 %v2282_v27, %v2232_v54  ;;  %v6533_v27 = vld [vmem:[#allocation33_spill] sm:$0xff] }
 0x51b   : > { %v2894_v8 = vpop.f32.mrf.mxu3  ;;  %v2239_v30 = vmul.f32 %v6533_v27, %v2207_v34  ;;  %v2195_v27 = vld [vmem:[#allocation4 + $0x60] sm:$0xff] }
 0x51c   : > { %2361 = vst.msk [vmem:[#allocation4 + $0x88] sm:$0xff] %vm2343_vm1, %v2328_v11  ;;  %v2943_v55 = vadd.f32 %v2894_v8, %v2589_v45  ;;  %v2383_v45 = vld [vmem:[#allocation5 + $0x38] sm:$0xff] }
 0x51d   : > { %v6534_v8 = vld [vmem:[#allocation29_spill] sm:$0xff]  ;;  %v2575_v36 = vmul.f32 %v6012_v18, %v2383_v45 }
 0x51e   : > { %2975 = vst [vmem:[#allocation5 + $0x40] sm:$0xff] %v2943_v55  ;;  %v2220_v31 = vmul.f32 %v6534_v8, %v2188_v0  ;;  %v2209_v8 = vld [vmem:[#allocation4 + $0xd0] sm:$0xff] }
 0x51f   : > { %v2290_v13 = vpop.xlane.xlu0 %2289 }
 0x520   : > { %v2332_v2 = vadd.f32 %v2290_v13, %v2236_v46 }
 0x521   : > { %v2252_v6 = vpop.xlane.xlu1 %2251 }
 0x522   : > { %2365 = vst.msk [vmem:[#allocation4 + $0xa8] sm:$0xff] %vm2343_vm1, %v2332_v2  ;;  %v2313_v62 = vadd.f32 %v2252_v6, %v2217_v22  ;;  %v6535_v2 = vld [vmem:[#allocation41_spill] sm:$0xff] }
 0x523   : > { %v2897_v43 = vpop.f32.mrf.mxu3  ;;  %v2225_v42 = vmul.f32 %v6535_v2, %v2193_v3  ;;  %v2206_v6 = vld [vmem:[#allocation4 + $0xb8] sm:$0xff]  ;;  %v2196_v2 = vld [vmem:[#allocation4 + $0x68] sm:$0xff] }
 0x524   : > { %2346 = vst.msk [vmem:[#allocation4 + $0x10] sm:$0xff] %vm2343_vm1, %v2313_v62  ;;  %v2944_v21 = vadd.f32 %v2897_v43, %v2590_v25  ;;  %v6536_v62 = vld [vmem:[#allocation36_spill] sm:$0xff]  ;;  %v2238_v19 = vmul.f32 %v6537_v51, %v2206_v6  ;;  %v2386_v3 = vld [vmem:[#allocation5 + $0x78] sm:$0xff] }
 0x525   : > { %v2224_v43 = vmul.f32 %v6536_v62, %v2192_v63  ;;  %v2213_v62 = vld [vmem:[#allocation4 + $0xf0] sm:$0xff] }
 0x526   : > { %2976 = vst [vmem:[#allocation5 + $0x28] sm:$0xff] %v2944_v21 }
 0x527   : > { %v2260_v48 = vpop.xlane.xlu0 %2259 }
 0x528   : > { %v2317_v58 = vadd.f32 %v2260_v48, %v2221_v15 }
 0x529   : > { %v2288_v50 = vpop.xlane.xlu1 %2287 }
 0x52a   : > { %2350 = vst.msk [vmem:[#allocation4 + $0x30] sm:$0xff] %vm2343_vm1, %v2317_v58  ;;  %v2331_v5 = vadd.f32 %v2288_v50, %v2235_v61  ;;  %v2210_v58 = vld [vmem:[#allocation4 + $0xd8] sm:$0xff]  ;;  %v2191_v61 = vld [vmem:[#allocation4 + $0x40] sm:$0xff] }
 0x52b   : > { %v2752_v12 = vpop.f32.mrf.mxu2  ;;  %v2899_v41 = vpop.f32.mrf.mxu3  ;;  %v6538_v50 = vld [vmem:[#allocation39_spill] sm:$0xff] }
 0x52c   : > { %2364 = vst.msk [vmem:[#allocation4 + $0xa0] sm:$0xff] %vm2343_vm1, %v2331_v5  ;;  %v2928_v23 = vadd.f32 %v2752_v12, %v2574_v4  ;;  %v2945_v1 = vadd.f32 %v2899_v41, %v2591_v16  ;;  %v2242_v7 = vmul.f32 %v6538_v50, %v2210_v58  ;;  %v2400_v16 = vld [vmem:[#allocation5 + $0x90] sm:$0xff]  ;;  %v2385_v4 = vld [vmem:[#allocation5 + $0xf8] sm:$0xff] }
 0x52d   : > { %v2298_v29 = vpop.xlane.xlu2 %2297  ;;  %v6539_v41 = vld [vmem:[#allocation34_spill] sm:$0xff]  ;;  %v6543_v58 = vld [vmem:[#allocation37_spill] sm:$0xff] }
 0x52e   : > { %2960 = vst [vmem:[#allocation5 + $0x70] sm:$0xff] %v2928_v23  ;;  %v2336_v54 = vadd.f32 %v2298_v29, %v2240_v47  ;;  %v2223_v34 = vmul.f32 %v6539_v41, %v2191_v61  ;;  %v2577_v47 = vmul.f32 %v5998_v20, %v2385_v4  ;;  %v2401_v20 = vld [vmem:[#allocation5 + $0xe8] sm:$0xff] }
 0x52f   : > { %2977 = vst [vmem:[#allocation5] sm:$0xff] %v2945_v1  ;;  %v2296_v59 = vpop.xlane.xlu0 %2295  ;;  %v2592_v1 = vmul.f32 %v5977_v26, %v2400_v16 }
 0x530   : > { %2369 = vst.msk [vmem:[#allocation4 + $0xc8] sm:$0xff] %vm2343_vm1, %v2336_v54  ;;  %v2335_v11 = vadd.f32 %v2296_v59, %v2239_v30  ;;  %v2243_v59 = vmul.f32 %v5963_v57, %v2211_v37  ;;  %v2593_v57 = vmul.f32 %v6097_v53, %v2401_v20  ;;  %v2402_v53 = vld [vmem:[#allocation5 + $0xa0] sm:$0xff] }
 0x531   : > { %v2258_v55 = vpop.xlane.xlu1 %2257 }
 0x532   : > { %2368 = vst.msk [vmem:[#allocation4 + $0xc0] sm:$0xff] %vm2343_vm1, %v2335_v11  ;;  %v2316_v32 = vadd.f32 %v2258_v55, %v2220_v31  ;;  %v6540_v55 = vld [vmem:[#allocation38_spill] sm:$0xff] }
 0x533   : > { %v2754_v46 = vpop.f32.mrf.mxu2  ;;  %v2227_v26 = vmul.f32 %v6540_v55, %v2195_v27  ;;  %v2388_v55 = vld [vmem:[#allocation5 + $0xf0] sm:$0xff] }
 0x534   : > { %2349 = vst.msk [vmem:[#allocation4 + $0x28] sm:$0xff] %vm2343_vm1, %v2316_v32  ;;  %v2929_v13 = vadd.f32 %v2754_v46, %v2575_v36  ;;  %v6541_v46 = vld [vmem:[#allocation40_spill] sm:$0xff]  ;;  %v2580_v20 = vmul.f32 %v6031_v17, %v2388_v55 }
 0x535   : > { %v2268_v22 = vpop.xlane.xlu2 %2267  ;;  %v2241_v63 = vmul.f32 %v6541_v46, %v2209_v8  ;;  %v2197_v8 = vld [vmem:[#allocation4 + $0x70] sm:$0xff] }
 0x536   : > { %2961 = vst [vmem:[#allocation5 + $0x38] sm:$0xff] %v2929_v13  ;;  %v2321_v25 = vadd.f32 %v2268_v22, %v2225_v42  ;;  %v2578_v42 = vmul.f32 %v6038_v28, %v2386_v3  ;;  %v2245_v28 = vmul.f32 %v6075_v14, %v2213_v62  ;;  %v2198_v14 = vld [vmem:[#allocation4 + $0x78] sm:$0xff] }
 0x537   : > { %v2266_v21 = vpop.xlane.xlu0 %2265 }
 0x538   : > { %2354 = vst.msk [vmem:[#allocation4 + $0x50] sm:$0xff] %vm2343_vm1, %v2321_v25  ;;  %v2320_v18 = vadd.f32 %v2266_v21, %v2224_v43  ;;  %v6542_v21 = vld [vmem:[#allocation43_spill] sm:$0xff] }
 0x539   : > { %v2294_v15 = vpop.xlane.xlu1 %2293 }
 0x53a   : > { %2353 = vst.msk [vmem:[#allocation4 + $0x48] sm:$0xff] %vm2343_vm1, %v2320_v18  ;;  %v2334_v56 = vadd.f32 %v2294_v15, %v2238_v19  ;;  %v2228_v18 = vmul.f32 %v6542_v21, %v2196_v2  ;;  %v2194_v19 = vld [vmem:[#allocation4 + $0x58] sm:$0xff] }
 0x53b   : > { %v2757_v48 = vpop.f32.mrf.mxu2  ;;  %v2389_v2 = vld [vmem:[#allocation5 + $0x18] sm:$0xff] }
 0x53c   : > { %2367 = vst.msk [vmem:[#allocation4 + $0xb8] sm:$0xff] %vm2343_vm1, %v2334_v56  ;;  %v2930_v39 = vadd.f32 %v2757_v48, %v2576_v33  ;;  %v2387_v33 = vld [vmem:[#allocation5 + $0x88] sm:$0xff] }
 0x53d   : > { %v2579_v50 = vmul.f32 %v6041_v44, %v2387_v33 }
 0x53e   : > { %2962 = vst [vmem:[#allocation5 + $0x48] sm:$0xff] %v2930_v39  ;;  %v2226_v39 = vmul.f32 %v6543_v58, %v2194_v19 }
 0x53f   : > { %v2302_v5 = vpop.xlane.xlu0 %2301 }
 0x540   : > { %v2338_v12 = vadd.f32 %v2302_v5, %v2242_v7  ;;  %v2594_v7 = vmul.f32 %v6061_v10, %v2402_v53  ;;  %v2391_v53 = vld [vmem:[#allocation5 + $0x50] sm:$0xff] }
 0x541   : > { %v2264_v23 = vpop.xlane.xlu1 %2263 }
 0x542   : > { %2371 = vst.msk [vmem:[#allocation4 + $0xd8] sm:$0xff] %vm2343_vm1, %v2338_v12  ;;  %v2319_v29 = vadd.f32 %v2264_v23, %v2223_v34  ;;  %v2212_v34 = vld [vmem:[#allocation4 + $0xe8] sm:$0xff] }
 0x543   : > { %v2759_v0 = vpop.f32.mrf.mxu2  ;;  %v2902_v54 = vpop.f32.mrf.mxu3  ;;  %v6544_v23 = vld [vmem:[#allocation44_spill] sm:$0xff]  ;;  %v2244_v10 = vmul.f32 %v6087_v60, %v2212_v34  ;;  %v6545_v60 = vld [vmem:[#allocation42_spill] sm:$0xff] }
 0x544   : > { %2352 = vst.msk [vmem:[#allocation4 + $0x40] sm:$0xff] %vm2343_vm1, %v2319_v29  ;;  %v2931_v30 = vadd.f32 %v2759_v0, %v2577_v47  ;;  %v2946_v45 = vadd.f32 %v2902_v54, %v2592_v1  ;;  %v2230_v37 = vmul.f32 %v6544_v23, %v2198_v14  ;;  %v2403_v1 = vld [vmem:[#allocation5 + $0x20] sm:$0xff]  ;;  %v2214_v0 = vld [vmem:[#allocation4 + $0xf8] sm:$0xff]  ;;  %v2229_v3 = vmul.f32 %v6545_v60, %v2197_v8 }
 0x545   : > { %v2304_v11 = vpop.xlane.xlu2 %2303  ;;  %v2595_v54 = vmul.f32 %v6050_v9, %v2403_v1 }
 0x546   : > { %2963 = vst [vmem:[#allocation5 + $0xf8] sm:$0xff] %v2931_v30  ;;  %v2339_v31 = vadd.f32 %v2304_v11, %v2243_v59  ;;  %v2246_v59 = vmul.f32 %v6093_v52, %v2214_v0 }
 0x547   : > { %2978 = vst [vmem:[#allocation5 + $0x90] sm:$0xff] %v2946_v45  ;;  %v2272_v36 = vpop.xlane.xlu0 %2271 }
 0x548   : > { %2372 = vst.msk [vmem:[#allocation4 + $0xe0] sm:$0xff] %vm2343_vm1, %v2339_v31  ;;  %v2323_v32 = vadd.f32 %v2272_v36, %v2227_v26  ;;  %v2404_v26 = vld [vmem:[#allocation5 + $0x8] sm:$0xff] }
 0x549   : > { %v2300_v13 = vpop.xlane.xlu1 %2299  ;;  %v2596_v36 = vmul.f32 %v6106_v24, %v2404_v26  ;;  %v2390_v24 = vld [vmem:[#allocation5 + $0x30] sm:$0xff] }
 0x54a   : > { %2356 = vst.msk [vmem:[#allocation4 + $0x60] sm:$0xff] %vm2343_vm1, %v2323_v32  ;;  %v2337_v22 = vadd.f32 %v2300_v13, %v2241_v63 }
 0x54b   : > { %v2762_v6 = vpop.f32.mrf.mxu2  ;;  %v2904_v25 = vpop.f32.mrf.mxu3 }
 0x54c   : > { %2370 = vst.msk [vmem:[#allocation4 + $0xd0] sm:$0xff] %vm2343_vm1, %v2337_v22  ;;  %v2932_v43 = vadd.f32 %v2762_v6, %v2578_v42  ;;  %v2947_v35 = vadd.f32 %v2904_v25, %v2593_v57  ;;  %v2405_v42 = vld [vmem:[#allocation5 + $0xe0] sm:$0xff]  ;;  %v2581_v22 = vmul.f32 %v6059_v49, %v2389_v2  ;;  %v2407_v49 = vld [vmem:[#allocation5 + $0x98] sm:$0xff] }
 0x54d   : > { %v2274_v51 = vpop.xlane.xlu2 %2273 }
 0x54e   : > { %2964 = vst [vmem:[#allocation5 + $0x78] sm:$0xff] %v2932_v43  ;;  %v2324_v15 = vadd.f32 %v2274_v51, %v2228_v18  ;;  %v2582_v18 = vmul.f32 %v6065_v38, %v2390_v24 }
 0x54f   : > { %2979 = vst [vmem:[#allocation5 + $0xe8] sm:$0xff] %v2947_v35  ;;  %v2308_v56 = vpop.xlane.xlu0 %2307  ;;  %v2406_v35 = vld [vmem:[#allocation5 + $0x60] sm:$0xff] }
 0x550   : > { %2357 = vst.msk [vmem:[#allocation4 + $0x68] sm:$0xff] %vm2343_vm1, %v2324_v15  ;;  %v2341_v48 = vadd.f32 %v2308_v56, %v2245_v28 }
 0x551   : > { %v2270_v61 = vpop.xlane.xlu1 %2269 }
 0x552   : > { %2374 = vst.msk [vmem:[#allocation4 + $0xf0] sm:$0xff] %vm2343_vm1, %v2341_v48  ;;  %v2322_v16 = vadd.f32 %v2270_v61, %v2226_v39  ;;  %v2583_v48 = vmul.f32 %v6095_v40, %v2391_v53 }
 0x553   : > { %v2764_v4 = vpop.f32.mrf.mxu2  ;;  %v2907_v5 = vpop.f32.mrf.mxu3 }
 0x554   : > { %2355 = vst.msk [vmem:[#allocation4 + $0x58] sm:$0xff] %vm2343_vm1, %v2322_v16  ;;  %v2933_v12 = vadd.f32 %v2764_v4, %v2579_v50  ;;  %v2948_v41 = vadd.f32 %v2907_v5, %v2594_v7 }
 0x556   : > { %2965 = vst [vmem:[#allocation5 + $0x88] sm:$0xff] %v2933_v12 }
 0x557   : > { %2980 = vst [vmem:[#allocation5 + $0xa0] sm:$0xff] %v2948_v41  ;;  %v2278_v47 = vpop.xlane.xlu0 %2277 }
 0x558   : > { %v2326_v44 = vadd.f32 %v2278_v47, %v2230_v37 }
 0x559   : > { %v2306_v29 = vpop.xlane.xlu1 %2305 }
 0x55a   : > { %2359 = vst.msk [vmem:[#allocation4 + $0x78] sm:$0xff] %vm2343_vm1, %v2326_v44  ;;  %v2340_v27 = vadd.f32 %v2306_v29, %v2244_v10 }
 0x55b   : > { %v2909_v30 = vpop.f32.mrf.mxu3 }
 0x55c   : > { %2373 = vst.msk [vmem:[#allocation4 + $0xe8] sm:$0xff] %vm2343_vm1, %v2340_v27  ;;  %v2949_v45 = vadd.f32 %v2909_v30, %v2595_v54 }
 0x55d   : > { %v2310_v11 = vpop.xlane.xlu2 %2309 }
 0x55e   : > { %2981 = vst [vmem:[#allocation5 + $0x20] sm:$0xff] %v2949_v45  ;;  %v2342_v31 = vadd.f32 %v2310_v11, %v2246_v59 }
 0x560   : > { %2375 = vst.msk [vmem:[#allocation4 + $0xf8] sm:$0xff] %vm2343_vm1, %v2342_v31 }
 0x561   : > { %v2276_v9 = vpop.xlane.xlu1 %2275 }
 0x562   : > { %v2325_v32 = vadd.f32 %v2276_v9, %v2229_v3 }
 0x563   : > { %v2767_v46 = vpop.f32.mrf.mxu2  ;;  %v2912_v63 = vpop.f32.mrf.mxu3 }
 0x564   : > { %2358 = vst.msk [vmem:[#allocation4 + $0x70] sm:$0xff] %vm2343_vm1, %v2325_v32  ;;  %v2934_v52 = vadd.f32 %v2767_v46, %v2580_v20  ;;  %v2950_v13 = vadd.f32 %v2912_v63, %v2596_v36 }
 0x565   : > { %v2556_v57 = vpop.permute.xlu2 %2555 }
 0x566   : > { %2966 = vst [vmem:[#allocation5 + $0xf0] sm:$0xff] %v2934_v52  ;;  %v2597_v6 = vmul.f32 %v2556_v57, %v2405_v42 }
 0x567   : > { %2982 = vst [vmem:[#allocation5 + $0x8] sm:$0xff] %v2950_v13 }
 0x56a   : > { %v2561_v21 = vpop.permute.xlu0 %2560 }
 0x56b   : > { %v2769_v25 = vpop.f32.mrf.mxu2  ;;  %v2914_v62 = vpop.f32.mrf.mxu3  ;;  %v2598_v51 = vmul.f32 %v2561_v21, %v2406_v35 }
 0x56c   : > { %v2935_v17 = vadd.f32 %v2769_v25, %v2581_v22  ;;  %v2951_v43 = vadd.f32 %v2914_v62, %v2597_v6 }
 0x56e   : > { %2967 = vst [vmem:[#allocation5 + $0x18] sm:$0xff] %v2935_v17 }
 0x56f   : > { %2983 = vst [vmem:[#allocation5 + $0xe0] sm:$0xff] %v2951_v43 }
 0x573   : > { %v2772_v19 = vpop.f32.mrf.mxu2  ;;  %v2917_v15 = vpop.f32.mrf.mxu3 }
 0x574   : > { %v2936_v28 = vadd.f32 %v2772_v19, %v2582_v18  ;;  %v2952_v33 = vadd.f32 %v2917_v15, %v2598_v51 }
 0x576   : > { %2968 = vst [vmem:[#allocation5 + $0x30] sm:$0xff] %v2936_v28 }
 0x577   : > { %2984 = vst [vmem:[#allocation5 + $0x60] sm:$0xff] %v2952_v33 }
 0x579   : > { %v2566_v56 = vpop.permute.xlu1 %2565 }
 0x57a   : > { %v2599_v58 = vmul.f32 %v2566_v56, %v2407_v49 }
 0x57b   : > { %v2774_v39 = vpop.f32.mrf.mxu2  ;;  %v2919_v61 = vpop.f32.mrf.mxu3  ;;  %3021 = sbr.rel (%p3969_p7) target bundleno = 2140 (0x85c), region = 124 }
 0x57c   : > { %v2937_v50 = vadd.f32 %v2774_v39, %v2583_v48  ;;  %v2953_v7 = vadd.f32 %v2919_v61, %v2599_v58 }
 0x57e   : > { %2969 = vst [vmem:[#allocation5 + $0x50] sm:$0xff] %v2937_v50 }
 0x57f   : > { %2985 = vst [vmem:[#allocation5 + $0x98] sm:$0xff] %v2953_v7 }
 0x580   : > { %v3026_v38 = vld [vmem:[#allocation4 + $0x20] sm:$0xff]  ;;  %v3024_v16 = vld [vmem:[#allocation4 + $0x10] sm:$0xff]  ;;  %v4535_v5 = vmov 0   ;;  %v3027_v40 = vld [vmem:[#allocation4 + $0x28] sm:$0xff]  ;;  %vm3673_vm2 = vcmask 130112   ;;  %vm3677_vm3 = vcmask 195712  }
 0x581   : > { %v3022_v4 = vld [vmem:[#allocation4] sm:$0xff]  ;;  %4333 = vset.pattern.permute.xlu2 %v4535_v5  ;;  %4332 = vset.pattern.permute.xlu1 %v4535_v5  ;;  %4335 = vrcp.f32 %v3026_v38  ;;  %v3025_v14 = vld [vmem:[#allocation4 + $0x18] sm:$0xff]  ;;  %v3023_v12 = vld [vmem:[#allocation4 + $0x8] sm:$0xff]  ;;  %vm3681_vm4 = vcmask 261312   ;;  %vm3685_vm5 = vcmask 326912   ;;  %vm3689_vm6 = vcmask 392512  }
 0x582   : > { %4331 = vset.pattern.permute.xlu0 %v4535_v5  ;;  %4337 = vrcp.f32 %v3024_v16  ;;  %v3030_v37 = vld [vmem:[#allocation4 + $0x40] sm:$0xff]  ;;  %v3029_v47 = vld [vmem:[#allocation4 + $0x38] sm:$0xff]  ;;  %v3028_v10 = vld [vmem:[#allocation4 + $0x30] sm:$0xff]  ;;  %vm3693_vm7 = vcmask 458112   ;;  %vm3697_vm8 = vcmask 523712   ;;  %vm3701_vm9 = vcmask 589312  }
 0x583   : > { %4339 = vrcp.f32 %v3022_v4  ;;  %v3033_v0 = vld [vmem:[#allocation4 + $0x58] sm:$0xff]  ;;  %v3032_v27 = vld [vmem:[#allocation4 + $0x50] sm:$0xff]  ;;  %v3031_v45 = vld [vmem:[#allocation4 + $0x48] sm:$0xff]  ;;  %vm3705_vm10 = vcmask 654912   ;;  %vm3709_vm11 = vcmask 720512   ;;  %vm3713_vm12 = vcmask 786112  }
 0x584   : > { %4341 = vrcp.f32 %v3027_v40  ;;  %v3036_v11 = vld [vmem:[#allocation4 + $0x70] sm:$0xff]  ;;  %v3035_v31 = vld [vmem:[#allocation4 + $0x68] sm:$0xff]  ;;  %v3034_v26 = vld [vmem:[#allocation4 + $0x60] sm:$0xff]  ;;  %vm3717_vm13 = vcmask 851712   ;;  %vm3721_vm14 = vcmask 917312   ;;  %vm3725_vm15 = vcmask 982912  }
 0x585   : > { %4343 = vrcp.f32 %v3025_v14  ;;  %v3039_v3 = vld [vmem:[#allocation4 + $0x88] sm:$0xff]  ;;  %v3038_v20 = vld [vmem:[#allocation4 + $0x80] sm:$0xff]  ;;  %v3037_v32 = vld [vmem:[#allocation4 + $0x78] sm:$0xff]  ;;  %vm3729_vm0 = vcmask 1048512   ;;  %vm3762_vm1 = vcmask 1041409  }
 0x586   : > { %4345 = vrcp.f32 %v3023_v12  ;;  %v3042_v63 = vld [vmem:[#allocation4 + $0xa0] sm:$0xff]  ;;  %v3041_v13 = vld [vmem:[#allocation4 + $0x98] sm:$0xff]  ;;  %v3040_v42 = vld [vmem:[#allocation4 + $0x90] sm:$0xff] }
 0x587   : > { %v4336_v41 = vpop.eup %4335  ;;  %4347 = vrcp.f32 %v3030_v37  ;;  %v3045_v22 = vld [vmem:[#allocation4 + $0xb8] sm:$0xff]  ;;  %v3044_v25 = vld [vmem:[#allocation4 + $0xb0] sm:$0xff]  ;;  %v3043_v17 = vld [vmem:[#allocation4 + $0xa8] sm:$0xff] }
 0x588   : > { %v4338_v34 = vpop.eup %4337  ;;  %3140 = vperm.xlu2 %4333, %v4336_v41   ;;  %4349 = vrcp.f32 %v3029_v47  ;;  %v3048_v24 = vld [vmem:[#allocation4 + $0xd0] sm:$0xff]  ;;  %v3047_v21 = vld [vmem:[#allocation4 + $0xc8] sm:$0xff]  ;;  %v3046_v51 = vld [vmem:[#allocation4 + $0xc0] sm:$0xff] }
 0x589   : > { %v4340_v23 = vpop.eup %4339  ;;  %3130 = vperm.xlu1 %4332, %v4338_v34   ;;  %4351 = vrcp.f32 %v3028_v10  ;;  %v3051_v15 = vld [vmem:[#allocation4 + $0xe8] sm:$0xff]  ;;  %v3050_v33 = vld [vmem:[#allocation4 + $0xe0] sm:$0xff]  ;;  %v3049_v49 = vld [vmem:[#allocation4 + $0xd8] sm:$0xff] }
 0x58a   : > { %3120 = vperm.xlu0 %4331, %v4340_v23   ;;  %v4342_v1 = vpop.eup %4341  ;;  %4353 = vrcp.f32 %v3033_v0  ;;  %v3088_v7 = vld [vmem:[#allocation5 + $0x10] sm:$0xff]  ;;  %v3086_v38 = vld [vmem:[#allocation5 + $0xa8] sm:$0xff]  ;;  %v6183_v4 = vld [vmem:[%s6434_s2 + $0x6] ss:$0 sm:$0xff] }
 0x58b   : > { %v4344_v44 = vpop.eup %4343  ;;  %4355 = vrcp.f32 %v3032_v27  ;;  %v3089_v34 = vld [vmem:[#allocation5 + $0xc0] sm:$0xff]  ;;  %v3087_v37 = vld [vmem:[#allocation5 + $0x68] sm:$0xff]  ;;  %v3091_v27 = vld [vmem:[#allocation5 + $0xb0] sm:$0xff] }
 0x58c   : > { %v4346_v29 = vpop.eup %4345  ;;  %4357 = vrcp.f32 %v3031_v45 }
 0x58d   : > { %v4348_v54 = vpop.eup %4347  ;;  %4359 = vrcp.f32 %v3036_v11 }
 0x58e   : > { %v4350_v30 = vpop.eup %4349  ;;  %4361 = vrcp.f32 %v3035_v31 }
 0x58f   : > { %v4352_v59 = vpop.eup %4351  ;;  %4363 = vrcp.f32 %v3034_v26 }
 0x590   : > { %3145 = vperm.xlu2 %4333, %v4342_v1   ;;  %v4354_v8 = vpop.eup %4353  ;;  %4365 = vrcp.f32 %v3039_v3  ;;  %v3094_v3 = vld [vmem:[#allocation5 + $0x48] sm:$0xff] }
 0x591   : > { %3135 = vperm.xlu1 %4332, %v4344_v44   ;;  %v4356_v55 = vpop.eup %4355  ;;  %4367 = vrcp.f32 %v3038_v20 }
 0x592   : > { %3125 = vperm.xlu0 %4331, %v4346_v29   ;;  %v4358_v60 = vpop.eup %4357  ;;  %4369 = vrcp.f32 %v3037_v32 }
 0x593   : > { %v4360_v9 = vpop.eup %4359  ;;  %4371 = vrcp.f32 %v3042_v63 }
 0x594   : > { %v4362_v36 = vpop.eup %4361  ;;  %4373 = vrcp.f32 %v3041_v13  ;;  %v3097_v13 = vld [vmem:[#allocation5 + $0x88] sm:$0xff] }
 0x595   : > { %v4364_v46 = vpop.eup %4363  ;;  %4375 = vrcp.f32 %v3040_v42 }
 0x596   : > { %v4366_v52 = vpop.eup %4365  ;;  %4377 = vrcp.f32 %v3045_v22 }
 0x597   : > { %v4368_v2 = vpop.eup %4367  ;;  %4379 = vrcp.f32 %v3044_v25 }
 0x598   : > { %3160 = vperm.xlu2 %4333, %v4348_v54   ;;  %v4370_v57 = vpop.eup %4369  ;;  %4381 = vrcp.f32 %v3043_v17  ;;  %v3090_v54 = vld [vmem:[#allocation5 + $0xc8] sm:$0xff] }
 0x599   : > { %3155 = vperm.xlu1 %4332, %v4350_v30   ;;  %v4372_v6 = vpop.eup %4371  ;;  %4383 = vrcp.f32 %v3048_v24  ;;  %v3092_v30 = vld [vmem:[#allocation5 + $0x70] sm:$0xff] }
 0x59a   : > { %3150 = vperm.xlu0 %4331, %v4352_v59   ;;  %v4374_v62 = vpop.eup %4373  ;;  %4385 = vrcp.f32 %v3047_v21 }
 0x59b   : > { %v4376_v43 = vpop.eup %4375  ;;  %4387 = vrcp.f32 %v3046_v51 }
 0x59c   : > { %v4378_v35 = vpop.eup %4377  ;;  %4389 = vrcp.f32 %v3051_v15  ;;  %v3103_v15 = vld [vmem:[#allocation5 + $0xd0] sm:$0xff] }
 0x59d   : > { %v4380_v18 = vpop.eup %4379  ;;  %4391 = vrcp.f32 %v3050_v33  ;;  %v3104_v33 = vld [vmem:[#allocation5 + $0xd8] sm:$0xff] }
 0x59e   : > { %v4382_v19 = vpop.eup %4381  ;;  %4393 = vrcp.f32 %v3049_v49 }
 0x59f   : > { %v4384_v28 = vpop.eup %4383 }
 0x5a0   : > { %3175 = vperm.xlu2 %4333, %v4354_v8   ;;  %v4386_v53 = vpop.eup %4385 }
 0x5a1   : > { %3170 = vperm.xlu1 %4332, %v4356_v55   ;;  %v4388_v56 = vpop.eup %4387 }
 0x5a2   : > { %3165 = vperm.xlu0 %4331, %v4358_v60   ;;  %v4390_v48 = vpop.eup %4389 }
 0x5a3   : > { %v4392_v58 = vpop.eup %4391 }
 0x5a4   : > { %v4394_v39 = vpop.eup %4393 }
 0x5a8   : > { %3190 = vperm.xlu2 %4333, %v4360_v9   ;;  %v3095_v9 = vld [vmem:[#allocation5 + $0xf8] sm:$0xff] }
 0x5a9   : > { %3185 = vperm.xlu1 %4332, %v4362_v36  }
 0x5aa   : > { %3180 = vperm.xlu0 %4331, %v4364_v46  }
 0x5b0   : > { %3205 = vperm.xlu2 %4333, %v4366_v52  }
 0x5b1   : > { %3200 = vperm.xlu1 %4332, %v4368_v2   ;;  %v3098_v2 = vld [vmem:[#allocation5 + $0xf0] sm:$0xff] }
 0x5b2   : > { %3195 = vperm.xlu0 %4331, %v4370_v57  }
 0x5b8   : > { %3220 = vperm.xlu2 %4333, %v4372_v6  }
 0x5b9   : > { %3215 = vperm.xlu1 %4332, %v4374_v62   ;;  %v3100_v62 = vld [vmem:[#allocation5 + $0x30] sm:$0xff] }
 0x5ba   : > { %3210 = vperm.xlu0 %4331, %v4376_v43   ;;  %v3101_v43 = vld [vmem:[#allocation5 + $0x50] sm:$0xff] }
 0x5c0   : > { %3235 = vperm.xlu2 %4333, %v4378_v35  }
 0x5c1   : > { %3230 = vperm.xlu1 %4332, %v4380_v18  }
 0x5c2   : > { %3225 = vperm.xlu0 %4331, %v4382_v19  }
 0x5c8   : > { %3250 = vperm.xlu2 %4333, %v4384_v28  }
 0x5c9   : > { %3245 = vperm.xlu1 %4332, %v4386_v53   ;;  %v3093_v53 = vld [vmem:[#allocation5 + $0x38] sm:$0xff] }
 0x5ca   : > { %3240 = vperm.xlu0 %4331, %v4388_v56  }
 0x5d0   : > { %3265 = vperm.xlu2 %4333, %v4390_v48  }
 0x5d1   : > { %3260 = vperm.xlu1 %4332, %v4392_v58  }
 0x5d2   : > { %3255 = vperm.xlu0 %4331, %v4394_v39  }
 0x5e2   : > { %v3141_v61 = vpop.permute.xlu2 %3140 }
 0x5e3   : > { %v3282_v45 = vmul.f32 %v3141_v61, %v3090_v54 }
 0x5e5   : > { %v3316_v55 = vmul.f32 %v6183_v4, %v3282_v45 }
 0x5ea   : > { %v3146_v50 = vpop.permute.xlu2 %3145 }
 0x5eb   : > { %v3283_v59 = vmul.f32 %v3146_v50, %v3091_v27  ;;  %v3106_v50 = vld [vmem:[#allocation5 + $0x80] sm:$0xff] }
 0x5ed   : > { %v3317_v26 = vmul.f32 %v6183_v4, %v3283_v59 }
 0x5f2   : > { %v3161_v23 = vpop.permute.xlu2 %3160 }
 0x5f3   : > { %v3286_v20 = vmul.f32 %v3161_v23, %v3094_v3 }
 0x5f5   : > { %v3320_v63 = vmul.f32 %v6183_v4, %v3286_v20 }
 0x5fa   : > { %v3176_v11 = vpop.permute.xlu2 %3175 }
 0x5fb   : > { %v3131_v16 = vpop.permute.xlu1 %3130  ;;  %v3289_v42 = vmul.f32 %v3176_v11, %v3097_v13  ;;  %v3112_v11 = vld [vmem:[#allocation5 + $0xa0] sm:$0xff] }
 0x5fc   : > { %v3280_v5 = vmul.f32 %v3131_v16, %v3088_v7  ;;  %v3121_v40 = vpop.permute.xlu0 %3120  ;;  %v3096_v7 = vld [vmem:[#allocation5 + $0x78] sm:$0xff] }
 0x5fd   : > { %v3278_v14 = vmul.f32 %v3121_v40, %v3086_v38  ;;  %v3323_v6 = vmul.f32 %v6183_v4, %v3289_v42 }
 0x5fe   : > { %v3314_v12 = vmul.f32 %v6183_v4, %v3280_v5  ;;  %v3107_v5 = vld [vmem:[#allocation5 + $0x40] sm:$0xff] }
 0x5ff   : > { %v3312_v41 = vmul.f32 %v6183_v4, %v3278_v14 }
 0x600   : > { %3348 = vadd.xlane.f32.xlu1 %v3314_v12 }
 0x601   : > { %3344 = vadd.xlane.f32.xlu2 %v3312_v41 }
 0x602   : > { %v3191_v46 = vpop.permute.xlu2 %3190 }
 0x603   : > { %v3136_v1 = vpop.permute.xlu1 %3135  ;;  %v3292_v24 = vmul.f32 %v3191_v46, %v3100_v62  ;;  %v3052_v62 = vld [vmem:[#allocation4 + $0xf0] sm:$0xff] }
 0x604   : > { %v3281_v47 = vmul.f32 %v3136_v1, %v3089_v34  ;;  %v3126_v44 = vpop.permute.xlu0 %3125  ;;  %4395 = vrcp.f32 %v3052_v62 }
 0x605   : > { %v3279_v10 = vmul.f32 %v3126_v44, %v3087_v37  ;;  %v3326_v51 = vmul.f32 %v6183_v4, %v3292_v24  ;;  %v3110_v44 = vld [vmem:[#allocation5 + $0x90] sm:$0xff] }
 0x606   : > { %v3315_v29 = vmul.f32 %v6183_v4, %v3281_v47  ;;  %v3109_v47 = vld [vmem:[#allocation5] sm:$0xff] }
 0x607   : > { %v3313_v0 = vmul.f32 %v6183_v4, %v3279_v10 }
 0x609   : > { %3350 = vadd.xlane.f32.xlu2 %v3315_v29  ;;  %3346 = vadd.xlane.f32.xlu0 %v3313_v0 }
 0x60a   : > { %v3206_v17 = vpop.permute.xlu2 %3205 }
 0x60b   : > { %v3156_v18 = vpop.permute.xlu1 %3155  ;;  %v3295_v49 = vmul.f32 %v3206_v17, %v3103_v15 }
 0x60c   : > { %v3151_v8 = vpop.permute.xlu0 %3150  ;;  %v3285_v58 = vmul.f32 %v3156_v18, %v3093_v53  ;;  %v3111_v18 = vld [vmem:[#allocation5 + $0xe8] sm:$0xff] }
 0x60d   : > { %v3284_v31 = vmul.f32 %v3151_v8, %v3092_v30  ;;  %v3329_v39 = vmul.f32 %v6183_v4, %v3295_v49  ;;  %v3099_v30 = vld [vmem:[#allocation5 + $0x18] sm:$0xff]  ;;  %v3408_v49 = vld [vmem:[%s4836_s5] sm:$0xff] }
 0x60e   : > { %v3319_v16 = vmul.f32 %v6183_v4, %v3285_v58 }
 0x60f   : > { %v3318_v60 = vmul.f32 %v6183_v4, %v3284_v31  ;;  %v3113_v31 = vld [vmem:[#allocation5 + $0x20] sm:$0xff] }
 0x611   : > { %3352 = vadd.xlane.f32.xlu2 %v3316_v55  ;;  %3354 = vadd.xlane.f32.xlu0 %v3317_v26 }
 0x612   : > { %3356 = vadd.xlane.f32.xlu1 %v3318_v60  ;;  %v3221_v28 = vpop.permute.xlu2 %3220  ;;  %v3102_v60 = vld [vmem:[#allocation5 + $0xb8] sm:$0xff] }
 0x613   : > { %v3171_v38 = vpop.permute.xlu1 %3170  ;;  %v3298_v40 = vmul.f32 %v3221_v28, %v3106_v50  ;;  %v3114_v28 = vld [vmem:[#allocation5 + $0x8] sm:$0xff] }
 0x614   : > { %v3166_v36 = vpop.permute.xlu0 %3165  ;;  %v3288_v14 = vmul.f32 %v3171_v38, %v3096_v7  ;;  %v3411_v7 = vld [vmem:[%s4836_s5 + $0x18] sm:$0xff] }
 0x615   : > { %v3287_v32 = vmul.f32 %v3166_v36, %v3095_v9  ;;  %v3332_v23 = vmul.f32 %v6183_v4, %v3298_v40 }
 0x616   : > { %v3322_v1 = vmul.f32 %v6183_v4, %v3288_v14 }
 0x617   : > { %v3321_v52 = vmul.f32 %v6183_v4, %v3287_v32 }
 0x619   : > { %3360 = vadd.xlane.f32.xlu0 %v3320_v63  ;;  %3358 = vadd.xlane.f32.xlu2 %v3319_v16  ;;  %v3115_v63 = vld [vmem:[#allocation5 + $0xe0] sm:$0xff] }
 0x61a   : > { %3362 = vadd.xlane.f32.xlu1 %v3321_v52  ;;  %v3236_v12 = vpop.permute.xlu2 %3235 }
 0x61b   : > { %v3186_v10 = vpop.permute.xlu1 %3185  ;;  %v3301_v29 = vmul.f32 %v3236_v12, %v3109_v47  ;;  %v3413_v12 = vld [vmem:[%s4836_s5 + $0x28] sm:$0xff] }
 0x61c   : > { %v3181_v57 = vpop.permute.xlu0 %3180  ;;  %v3291_v8 = vmul.f32 %v3186_v10, %v3099_v30 }
 0x61d   : > { %v3290_v22 = vmul.f32 %v3181_v57, %v3098_v2  ;;  %v3335_v45 = vmul.f32 %v6183_v4, %v3301_v29 }
 0x61e   : > { %v3325_v20 = vmul.f32 %v6183_v4, %v3291_v8 }
 0x61f   : > { %v3324_v25 = vmul.f32 %v6183_v4, %v3290_v22  ;;  %v3105_v22 = vld [vmem:[#allocation5 + $0x58] sm:$0xff] }
 0x621   : > { %3366 = vadd.xlane.f32.xlu0 %v3323_v6  ;;  %3364 = vadd.xlane.f32.xlu2 %v3322_v1  ;;  %v3416_v1 = vld [vmem:[%s4836_s5 + $0x40] sm:$0xff] }
 0x622   : > { %3368 = vadd.xlane.f32.xlu1 %v3324_v25  ;;  %v3251_v27 = vpop.permute.xlu2 %3250 }
 0x623   : > { %v3304_v55 = vmul.f32 %v3251_v27, %v3112_v11  ;;  %v3201_v3 = vpop.permute.xlu1 %3200 }
 0x624   : > { %v3196_v35 = vpop.permute.xlu0 %3195  ;;  %v3294_v46 = vmul.f32 %v3201_v3, %v3102_v60 }
 0x625   : > { %v3293_v21 = vmul.f32 %v3196_v35, %v3101_v43  ;;  %v3338_v36 = vmul.f32 %v6183_v4, %v3304_v55  ;;  %v3108_v43 = vld [vmem:[#allocation5 + $0x28] sm:$0xff] }
 0x626   : > { %v3328_v2 = vmul.f32 %v6183_v4, %v3294_v46 }
 0x627   : > { %v3327_v19 = vmul.f32 %v6183_v4, %v3293_v21  ;;  %v4396_v21 = vpop.eup %4395 }
 0x629   : > { %3372 = vadd.xlane.f32.xlu0 %v3326_v51  ;;  %3370 = vadd.xlane.f32.xlu2 %v3325_v20 }
 0x62a   : > { %3374 = vadd.xlane.f32.xlu1 %v3327_v19  ;;  %v3266_v52 = vpop.permute.xlu2 %3265 }
 0x62b   : > { %v3307_v13 = vmul.f32 %v3266_v52, %v3115_v63  ;;  %v3216_v42 = vpop.permute.xlu1 %3215 }
 0x62c   : > { %v3211_v56 = vpop.permute.xlu0 %3210  ;;  %v3297_v6 = vmul.f32 %v3216_v42, %v3105_v22 }
 0x62d   : > { %v3296_v48 = vmul.f32 %v3211_v56, %v3104_v33  ;;  %v3341_v57 = vmul.f32 %v6183_v4, %v3307_v13  ;;  %v6215_v56 = vstv %s3440_s26  ;;  %v3431_v13 = vld [vmem:[%s4836_s5 + $0xb8] sm:$0xff] }
 0x62e   : > { %v3331_v17 = vmul.f32 %v6183_v4, %v3297_v6  ;;  %v3445_v16 = vmul.f32 %v6215_v56, %v3411_v7  ;;  %v3465_v42 = vmul.f32 %v6215_v56, %v3431_v13  ;;  %v3434_v6 = vld [vmem:[%s4836_s5 + $0xd0] sm:$0xff] }
 0x62f   : > { %v3330_v61 = vmul.f32 %v6183_v4, %v3296_v48  ;;  %v3442_v48 = vmul.f32 %v6215_v56, %v3408_v49  ;;  %v3468_v62 = vmul.f32 %v6215_v56, %v3434_v6  ;;  %v3053_v49 = vld [vmem:[#allocation4 + $0xf8] sm:$0xff] }
 0x630   : > { %4397 = vrcp.f32 %v3053_v49  ;;  %v3117_v49 = vld [vmem:[#allocation5 + $0x98] sm:$0xff] }
 0x631   : > { %3378 = vadd.xlane.f32.xlu0 %v3329_v39  ;;  %3376 = vadd.xlane.f32.xlu2 %v3328_v2  ;;  %v6219_v39 = vstv %s3970_s28 }
 0x632   : > { %3380 = vadd.xlane.f32.xlu1 %v3330_v61 }
 0x633   : > { %v3231_v25 = vpop.permute.xlu1 %3230 }
 0x634   : > { %v3226_v41 = vpop.permute.xlu0 %3225  ;;  %v3300_v24 = vmul.f32 %v3231_v25, %v3108_v43 }
 0x635   : > { %v3299_v34 = vmul.f32 %v3226_v41, %v3107_v5 }
 0x636   : > { %v3334_v35 = vmul.f32 %v6183_v4, %v3300_v24  ;;  %v3437_v24 = vld [vmem:[%s4836_s5 + $0xe8] sm:$0xff] }
 0x637   : > { %v3333_v37 = vmul.f32 %v6183_v4, %v3299_v34  ;;  %v3447_v34 = vmul.f32 %v6215_v56, %v3413_v12  ;;  %v3415_v12 = vld [vmem:[%s4836_s5 + $0x38] sm:$0xff] }
 0x639   : > { %3384 = vadd.xlane.f32.xlu0 %v3332_v23  ;;  %3382 = vadd.xlane.f32.xlu2 %v3331_v17 }
 0x63a   : > { %3386 = vadd.xlane.f32.xlu1 %v3333_v37 }
 0x63b   : > { %v3246_v51 = vpop.permute.xlu1 %3245 }
 0x63c   : > { %v3241_v0 = vpop.permute.xlu0 %3240  ;;  %v3303_v19 = vmul.f32 %v3246_v51, %v3111_v18 }
 0x63d   : > { %v3302_v54 = vmul.f32 %v3241_v0, %v3110_v44  ;;  %v3450_v44 = vmul.f32 %v6215_v56, %v3416_v1  ;;  %v3419_v0 = vld [vmem:[%s4836_s5 + $0x58] sm:$0xff] }
 0x63e   : > { %v3337_v15 = vmul.f32 %v6183_v4, %v3303_v19  ;;  %v3453_v27 = vmul.f32 %v6215_v56, %v3419_v0 }
 0x63f   : > { %v3336_v59 = vmul.f32 %v6183_v4, %v3302_v54 }
 0x641   : > { %3390 = vadd.xlane.f32.xlu0 %v3335_v45  ;;  %3388 = vadd.xlane.f32.xlu2 %v3334_v35 }
 0x642   : > { %3392 = vadd.xlane.f32.xlu1 %v3336_v59  ;;  %v3422_v59 = vld [vmem:[%s4836_s5 + $0x70] sm:$0xff] }
 0x643   : > { %v3261_v33 = vpop.permute.xlu1 %3260  ;;  %v3456_v8 = vmul.f32 %v6215_v56, %v3422_v59 }
 0x644   : > { %v3256_v26 = vpop.permute.xlu0 %3255  ;;  %v3306_v53 = vmul.f32 %v3261_v33, %v3114_v28 }
 0x645   : > { %v3305_v9 = vmul.f32 %v3256_v26, %v3113_v31  ;;  %v3425_v26 = vld [vmem:[%s4836_s5 + $0x88] sm:$0xff] }
 0x646   : > { %v3340_v58 = vmul.f32 %v6183_v4, %v3306_v53  ;;  %v3459_v3 = vmul.f32 %v6215_v56, %v3425_v26 }
 0x647   : > { %v3339_v32 = vmul.f32 %v6183_v4, %v3305_v9 }
 0x649   : > { %3396 = vadd.xlane.f32.xlu0 %v3338_v36  ;;  %3394 = vadd.xlane.f32.xlu2 %v3337_v15  ;;  %v3428_v36 = vld [vmem:[%s4836_s5 + $0xa0] sm:$0xff] }
 0x64a   : > { %3398 = vadd.xlane.f32.xlu1 %v3339_v32  ;;  %v3462_v46 = vmul.f32 %v6215_v56, %v3428_v36  ;;  %v3116_v15 = vld [vmem:[#allocation5 + $0x60] sm:$0xff] }
 0x651   : > { %3402 = vadd.xlane.f32.xlu0 %v3341_v57  ;;  %3400 = vadd.xlane.f32.xlu2 %v3340_v58  ;;  %v3409_v58 = vld [vmem:[%s4836_s5 + $0x8] sm:$0xff] }
 0x665   : > { %3270 = vperm.xlu0 %4331, %v4396_v21   ;;  %v3471_v21 = vmul.f32 %v6215_v56, %v3437_v24 }
 0x674   : > { %v3345_v61 = vpop.xlane.xlu2 %3344 }
 0x675   : > { %v3474_v50 = vadd.f32 %v3442_v48, %v3345_v61  ;;  %v4398_v61 = vpop.eup %4397 }
 0x677   : > { %v3508_v38 = vadd.f32 %v6219_v39, %v3474_v50  ;;  %v3443_v50 = vmul.f32 %v6215_v56, %v3409_v58  ;;  %v3668_v58 = vlaneseq }
 0x679   : > { %3573 = vperm.xlu0 %4331, %v3508_v38  }
 0x67c   : > { %v3351_v5 = vpop.xlane.xlu2 %3350  ;;  %v6224_v40 = vpop.xlane.xlu0 %3346 }
 0x67d   : > { %v3477_v14 = vadd.f32 %v3445_v16, %v3351_v5  ;;  %v3475_v38 = vadd.f32 %v3443_v50, %v6224_v40  ;;  %v3412_v16 = vld [vmem:[%s4836_s5 + $0x20] sm:$0xff]  ;;  %v3418_v40 = vld [vmem:[%s4836_s5 + $0x50] sm:$0xff] }
 0x67f   : > { %v3511_v41 = vadd.f32 %v6219_v39, %v3477_v14  ;;  %v3509_v5 = vadd.f32 %v6219_v39, %v3475_v38  ;;  %v3446_v14 = vmul.f32 %v6215_v56, %v3412_v16 }
 0x681   : > { %3582 = vperm.xlu0 %4331, %v3511_v41  }
 0x684   : > { %v3355_v23 = vpop.xlane.xlu0 %3354  ;;  %v3353_v48 = vpop.xlane.xlu2 %3352 }
 0x685   : > { %v3479_v37 = vadd.f32 %v3447_v34, %v3355_v23  ;;  %v3478_v41 = vadd.f32 %v3446_v14, %v3353_v48  ;;  %v3449_v23 = vmul.f32 %v6215_v56, %v3415_v12 }
 0x687   : > { %v3513_v47 = vadd.f32 %v6219_v39, %v3479_v37  ;;  %v3512_v37 = vadd.f32 %v6219_v39, %v3478_v41 }
 0x689   : > { %3588 = vperm.xlu0 %4331, %v3513_v47   ;;  %v6264_v47 = vpop.xlane.xlu1 %3348 }
 0x68c   : > { %v3361_v10 = vpop.xlane.xlu0 %3360  ;;  %v3359_v7 = vpop.xlane.xlu2 %3358 }
 0x68d   : > { %v3482_v29 = vadd.f32 %v3450_v44, %v3361_v10  ;;  %v3481_v1 = vadd.f32 %v3449_v23, %v3359_v7  ;;  %v6293_v7 = vand.u32 127, %v3668_v58 }
 0x68f   : > { %v3516_v54 = vadd.f32 %v6219_v39, %v3482_v29  ;;  %v3515_v44 = vadd.f32 %v6219_v39, %v3481_v1  ;;  %v3452_v29 = vmul.f32 %v6215_v56, %v3418_v40  ;;  %v6296_v16 = vadd.s32 4294967288, %v6293_v7 }
 0x691   : > { %3597 = vperm.xlu0 %4331, %v3516_v54   ;;  %v3421_v54 = vld [vmem:[%s4836_s5 + $0x68] sm:$0xff] }
 0x694   : > { %v3367_v30 = vpop.xlane.xlu0 %3366  ;;  %v3365_v34 = vpop.xlane.xlu2 %3364 }
 0x695   : > { %v3485_v45 = vadd.f32 %v3453_v27, %v3367_v30  ;;  %v3484_v0 = vadd.f32 %v3452_v29, %v3365_v34  ;;  %v6270_v27 = vpop.xlane.xlu1 %3356  ;;  %v3410_v34 = vld [vmem:[%s4836_s5 + $0x10] sm:$0xff] }
 0x697   : > { %v3519_v11 = vadd.f32 %v6219_v39, %v3485_v45  ;;  %v3518_v30 = vadd.f32 %v6219_v39, %v3484_v0  ;;  %v3455_v45 = vmul.f32 %v6215_v56, %v3421_v54 }
 0x699   : > { %3606 = vperm.xlu0 %4331, %v3519_v11  }
 0x69c   : > { %v3373_v31 = vpop.xlane.xlu0 %3372  ;;  %v3371_v10 = vpop.xlane.xlu2 %3370 }
 0x69d   : > { %v3488_v55 = vadd.f32 %v3456_v8, %v3373_v31  ;;  %v3487_v11 = vadd.f32 %v3455_v45, %v3371_v10  ;;  %v3424_v8 = vld [vmem:[%s4836_s5 + $0x80] sm:$0xff]  ;;  %v6275_v31 = vpop.xlane.xlu1 %3362  ;;  %v3417_v10 = vld [vmem:[%s4836_s5 + $0x48] sm:$0xff] }
 0x69e   : > { %v3458_v26 = vmul.f32 %v6215_v56, %v3424_v8  ;;  %v3451_v0 = vmul.f32 %v6215_v56, %v3417_v10 }
 0x69f   : > { %v3522_v60 = vadd.f32 %v6219_v39, %v3488_v55  ;;  %v3521_v55 = vadd.f32 %v6219_v39, %v3487_v11  ;;  %v3423_v11 = vld [vmem:[%s4836_s5 + $0x78] sm:$0xff] }
 0x6a0   : > { %v3483_v54 = vadd.f32 %v3451_v0, %v6275_v31  ;;  %v3457_v8 = vmul.f32 %v6215_v56, %v3423_v11 }
 0x6a1   : > { %3615 = vperm.xlu0 %4331, %v3522_v60  }
 0x6a4   : > { %v3379_v9 = vpop.xlane.xlu0 %3378  ;;  %v3377_v59 = vpop.xlane.xlu2 %3376 }
 0x6a5   : > { %v3491_v20 = vadd.f32 %v3459_v3, %v3379_v9  ;;  %v3490_v3 = vadd.f32 %v3458_v26, %v3377_v59  ;;  %v3427_v9 = vld [vmem:[%s4836_s5 + $0x98] sm:$0xff]  ;;  %v3426_v26 = vld [vmem:[%s4836_s5 + $0x90] sm:$0xff] }
 0x6a6   : > { %v3461_v36 = vmul.f32 %v6215_v56, %v3427_v9  ;;  %v3429_v9 = vld [vmem:[%s4836_s5 + $0xa8] sm:$0xff] }
 0x6a7   : > { %v3525_v32 = vadd.f32 %v6219_v39, %v3491_v20  ;;  %v3524_v20 = vadd.f32 %v6219_v39, %v3490_v3 }
 0x6a9   : > { %3624 = vperm.xlu0 %4331, %v3525_v32   ;;  %v3369_v32 = vpop.xlane.xlu1 %3368 }
 0x6ac   : > { %v3385_v63 = vpop.xlane.xlu0 %3384  ;;  %v3383_v60 = vpop.xlane.xlu2 %3382 }
 0x6ad   : > { %v3494_v52 = vadd.f32 %v3462_v46, %v3385_v63  ;;  %v3493_v46 = vadd.f32 %v3461_v36, %v3383_v60  ;;  %v3430_v63 = vld [vmem:[%s4836_s5 + $0xb0] sm:$0xff]  ;;  %v3460_v60 = vmul.f32 %v6215_v56, %v3426_v26  ;;  %v3463_v36 = vmul.f32 %v6215_v56, %v3429_v9 }
 0x6af   : > { %v3528_v2 = vadd.f32 %v6219_v39, %v3494_v52  ;;  %v3527_v13 = vadd.f32 %v6219_v39, %v3493_v46  ;;  %v3432_v46 = vld [vmem:[%s4836_s5 + $0xc0] sm:$0xff] }
 0x6b1   : > { %3633 = vperm.xlu0 %4331, %v3528_v2   ;;  %v3464_v2 = vmul.f32 %v6215_v56, %v3430_v63 }
 0x6b4   : > { %v3391_v57 = vpop.xlane.xlu0 %3390  ;;  %v3389_v52 = vpop.xlane.xlu2 %3388 }
 0x6b5   : > { %v3497_v22 = vadd.f32 %v3465_v42, %v3391_v57  ;;  %v3375_v42 = vpop.xlane.xlu1 %3374  ;;  %v3496_v57 = vadd.f32 %v3464_v2, %v3389_v52  ;;  %v3466_v52 = vmul.f32 %v6215_v56, %v3432_v46  ;;  %v3435_v2 = vld [vmem:[%s4836_s5 + $0xd8] sm:$0xff] }
 0x6b7   : > { %v3531_v25 = vadd.f32 %v6219_v39, %v3497_v22  ;;  %v3433_v22 = vld [vmem:[%s4836_s5 + $0xc8] sm:$0xff] }
 0x6b9   : > { %3642 = vperm.xlu0 %4331, %v3531_v25   ;;  %v3530_v25 = vadd.f32 %v6219_v39, %v3496_v57  ;;  %v3469_v57 = vmul.f32 %v6215_v56, %v3435_v2  ;;  %v3699_v2 = vadd.s32 4294967232, %v6293_v7 }
 0x6bc   : > { %v3397_v17 = vpop.xlane.xlu0 %3396  ;;  %v3395_v6 = vpop.xlane.xlu2 %3394 }
 0x6bd   : > { %v3500_v43 = vadd.f32 %v3468_v62, %v3397_v17  ;;  %v3467_v62 = vmul.f32 %v6215_v56, %v3433_v22  ;;  %v3381_v24 = vpop.xlane.xlu1 %3380 }
 0x6be   : > { %v3492_v3 = vadd.f32 %v3460_v60, %v3381_v24  ;;  %v3439_v24 = vld [vmem:[%s4836_s5 + $0xf8] sm:$0xff] }
 0x6bf   : > { %v3534_v35 = vadd.f32 %v6219_v39, %v3500_v43  ;;  %v3499_v17 = vadd.f32 %v3467_v62, %v3395_v6  ;;  %v3436_v43 = vld [vmem:[%s4836_s5 + $0xe0] sm:$0xff]  ;;  %v3438_v6 = vld [vmem:[%s4836_s5 + $0xf0] sm:$0xff] }
 0x6c0   : > { %v3472_v62 = vmul.f32 %v6215_v56, %v3438_v6 }
 0x6c1   : > { %3651 = vperm.xlu0 %4331, %v3534_v35   ;;  %v3533_v35 = vadd.f32 %v6219_v39, %v3499_v17 }
 0x6c4   : > { %v3403_v18 = vpop.xlane.xlu0 %3402 }
 0x6c5   : > { %v3503_v51 = vadd.f32 %v3471_v21, %v3403_v18  ;;  %v3470_v21 = vmul.f32 %v6215_v56, %v3436_v43  ;;  %v3401_v18 = vpop.xlane.xlu2 %3400 }
 0x6c7   : > { %v3537_v19 = vadd.f32 %v6219_v39, %v3503_v51  ;;  %v3502_v51 = vadd.f32 %v3470_v21, %v3401_v18 }
 0x6c9   : > { %3660 = vperm.xlu0 %4331, %v3537_v19   ;;  %v3387_v19 = vpop.xlane.xlu1 %3386 }
 0x6d7   : > { %v3271_v28 = vpop.permute.xlu0 %3270 }
 0x6d8   : > { %v3308_v33 = vmul.f32 %v3271_v28, %v3116_v15  ;;  %v3536_v15 = vadd.f32 %v6219_v39, %v3502_v51  ;;  %v3393_v28 = vpop.xlane.xlu1 %3392 }
 0x6da   : > { %v3342_v53 = vmul.f32 %v6183_v4, %v3308_v33 }
 0x6dc   : > { %3404 = vadd.xlane.f32.xlu1 %v3342_v53 }
 0x6e0   : > { %v3399_v33 = vpop.xlane.xlu1 %3398 }
 0x6e1   : > { %v3501_v22 = vadd.f32 %v3469_v57, %v3399_v33 }
 0x6eb   : > { %v3574_v38 = vpop.permute.xlu0 %3573 }
 0x6ec   : > { %v3670_v14 = vperm.slane %v3574_v38, %v6293_v7 }
 0x6f5   : > { %3275 = vperm.xlu1 %4332, %v4398_v61  }
 0x6fd   : > { %3576 = vperm.xlu1 %4332, %v3509_v5  }
 0x705   : > { %3585 = vperm.xlu1 %4332, %v3512_v37   ;;  %v3414_v37 = vld [vmem:[%s4836_s5 + $0x30] sm:$0xff] }
 0x706   : > { %v3448_v40 = vmul.f32 %v6215_v56, %v3414_v37 }
 0x70d   : > { %3594 = vperm.xlu1 %4332, %v3515_v44   ;;  %v3480_v44 = vadd.f32 %v3448_v40, %v6270_v27 }
 0x70f   : > { %v3514_v29 = vadd.f32 %v6219_v39, %v3480_v44  ;;  %v3679_v44 = vadd.s32 4294967272, %v6293_v7 }
 0x715   : > { %3603 = vperm.xlu1 %4332, %v3518_v30   ;;  %v3517_v30 = vadd.f32 %v6219_v39, %v3483_v54 }
 0x71d   : > { %3612 = vperm.xlu1 %4332, %v3521_v55   ;;  %v3489_v55 = vadd.f32 %v3457_v8, %v3375_v42 }
 0x71f   : > { %v3523_v31 = vadd.f32 %v6219_v39, %v3489_v55 }
 0x725   : > { %3621 = vperm.xlu1 %4332, %v3524_v20   ;;  %v3526_v20 = vadd.f32 %v6219_v39, %v3492_v3 }
 0x72d   : > { %3630 = vperm.xlu1 %4332, %v3527_v13   ;;  %v3498_v13 = vadd.f32 %v3466_v52, %v3393_v28 }
 0x72f   : > { %v3532_v42 = vadd.f32 %v6219_v39, %v3498_v13 }
 0x735   : > { %3639 = vperm.xlu1 %4332, %v3530_v25   ;;  %v3535_v25 = vadd.f32 %v6219_v39, %v3501_v22 }
 0x73d   : > { %3648 = vperm.xlu1 %4332, %v3533_v35   ;;  %v3473_v35 = vmul.f32 %v6215_v56, %v3439_v24 }
 0x745   : > { %3657 = vperm.xlu1 %4332, %v3536_v15   ;;  %v3583_v15 = vpop.permute.xlu0 %3582 }
 0x74f   : > { %v3405_v53 = vpop.xlane.xlu1 %3404 }
 0x750   : > { %v3504_v17 = vadd.f32 %v3472_v62, %v3405_v53 }
 0x752   : > { %v3538_v43 = vadd.f32 %v6219_v39, %v3504_v17 }
 0x767   : > { %v3276_v48 = vpop.permute.xlu1 %3275 }
 0x768   : > { %v3309_v61 = vmul.f32 %v3276_v48, %v3117_v49  ;;  %v3589_v49 = vpop.permute.xlu0 %3588 }
 0x76a   : > { %v3343_v50 = vmul.f32 %v6183_v4, %v3309_v61  ;;  %v3444_v4 = vmul.f32 %v6215_v56, %v3410_v34 }
 0x76c   : > { %3406 = vadd.xlane.f32.xlu2 %v3343_v50  ;;  %v3476_v23 = vadd.f32 %v3444_v4, %v6264_v47  ;;  %v3420_v47 = vld [vmem:[%s4836_s5 + $0x60] sm:$0xff] }
 0x76d   : > { %v3454_v45 = vmul.f32 %v6215_v56, %v3420_v47 }
 0x76e   : > { %v3510_v1 = vadd.f32 %v6219_v39, %v3476_v23  ;;  %v3675_v23 = vadd.s32 4294967280, %v6293_v7 }
 0x76f   : > { %v3577_v5 = vpop.permute.xlu1 %3576  ;;  %v3486_v59 = vadd.f32 %v3454_v45, %v3369_v32  ;;  %v3495_v32 = vadd.f32 %v3463_v36, %v3387_v19 }
 0x770   : > { %v3672_v12 = vperm.slane %v3577_v5, %v6296_v16  ;;  %v6341_v53 = vpop.permute.xlu0 %3597 }
 0x771   : > { %v3520_v27 = vadd.f32 %v6219_v39, %v3486_v59  ;;  %v3529_v63 = vadd.f32 %v6219_v39, %v3495_v32  ;;  %v3683_v59 = vadd.s32 4294967264, %v6293_v7 }
 0x772   : > { %v6301_v41 = vsel %vm3673_vm2, %v3672_v12, %v3670_v14 }
 0x777   : > { %v3586_v28 = vpop.permute.xlu1 %3585 }
 0x778   : > { %v6347_v56 = vpop.permute.xlu0 %3606  ;;  %v3684_v60 = vperm.slane %v3586_v28, %v3683_v59 }
 0x77f   : > { %v3595_v48 = vpop.permute.xlu1 %3594 }
 0x780   : > { %v6353_v5 = vpop.permute.xlu0 %3615 }
 0x784   : > { %3579 = vperm.xlu2 %4333, %v3510_v1  }
 0x787   : > { %v6343_v61 = vpop.permute.xlu1 %3603 }
 0x788   : > { %v3625_v34 = vpop.permute.xlu0 %3624 }
 0x789   : > { %v3732_v0 = vperm.slane %v3625_v34, %v6296_v16  ;;  %v3691_v16 = vadd.s32 4294967248, %v6293_v7  ;;  %v3715_v34 = vadd.s32 4294967200, %v6293_v7 }
 0x78c   : > { %3591 = vperm.xlu2 %4333, %v3514_v29  }
 0x78f   : > { %v6349_v38 = vpop.permute.xlu1 %3612 }
 0x790   : > { %v3634_v1 = vpop.permute.xlu0 %3633 }
 0x794   : > { %3600 = vperm.xlu2 %4333, %v3517_v30   ;;  %v3680_v30 = vperm.slane %v3583_v15, %v3679_v44  ;;  %v3707_v15 = vadd.s32 4294967216, %v6293_v7 }
 0x797   : > { %v3622_v14 = vpop.permute.xlu1 %3621 }
 0x798   : > { %v3731_v10 = vperm.slane %v3622_v14, %v6293_v7 }
 0x79a   : > { %v3733_v45 = vsel %vm3673_vm2, %v3732_v0, %v3731_v10  ;;  %v3719_v10 = vadd.s32 4294967192, %v6293_v7  ;;  %v3727_v0 = vadd.s32 4294967176, %v6293_v7 }
 0x79c   : > { %3609 = vperm.xlu2 %4333, %v3520_v27   ;;  %v3687_v27 = vadd.s32 4294967256, %v6293_v7 }
 0x79e   : > { %v3688_v32 = vperm.slane %v3589_v49, %v3687_v27  ;;  %v3711_v49 = vadd.s32 4294967208, %v6293_v7 }
 0x79f   : > { %v3631_v4 = vpop.permute.xlu1 %3630 }
 0x7a0   : > { %v3736_v8 = vperm.slane %v3631_v4, %v3679_v44 }
 0x7a4   : > { %3618 = vperm.xlu2 %4333, %v3523_v31   ;;  %v3643_v31 = vpop.permute.xlu0 %3642 }
 0x7a7   : > { %v3640_v54 = vpop.permute.xlu1 %3639 }
 0x7ac   : > { %3627 = vperm.xlu2 %4333, %v3526_v20   ;;  %v3738_v20 = vperm.slane %v3634_v1, %v3683_v59 }
 0x7af   : > { %v3649_v57 = vpop.permute.xlu1 %3648 }
 0x7b4   : > { %3636 = vperm.xlu2 %4333, %v3529_v63   ;;  %v3695_v63 = vadd.s32 4294967240, %v6293_v7 }
 0x7b6   : > { %v3696_v6 = vperm.slane %v3595_v48, %v3695_v63 }
 0x7bc   : > { %3645 = vperm.xlu2 %4333, %v3532_v42   ;;  %v3742_v42 = vperm.slane %v3640_v54, %v3691_v16 }
 0x7c4   : > { %3654 = vperm.xlu2 %4333, %v3535_v25   ;;  %v3703_v25 = vadd.s32 4294967224, %v6293_v7 }
 0x7c6   : > { %v3748_v48 = vperm.slane %v3649_v57, %v3703_v25 }
 0x7cc   : > { %3663 = vperm.xlu2 %4333, %v3538_v43   ;;  %v3744_v43 = vperm.slane %v3643_v31, %v3695_v63 }
 0x7df   : > { %v3407_v21 = vpop.xlane.xlu2 %3406 }
 0x7e0   : > { %v3505_v18 = vadd.f32 %v3473_v35, %v3407_v21 }
 0x7e2   : > { %v3539_v51 = vadd.f32 %v6219_v39, %v3505_v18  ;;  %v3700_v18 = vperm.slane %v6341_v53, %v3699_v2  ;;  %v3658_v53 = vpop.permute.xlu1 %3657 }
 0x7e4   : > { %3666 = vperm.xlu1 %4332, %v3539_v51   ;;  %v3652_v51 = vpop.permute.xlu0 %3651 }
 0x7e7   : > { %v3580_v19 = vpop.permute.xlu2 %3579 }
 0x7e8   : > { %v3676_v40 = vperm.slane %v3580_v19, %v3675_v23 }
 0x7ea   : > { %v3678_v47 = vsel %vm3677_vm3, %v3676_v40, %v6301_v41  ;;  %v3712_v40 = vperm.slane %v6347_v56, %v3711_v49 }
 0x7eb   : > { %v3682_v55 = vsel %vm3681_vm4, %v3680_v30, %v3678_v47  ;;  %v3723_v47 = vadd.s32 4294967184, %v6293_v7 }
 0x7ec   : > { %v3686_v41 = vsel %vm3685_vm5, %v3684_v60, %v3682_v55  ;;  %v3661_v30 = vpop.permute.xlu0 %3660 }
 0x7ed   : > { %v3690_v52 = vsel %vm3689_vm6, %v3688_v32, %v3686_v41  ;;  %v3756_v56 = vperm.slane %v3661_v30, %v3719_v10 }
 0x7ef   : > { %v3592_v33 = vpop.permute.xlu2 %3591 }
 0x7f0   : > { %v3692_v36 = vperm.slane %v3592_v33, %v3691_v16 }
 0x7f2   : > { %v3694_v22 = vsel %vm3693_vm7, %v3692_v36, %v3690_v52 }
 0x7f3   : > { %v3698_v24 = vsel %vm3697_vm8, %v3696_v6, %v3694_v22 }
 0x7f4   : > { %v3702_v28 = vsel %vm3701_vm9, %v3700_v18, %v3698_v24 }
 0x7f7   : > { %v6339_v58 = vpop.permute.xlu2 %3600 }
 0x7f8   : > { %v3704_v35 = vperm.slane %v6339_v58, %v3703_v25 }
 0x7fa   : > { %v3706_v14 = vsel %vm3705_vm10, %v3704_v35, %v3702_v28 }
 0x7ff   : > { %v6345_v50 = vpop.permute.xlu2 %3609 }
 0x800   : > { %v3716_v1 = vperm.slane %v6345_v50, %v3715_v34 }
 0x807   : > { %v6351_v39 = vpop.permute.xlu2 %3618 }
 0x808   : > { %v3728_v55 = vperm.slane %v6351_v39, %v3727_v0 }
 0x80f   : > { %v3628_v12 = vpop.permute.xlu2 %3627 }
 0x810   : > { %v3734_v29 = vperm.slane %v3628_v12, %v3675_v23  ;;  %v3708_v12 = vperm.slane %v6343_v61, %v3707_v15  ;;  %v3750_v23 = vperm.slane %v3652_v51, %v3707_v15 }
 0x812   : > { %v3735_v11 = vsel %vm3677_vm3, %v3734_v29, %v3733_v45  ;;  %v3754_v45 = vperm.slane %v3658_v53, %v3715_v34 }
 0x813   : > { %v3737_v3 = vsel %vm3681_vm4, %v3736_v8, %v3735_v11  ;;  %v3720_v11 = vperm.slane %v6349_v38, %v3719_v10 }
 0x814   : > { %v3739_v46 = vsel %vm3685_vm5, %v3738_v20, %v3737_v3 }
 0x817   : > { %v3637_v37 = vpop.permute.xlu2 %3636 }
 0x818   : > { %v3740_v9 = vperm.slane %v3637_v37, %v3687_v27  ;;  %v3710_v37 = vsel %vm3709_vm11, %v3708_v12, %v3706_v14 }
 0x819   : > { %v3714_v29 = vsel %vm3713_vm12, %v3712_v40, %v3710_v37 }
 0x81a   : > { %v3741_v13 = vsel %vm3689_vm6, %v3740_v9, %v3739_v46  ;;  %v3718_v59 = vsel %vm3717_vm13, %v3716_v1, %v3714_v29 }
 0x81b   : > { %v3743_v62 = vsel %vm3693_vm7, %v3742_v42, %v3741_v13  ;;  %v3722_v8 = vsel %vm3721_vm14, %v3720_v11, %v3718_v59 }
 0x81c   : > { %v3745_v19 = vsel %vm3697_vm8, %v3744_v43, %v3743_v62 }
 0x81f   : > { %v3646_v26 = vpop.permute.xlu2 %3645 }
 0x820   : > { %v3746_v17 = vperm.slane %v3646_v26, %v3699_v2  ;;  %v3724_v26 = vperm.slane %v6353_v5, %v3723_v47 }
 0x822   : > { %v3747_v33 = vsel %vm3701_vm9, %v3746_v17, %v3745_v19  ;;  %v3726_v16 = vsel %vm3725_vm15, %v3724_v26, %v3722_v8 }
 0x823   : > { %v3749_v58 = vsel %vm3705_vm10, %v3748_v48, %v3747_v33  ;;  %v3730_v9 = vsel %vm3729_vm0, %v3728_v55, %v3726_v16 }
 0x824   : > { %v3751_v44 = vsel %vm3709_vm11, %v3750_v23, %v3749_v58 }
 0x827   : > { %v3655_v21 = vpop.permute.xlu2 %3654 }
 0x828   : > { %v3752_v4 = vperm.slane %v3655_v21, %v3711_v49 }
 0x82a   : > { %v3753_v61 = vsel %vm3713_vm12, %v3752_v4, %v3751_v44 }
 0x82b   : > { %v3755_v50 = vsel %vm3717_vm13, %v3754_v45, %v3753_v61 }
 0x82c   : > { %v3757_v60 = vsel %vm3721_vm14, %v3756_v56, %v3755_v50 }
 0x82f   : > { %v3664_v54 = vpop.permute.xlu2 %3663 }
 0x830   : > { %v3758_v27 = vperm.slane %v3664_v54, %v3723_v47 }
 0x832   : > { %v3759_v3 = vsel %vm3725_vm15, %v3758_v27, %v3757_v60 }
 0x856   : > { %v3667_v31 = vpop.permute.xlu1 %3666 }
 0x857   : > { %v3760_v7 = vperm.slane %v3667_v31, %v3727_v0 }
 0x859   : > { %v3761_v20 = vsel %vm3729_vm0, %v3760_v7, %v3759_v3 }
 0x85a   : > { %v3763_v38 = vsel %vm3762_vm1, %v3761_v20, %v3730_v9 }
 0x85b   : > { %3765 = vst [vmem:[%s4845_s25] sm:$0x3] %v3763_v38 }
 0x85c PF: > { %s3972_s5 = sshll.u32 %s4516_s21, 1  ;;  %s3779_s6 = sshll.u32 %s4845_s25, 4  ;;  %s3780_s6 = int_to_ptr.vmem [resolvable:$true] %s3779_s6 }
 0x85d   : > { %s3777_s3 = scalar_lea.hbm %s6436_s4, %s3972_s5  ;;  %s3767_s16 = scalar_lea.sflag [#allocation9], %s4832_s9 }
 0x85e   : > { %s3781_s14 = sshll.u32 %s3777_s3, 4  ;;  %s4434_s21 = scalar_lea.hbm %s6436_s4, 4  ;;  %s3782_s14 = int_to_ptr.hbm [resolvable:$true] %s3781_s14 }
 0x85f   : > { %s4428_s13 = sshra.s32 %s3782_s14, 4  ;;  %s4429_s13 = int_to_ptr.hbm [resolvable:$true] %s4428_s13 }
 0x860   : > { %s4430_s20 = scalar_lea.hbm %s4429_s13, 2  ;;  %p4435_p0 = scmp.lt.s32.totalorder %s4429_s13, %s6436_s4 }
 0x861   : > { %p4431_p9 = scmp.ne.s32.totalorder %s4429_s13, %s4430_s20  ;;  %p4436_p2 = scmp.lt.s32.totalorder %s4434_s21, %s4430_s20 }
 0x863   : > { %p4432_p10 = pnand %p4431_p9, %p4653_p12  ;;  %p4437_p4 = por %p4436_p2, %p4435_p0 }
 0x865   : > { %p4433_p11 = pneg %p4432_p10 }
 0x867   : > { %p4438_p5 = pnand %p4437_p4, %p4433_p11 }
 0x869   : > { %4441 = shalt.err (!%p4438_p5)
}
 0x86a   : > { %4092 = dma.vmem_to_hbm [thread:$0]  (%p4653_p12), %s3780_s6, 32, %s3782_s14, %s3767_s16  }
 0x86b PF: > { %p4104_p1 = scmp.ge.s32.totalorder %s4528_s24, 2  ;;  %s3793_s9 = sand.u32 1, %s4492_s15  }
 0x86c   : > { %s3794_s25 = scalar_lea.sflag [#allocation9], %s3793_s9 }
 0x86d   : > { %p4099_p6 = pnand %p4104_p1, %p4657_p13 }
 0x86f   : > { %p4100_p8 = pneg %p4099_p6 }
 0x871   : > { %4487 = dma.done.wait (%p4100_p8), %s3794_s25, 32  }
 0x872   : > { %4489 = vsyncadd (%p4100_p8), %s3794_s25, 4294967264  ;;  %s18_s24 = sadd.s32 1, %s4528_s24   ;;  %s6546_s0 = sld [smem:[#allocation14_spill]] }
 0x873   : > { %p15_p3 = scmp.ge.s32.totalorder %s18_s24, 6   ;;  %s6547_s15 = smov %s4504_s18 }
 0x874   : > { %s6548_s16 = smov %s4500_s17  ;;  %s6549_s17 = smov %s4637_s7 }
 0x875   : > { %s6550_s18 = smov %s4508_s19  ;;  %s6551_s19 = smov %s4648_s10 }
 0x876   : > { %s6552_s20 = smov %s4520_s22  ;;  %s6553_s21 = smov %s4524_s23 }
 0x877   : > { %s6554_s22 = smov %s6557_s27  ;;  %17 = sbr.rel (!%p15_p3) target bundleno = 10 (0xa), region = 173 }
 0x878   : > { %s6555_s23 = smov %s6546_s0 }
 0x87c   :  { %3800 = vsyncpa [#allocation9], 1 }
 0x87d   :  { %3802 = vsyncpa [#allocation9 + $0x1], 1 }
 0x87e   :  { %3803 = vsyncpa [#allocation10], 1 }
 0x87f   :  { %3805 = vsyncpa [#allocation10 + $0x1], 1 }

</bundles_post_ra>
